<compile_context>
chip_gen: v6e
topology: v6e:2x2x1
jax: 0.10.0
libtpu: 0.0.40
codegen_flags: <defaults>
</compile_context>

<pallas_src>
import functools

import jax
import jax.numpy as jnp
from jax.experimental import pallas as pl
from jax.experimental.pallas import tpu as pltpu

BN_EPS = 1e-5
_VMEM_LIMIT = 32 * 1024 * 1024       # explicit scoped-VMEM budget (safe on v5e/v6e/v7x)
_BLOCK_BUDGET = 20 * 1024 * 1024     # target bytes for all live blocks of one kernel


def _round_up(x, m):
    return ((x + m - 1) // m) * m


def _largest_divisor_leq(total, cap):
    """Largest divisor of `total` that is <= cap (at least 1)."""
    cap = max(1, min(total, cap))
    for t in range(cap, 0, -1):
        if total % t == 0:
            return t
    return 1


# ----------------------------- Pallas kernels ------------------------------

def _maxpool_kernel(x_ref, o_ref):
    """2x2/2 max pool.  x_ref: (TR, 2, Wo, 2C) bf16 -> o_ref: (TR, Wo, C) bf16."""
    c = o_ref.shape[-1]
    m = jnp.maximum(x_ref[:, 0, :, :], x_ref[:, 1, :, :])            # H-direction max
    o_ref[...] = jnp.maximum(m[..., :c], m[..., c:]).astype(o_ref.dtype)  # W-direction


def _make_conv_stats_kernel(k, th, wo, cin, cout_p):
    """Conv (stride 1) + per-image BatchNorm (sum, sumsq) accumulation.

    Grid = (N, Ho // TH); step (n, i) computes output rows [i*TH, (i+1)*TH) of
    image n as k*k accumulating MXU matmuls (M = TH*Wo, K = Cin) over static
    shifted slices of one overlapping (TH+k-1)-row padded input slab.
    """

    def kernel(x_ref, w_ref, y_ref, stat_ref, acc_ref):
        # Zero this image's stat accumulator on its first row tile.
        @pl.when(pl.program_id(1) == 0)
        def _():
            stat_ref[...] = jnp.zeros_like(stat_ref)

        # TODO(synk): for very small Cin the k*k taps could be folded into one
        # (M, k*k*Cin) matmul (deeper MXU contraction); kept as k*k accumulating
        # matmuls into the VMEM scratch for lowering robustness.
        first_tap = True
        for ki in range(k):
            for kj in range(k):
                tap = x_ref[0, ki:ki + th, kj:kj + wo, :].reshape(th * wo, cin)
                part = jnp.dot(tap, w_ref[ki * k + kj, :, :],
                               preferred_element_type=jnp.float32)
                if first_tap:
                    acc_ref[...] = part
                    first_tap = False
                else:
                    acc_ref[...] += part

        # Round to storage precision first so batch statistics are computed from
        # exactly the values that later get normalized.
        y = acc_ref[...].astype(y_ref.dtype)                  # (TH*Wo, Cout_p) bf16
        y_ref[0, :, :, :] = y.reshape(th, wo, cout_p)

        yf = y.astype(jnp.float32)
        stat_ref[0, 0:1, :] = stat_ref[0, 0:1, :] + jnp.sum(yf, axis=0, keepdims=True)
        stat_ref[0, 1:2, :] = stat_ref[0, 1:2, :] + jnp.sum(yf * yf, axis=0,
                                                            keepdims=True)

    return kernel


def _bn_relu_kernel(y_ref, scale_ref, shift_ref, o_ref):
    """Fused BN normalize (pre-folded scale/shift) + ReLU, row tiled, lane dense."""
    y = y_ref[...].astype(jnp.float32)
    o_ref[...] = jnp.maximum(y * scale_ref[...] + shift_ref[...], 0.0).astype(o_ref.dtype)


# ------------------------------ JAX wrappers --------------------------------

def maxpool2x2_nhwc(x):
    """MaxPool2d(2, 2) on NHWC bf16 input -> bf16 pooled output."""
    n, h, w, c = x.shape
    ho, wo = h // 2, w // 2
    x = x[:, :2 * ho, :2 * wo, :]                 # floor behaviour for odd H/W
    xr = x.reshape(n * ho, 2, wo, 2 * c)          # free reshape (no data movement)
    rows = n * ho
    # per-row bytes of (input + output) blocks, double-buffered, bf16
    bytes_per_row = (2 * wo * 2 * c + wo * c) * 2 * 2
    tr = _largest_divisor_leq(rows, _BLOCK_BUDGET // max(1, bytes_per_row))
    out = pl.pallas_call(
        _maxpool_kernel,
        grid=(rows // tr,),
        in_specs=[pl.BlockSpec((tr, 2, wo, 2 * c), lambda r: (r, 0, 0, 0))],
        out_specs=pl.BlockSpec((tr, wo, c), lambda r: (r, 0, 0)),
        out_shape=jax.ShapeDtypeStruct((rows, wo, c), jnp.bfloat16),
        compiler_params=pltpu.CompilerParams(
            dimension_semantics=("parallel",),
            vmem_limit_bytes=_VMEM_LIMIT),
    )(xr)
    return out.reshape(n, ho, wo, c)


def _pick_conv_row_tile(ho, wo, wp, cin, cout_p, k):
    """Largest divisor TH of Ho whose conv blocks fit the VMEM block budget."""
    def live_bytes(th):
        in_blk = (th + k - 1) * wp * cin * 2            # bf16 input slab
        out_blk = th * wo * cout_p * 2                  # bf16 conv output
        w_blk = k * k * cin * cout_p * 2                # bf16 weights (grid resident)
        stat_blk = 2 * cout_p * 4
        acc = th * wo * cout_p * 4                      # f32 scratch accumulator
        return 2 * (in_blk + out_blk + w_blk + stat_blk) + acc   # x2: double buffer
    cap = ho
    while cap > 1 and live_bytes(cap) > _BLOCK_BUDGET:
        cap -= 1
    return _largest_divisor_leq(ho, cap)


def conv_bn_stats(x_padded, w_taps, *, k):
    """Stride-1 conv + per-image BN batch-stat accumulation.

    x_padded: (N, Hp, Wp, Cin) bf16 (already spatially zero-padded).
    w_taps:   (k*k, Cin, Cout_p) bf16.
    Returns (y, stats): y (N, Ho, Wo, Cout_p) bf16 pre-BN conv output,
                        stats (N, 2, Cout_p) f32 per-image [sum; sumsq].
    """
    n, hp, wp, cin = x_padded.shape
    cout_p = w_taps.shape[-1]
    ho, wo = hp - k + 1, wp - k + 1

    th = _pick_conv_row_tile(ho, wo, wp, cin, cout_p, k)
    n_h = ho // th

    kernel = _make_conv_stats_kernel(k, th, wo, cin, cout_p)

    if n_h == 1:
        # The single row tile covers the whole padded height: plain blocked block.
        x_spec = pl.BlockSpec((1, hp, wp, cin), lambda ni, ii: (ni, 0, 0, 0))
    else:
        # Overlapping (TH+k-1)-row slabs, stride TH: element-offset indexing on H.
        x_spec = pl.BlockSpec((1, pl.Element(th + k - 1), wp, cin),
                              lambda ni, ii: (ni, ii * th, 0, 0))

    w_spec = pl.BlockSpec((k * k, cin, cout_p), lambda ni, ii: (0, 0, 0))

    y, stats = pl.pallas_call(
        kernel,
        grid=(n, n_h),
        in_specs=[x_spec, w_spec],
        out_specs=(pl.BlockSpec((1, th, wo, cout_p), lambda ni, ii: (ni, ii, 0, 0)),
                   pl.BlockSpec((1, 2, cout_p), lambda ni, ii: (ni, 0, 0))),
        out_shape=(jax.ShapeDtypeStruct((n, ho, wo, cout_p), jnp.bfloat16),
                   jax.ShapeDtypeStruct((n, 2, cout_p), jnp.float32)),
        scratch_shapes=[pltpu.VMEM((th * wo, cout_p), jnp.float32)],
        compiler_params=pltpu.CompilerParams(
            # Stats accumulate only across row tiles of the same image, so the
            # image axis can shard across TensorCores (v7x); row tiles stay
            # sequential for the resident (1, 2, Cout_p) accumulator.
            dimension_semantics=("parallel", "arbitrary"),
            vmem_limit_bytes=_VMEM_LIMIT),
    )(x_padded, w_taps)
    return y, stats


def bn_relu(y2d, scale, shift, out_dtype):
    """Row-tiled fused scale/shift + ReLU over a (R, Cout_p) lane-dense slab."""
    r, c = y2d.shape
    # bf16 in + <=f32 out, double-buffered (conservative byte estimate per row).
    bytes_per_row = 2 * c * (2 + 4)
    tr = _largest_divisor_leq(r, _BLOCK_BUDGET // max(1, bytes_per_row))
    return pl.pallas_call(
        _bn_relu_kernel,
        grid=(r // tr,),
        in_specs=[pl.BlockSpec((tr, c), lambda i: (i, 0)),
                  pl.BlockSpec((1, c), lambda i: (0, 0)),
                  pl.BlockSpec((1, c), lambda i: (0, 0))],
        out_specs=pl.BlockSpec((tr, c), lambda i: (i, 0)),
        out_shape=jax.ShapeDtypeStruct((r, c), out_dtype),
        compiler_params=pltpu.CompilerParams(
            dimension_semantics=("parallel",),
            vmem_limit_bytes=_VMEM_LIMIT),
    )(y2d, scale.reshape(1, c), shift.reshape(1, c))


def _prep_conv_weights(w_oikk, cin_pad, cout_pad):
    """PyTorch (O, I, Kh, Kw) -> per-tap (K*K, cin_pad, cout_pad) bf16 matrices."""
    o, i, k, _ = w_oikk.shape
    w = jnp.transpose(w_oikk, (2, 3, 1, 0)).reshape(k * k, i, o)
    w = jnp.pad(w, ((0, 0), (0, cin_pad - i), (0, cout_pad - o)))
    return w.astype(jnp.bfloat16)


def _bn_scale_shift(stats, gamma_p, beta_p, count):
    """Fold training-mode BN (biased batch variance) into one scale/shift per channel."""
    s = jnp.sum(stats, axis=0)                     # reduce per-image partials -> (2, Cp)
    mean = s[0] / count
    # TODO(synk): E[x^2]-E[x]^2 in f32 (with per-image partial sums) is the simple
    # tiled formulation; switch to a centered/Welford accumulation if activations
    # become very large in magnitude.
    var = jnp.maximum(s[1] / count - mean * mean, 0.0)
    inv = jax.lax.rsqrt(var + BN_EPS)
    scale = gamma_p * inv
    shift = beta_p - mean * scale
    return scale, shift


def init_unet_down_conv_params(key, in_channels, out_channels, kernel_size):
    """Deterministic parameter init mirroring UNetBaseConv.__init__."""
    k1, k2, k3, k4 = jax.random.split(key, 4)
    std = jnp.sqrt(2.0 / (kernel_size * kernel_size * in_channels))
    return {
        "conv1_w": std * jax.random.normal(
            k1, (out_channels, in_channels, kernel_size, kernel_size), jnp.float32),
        # Conv biases are kept for parameter parity with nn.Conv2d but are NOT
        # applied: training-mode BatchNorm subtracts the batch mean right after
        # the conv, so a per-channel bias cancels exactly.
        "conv1_b": 0.01 * jax.random.normal(k2, (out_channels,), jnp.float32),
        # NOTE: reference code (re)uses std based on in_channels for conv2 too.
        "conv2_w": std * jax.random.normal(
            k3, (out_channels, out_channels, kernel_size, kernel_size), jnp.float32),
        "conv2_b": 0.01 * jax.random.normal(k4, (out_channels,), jnp.float32),
        # Shared BatchNorm2d affine params (PyTorch default init).
        "bn_gamma": jnp.ones((out_channels,), jnp.float32),
        "bn_beta": jnp.zeros((out_channels,), jnp.float32),
    }


@functools.partial(jax.jit, static_argnames=("stride", "pad"))
def unet_down_conv_forward(x_nchw, params, *, stride, pad):
    """Forward of UNetDownConv.  Input/output in NCHW (PyTorch convention)."""
    if stride != 1:
        # TODO(synk): strided conv (stride != 1) not implemented in this kernel.
        raise NotImplementedError("only stride=1 convolutions are supported")

    n, cin, h, w = x_nchw.shape
    cout, _, k, _ = params["conv1_w"].shape
    cp = _round_up(cout, 128)                      # lane-dense (padded) channel width

    # NCHW -> NHWC and cast to bf16 in one XLA pass; max is rounding-monotone so
    # cast-then-pool equals pool-then-cast for the bf16 pooled output.
    x = jnp.transpose(x_nchw, (0, 2, 3, 1)).astype(jnp.bfloat16)
    pooled = maxpool2x2_nhwc(x)                    # (N, H/2, W/2, Cin) bf16
    hq, wq = h // 2, w // 2

    gamma_p = jnp.pad(params["bn_gamma"], (0, cp - cout)).astype(jnp.float32)
    beta_p = jnp.pad(params["bn_beta"], (0, cp - cout)).astype(jnp.float32)

    # --- conv1 + BN (batch stats) + ReLU ---
    w1 = _prep_conv_weights(params["conv1_w"], cin, cp)
    # TODO(synk): the two jnp.pad HBM passes (and the first bn_relu round trip)
    # could be folded into the producing/consuming Pallas kernels; kept as plain
    # XLA passes here for robustness.
    x1p = jnp.pad(pooled, ((0, 0), (pad, pad), (pad, pad), (0, 0)))
    y1, s1 = conv_bn_stats(x1p, w1, k=k)
    ho1, wo1 = hq + 2 * pad - k + 1, wq + 2 * pad - k + 1
    scale1, shift1 = _bn_scale_shift(s1, gamma_p, beta_p, float(n * ho1 * wo1))
    a1 = bn_relu(y1.reshape(n * ho1 * wo1, cp), scale1, shift1, jnp.bfloat16)
    a1 = a1.reshape(n, ho1, wo1, cp)

    # --- conv2 + BN (batch stats, shared affine params) + ReLU ---
    w2 = _prep_conv_weights(params["conv2_w"], cp, cp)
    x2p = jnp.pad(a1, ((0, 0), (pad, pad), (pad, pad), (0, 0)))
    y2, s2 = conv_bn_stats(x2p, w2, k=k)
    ho2, wo2 = ho1 + 2 * pad - k + 1, wo1 + 2 * pad - k + 1
    scale2, shift2 = _bn_scale_shift(s2, gamma_p, beta_p, float(n * ho2 * wo2))
    out = bn_relu(y2.reshape(n * ho2 * wo2, cp), scale2, shift2, jnp.float32)
    out = out.reshape(n, ho2, wo2, cp)[..., :cout]     # drop channel padding

    return jnp.transpose(out, (0, 3, 1, 2))            # NHWC -> NCHW

# TODO(synk): BatchNorm running_mean/running_var updates are stateful training
# bookkeeping that does not affect the training-mode forward output; not materialized.


if __name__ == "__main__":
    in_channels, out_channels = 4, 8
    kernel_size, stride, padding = 3, 1, 1

    key = jax.random.PRNGKey(0)
    k_x, k_p = jax.random.split(key)
    x = jax.random.normal(k_x, (2, in_channels, 16, 16), dtype=jnp.float32)
    params = init_unet_down_conv_params(k_p, in_channels, out_channels, kernel_size)

    y = unet_down_conv_forward(x, params, stride=stride, pad=padding)
    y = jax.block_until_ready(y)

    assert y.shape == (2, out_channels, 8, 8), y.shape
    assert bool(jnp.all(y >= 0.0)), "ReLU output must be non-negative"
    print("KERNEL_OK")
</pallas_src>

<mosaic_0001>
module attributes {stable_mosaic.version = 11 : i64} {
  func.func @_maxpool_kernel(%arg0: i32, %arg1: memref<16x2x8x8xbf16, #tpu.memory_space<vmem>>, %arg2: memref<16x8x4xbf16, #tpu.memory_space<vmem>>) attributes {dimension_semantics = [#tpu.dimension_semantics<parallel>], iteration_bounds = array<i64: 1>, scalar_prefetch = 0 : i64, scratch_operands = 0 : i64, tpu.core_type = #tpu.core_type<tc>, window_params = [{transform_indices = @transform_0, window_bounds = array<i64: 16, 2, 8, 8>}, {transform_indices = @transform_1, window_bounds = array<i64: 16, 8, 4>}]} {
    %c0 = arith.constant 0 : index
    %c0_0 = arith.constant 0 : index
    %c0_1 = arith.constant 0 : index
    %c0_2 = arith.constant 0 : index
    %0 = vector.load %arg1[%c0, %c0_0, %c0_1, %c0_2] : memref<16x2x8x8xbf16, #tpu.memory_space<vmem>>, vector<16x1x8x8xbf16>
    %1 = vector.shape_cast %0 : vector<16x1x8x8xbf16> to vector<16x8x8xbf16>
    %c0_3 = arith.constant 0 : index
    %c1 = arith.constant 1 : index
    %c0_4 = arith.constant 0 : index
    %c0_5 = arith.constant 0 : index
    %2 = vector.load %arg1[%c0_3, %c1, %c0_4, %c0_5] : memref<16x2x8x8xbf16, #tpu.memory_space<vmem>>, vector<16x1x8x8xbf16>
    %3 = vector.shape_cast %2 : vector<16x1x8x8xbf16> to vector<16x8x8xbf16>
    %4 = arith.maximumf %1, %3 : vector<16x8x8xbf16>
    %5 = vector.extract_strided_slice %4 {offsets = [0, 0, 0], sizes = [16, 8, 4], strides = [1, 1, 1]} : vector<16x8x8xbf16> to vector<16x8x4xbf16>
    %6 = vector.extract_strided_slice %4 {offsets = [0, 0, 4], sizes = [16, 8, 4], strides = [1, 1, 1]} : vector<16x8x8xbf16> to vector<16x8x4xbf16>
    %7 = arith.maximumf %5, %6 : vector<16x8x4xbf16>
    %c0_6 = arith.constant 0 : index
    %c0_7 = arith.constant 0 : index
    %c0_8 = arith.constant 0 : index
    %8 = vector.load %arg2[%c0_6, %c0_7, %c0_8] : memref<16x8x4xbf16, #tpu.memory_space<vmem>>, vector<16x8x4xbf16>
    tpu.vector_store %arg2[%c0_6, %c0_7, %c0_8], %7 {strides = array<i32>} : memref<16x8x4xbf16, #tpu.memory_space<vmem>>, vector<16x8x4xbf16>,
    return
  }
  func.func @transform_0(%arg0: i32) -> (i32, i32, i32, i32) {
    %c0_i32 = arith.constant 0 : i32
    %c0_i32_0 = arith.constant 0 : i32
    %c0_i32_1 = arith.constant 0 : i32
    %c0_i32_2 = arith.constant 0 : i32
    return %arg0, %c0_i32, %c0_i32_0, %c0_i32_1 : i32, i32, i32, i32
  }
  func.func @transform_1(%arg0: i32) -> (i32, i32, i32) {
    %c0_i32 = arith.constant 0 : i32
    %c0_i32_0 = arith.constant 0 : i32
    %c0_i32_1 = arith.constant 0 : i32
    return %arg0, %c0_i32, %c0_i32_0 : i32, i32, i32
  }
}

module attributes {stable_mosaic.version = 11 : i64} {
  func.func @kernel(%arg0: i32, %arg1: i32, %arg2: memref<1x10x10x4xbf16, #tpu.memory_space<vmem>>, %arg3: memref<9x4x128xbf16, #tpu.memory_space<vmem>>, %arg4: memref<1x8x8x128xbf16, #tpu.memory_space<vmem>>, %arg5: memref<1x2x128xf32, #tpu.memory_space<vmem>>, %arg6: memref<64x128xf32, #tpu.memory_space<vmem>>) attributes {dimension_semantics = [#tpu.dimension_semantics<parallel>, #tpu.dimension_semantics<arbitrary>], iteration_bounds = array<i64: 2, 1>, scalar_prefetch = 0 : i64, scratch_operands = 1 : i64, tpu.core_type = #tpu.core_type<tc>, window_params = [{transform_indices = @transform_0, window_bounds = array<i64: 1, 10, 10, 4>}, {pipeline_mode = #tpu.pipeline_mode<synchronous>, transform_indices = @transform_1, window_bounds = array<i64: 9, 4, 128>}, {transform_indices = @transform_2, window_bounds = array<i64: 1, 8, 8, 128>}, {transform_indices = @transform_3, window_bounds = array<i64: 1, 2, 128>}]} {
    %c0_i32 = arith.constant 0 : i32
    %0 = arith.cmpi eq, %arg1, %c0_i32 : i32
    %1 = arith.extui %0 : i1 to i32
    %c0_i32_0 = arith.constant 0 : i32
    %2 = arith.cmpi ne, %1, %c0_i32_0 : i32
    scf.if %2 {
      %cst_117 = arith.constant 0.000000e+00 : f32
      %106 = vector.broadcast %cst_117 : f32 to vector<1x2x128xf32>
      %c0_118 = arith.constant 0 : index
      %c0_119 = arith.constant 0 : index
      %c0_120 = arith.constant 0 : index
      %107 = vector.load %arg5[%c0_118, %c0_119, %c0_120] : memref<1x2x128xf32, #tpu.memory_space<vmem>>, vector<1x2x128xf32>
      tpu.vector_store %arg5[%c0_118, %c0_119, %c0_120], %106 {strides = array<i32>} : memref<1x2x128xf32, #tpu.memory_space<vmem>>, vector<1x2x128xf32>,
    } else {
    }
    %c0 = arith.constant 0 : index
    %c0_1 = arith.constant 0 : index
    %c0_2 = arith.constant 0 : index
    %c0_3 = arith.constant 0 : index
    %3 = vector.load %arg2[%c0, %c0_1, %c0_2, %c0_3] : memref<1x10x10x4xbf16, #tpu.memory_space<vmem>>, vector<1x8x8x4xbf16>
    %4 = vector.shape_cast %3 : vector<1x8x8x4xbf16> to vector<8x8x4xbf16>
    %5 = vector.shape_cast %4 : vector<8x8x4xbf16> to vector<64x4xbf16>
    %c0_4 = arith.constant 0 : index
    %c0_5 = arith.constant 0 : index
    %c0_6 = arith.constant 0 : index
    %6 = vector.load %arg3[%c0_4, %c0_5, %c0_6] : memref<9x4x128xbf16, #tpu.memory_space<vmem>>, vector<1x4x128xbf16>
    %7 = vector.shape_cast %6 : vector<1x4x128xbf16> to vector<4x128xbf16>
    %cst = arith.constant dense<0.000000e+00> : vector<64x128xf32>
    %8 = tpu.matmul %5, %7, %cst {dimension_numbers = #tpu.dot_dimension_numbers<[1], [0], [0], [1], [0, 0, 1, 1], [], []>} : vector<64x4xbf16>, vector<4x128xbf16>, vector<64x128xf32> -> vector<64x128xf32>
    %c0_7 = arith.constant 0 : index
    %c0_8 = arith.constant 0 : index
    %9 = vector.load %arg6[%c0_7, %c0_8] : memref<64x128xf32, #tpu.memory_space<vmem>>, vector<64x128xf32>
    tpu.vector_store %arg6[%c0_7, %c0_8], %8 {strides = array<i32>} : memref<64x128xf32, #tpu.memory_space<vmem>>, vector<64x128xf32>,
    %c0_9 = arith.constant 0 : index
    %c0_10 = arith.constant 0 : index
    %c1 = arith.constant 1 : index
    %c0_11 = arith.constant 0 : index
    %10 = vector.load %arg2[%c0_9, %c0_10, %c1, %c0_11] : memref<1x10x10x4xbf16, #tpu.memory_space<vmem>>, vector<1x8x8x4xbf16>
    %11 = vector.shape_cast %10 : vector<1x8x8x4xbf16> to vector<8x8x4xbf16>
    %12 = vector.shape_cast %11 : vector<8x8x4xbf16> to vector<64x4xbf16>
    %c1_12 = arith.constant 1 : index
    %c0_13 = arith.constant 0 : index
    %c0_14 = arith.constant 0 : index
    %13 = vector.load %arg3[%c1_12, %c0_13, %c0_14] : memref<9x4x128xbf16, #tpu.memory_space<vmem>>, vector<1x4x128xbf16>
    %14 = vector.shape_cast %13 : vector<1x4x128xbf16> to vector<4x128xbf16>
    %cst_15 = arith.constant dense<0.000000e+00> : vector<64x128xf32>
    %15 = tpu.matmul %12, %14, %cst_15 {dimension_numbers = #tpu.dot_dimension_numbers<[1], [0], [0], [1], [0, 0, 1, 1], [], []>} : vector<64x4xbf16>, vector<4x128xbf16>, vector<64x128xf32> -> vector<64x128xf32>
    %c0_16 = arith.constant 0 : index
    %c0_17 = arith.constant 0 : index
    %16 = vector.load %arg6[%c0_16, %c0_17] : memref<64x128xf32, #tpu.memory_space<vmem>>, vector<64x128xf32>
    %17 = arith.addf %16, %15 : vector<64x128xf32>
    %c0_18 = arith.constant 0 : index
    %c0_19 = arith.constant 0 : index
    %18 = vector.load %arg6[%c0_18, %c0_19] : memref<64x128xf32, #tpu.memory_space<vmem>>, vector<64x128xf32>
    tpu.vector_store %arg6[%c0_18, %c0_19], %17 {strides = array<i32>} : memref<64x128xf32, #tpu.memory_space<vmem>>, vector<64x128xf32>,
    %c0_20 = arith.constant 0 : index
    %c0_21 = arith.constant 0 : index
    %c2 = arith.constant 2 : index
    %c0_22 = arith.constant 0 : index
    %19 = vector.load %arg2[%c0_20, %c0_21, %c2, %c0_22] : memref<1x10x10x4xbf16, #tpu.memory_space<vmem>>, vector<1x8x8x4xbf16>
    %20 = vector.shape_cast %19 : vector<1x8x8x4xbf16> to vector<8x8x4xbf16>
    %21 = vector.shape_cast %20 : vector<8x8x4xbf16> to vector<64x4xbf16>
    %c2_23 = arith.constant 2 : index
    %c0_24 = arith.constant 0 : index
    %c0_25 = arith.constant 0 : index
    %22 = vector.load %arg3[%c2_23, %c0_24, %c0_25] : memref<9x4x128xbf16, #tpu.memory_space<vmem>>, vector<1x4x128xbf16>
    %23 = vector.shape_cast %22 : vector<1x4x128xbf16> to vector<4x128xbf16>
    %cst_26 = arith.constant dense<0.000000e+00> : vector<64x128xf32>
    %24 = tpu.matmul %21, %23, %cst_26 {dimension_numbers = #tpu.dot_dimension_numbers<[1], [0], [0], [1], [0, 0, 1, 1], [], []>} : vector<64x4xbf16>, vector<4x128xbf16>, vector<64x128xf32> -> vector<64x128xf32>
    %c0_27 = arith.constant 0 : index
    %c0_28 = arith.constant 0 : index
    %25 = vector.load %arg6[%c0_27, %c0_28] : memref<64x128xf32, #tpu.memory_space<vmem>>, vector<64x128xf32>
    %26 = arith.addf %25, %24 : vector<64x128xf32>
    %c0_29 = arith.constant 0 : index
    %c0_30 = arith.constant 0 : index
    %27 = vector.load %arg6[%c0_29, %c0_30] : memref<64x128xf32, #tpu.memory_space<vmem>>, vector<64x128xf32>
    tpu.vector_store %arg6[%c0_29, %c0_30], %26 {strides = array<i32>} : memref<64x128xf32, #tpu.memory_space<vmem>>, vector<64x128xf32>,
    %c0_31 = arith.constant 0 : index
    %c1_32 = arith.constant 1 : index
    %c0_33 = arith.constant 0 : index
    %c0_34 = arith.constant 0 : index
    %28 = vector.load %arg2[%c0_31, %c1_32, %c0_33, %c0_34] : memref<1x10x10x4xbf16, #tpu.memory_space<vmem>>, vector<1x8x8x4xbf16>
    %29 = vector.shape_cast %28 : vector<1x8x8x4xbf16> to vector<8x8x4xbf16>
    %30 = vector.shape_cast %29 : vector<8x8x4xbf16> to vector<64x4xbf16>
    %c3 = arith.constant 3 : index
    %c0_35 = arith.constant 0 : index
    %c0_36 = arith.constant 0 : index
    %31 = vector.load %arg3[%c3, %c0_35, %c0_36] : memref<9x4x128xbf16, #tpu.memory_space<vmem>>, vector<1x4x128xbf16>
    %32 = vector.shape_cast %31 : vector<1x4x128xbf16> to vector<4x128xbf16>
    %cst_37 = arith.constant dense<0.000000e+00> : vector<64x128xf32>
    %33 = tpu.matmul %30, %32, %cst_37 {dimension_numbers = #tpu.dot_dimension_numbers<[1], [0], [0], [1], [0, 0, 1, 1], [], []>} : vector<64x4xbf16>, vector<4x128xbf16>, vector<64x128xf32> -> vector<64x128xf32>
    %c0_38 = arith.constant 0 : index
    %c0_39 = arith.constant 0 : index
    %34 = vector.load %arg6[%c0_38, %c0_39] : memref<64x128xf32, #tpu.memory_space<vmem>>, vector<64x128xf32>
    %35 = arith.addf %34, %33 : vector<64x128xf32>
    %c0_40 = arith.constant 0 : index
    %c0_41 = arith.constant 0 : index
    %36 = vector.load %arg6[%c0_40, %c0_41] : memref<64x128xf32, #tpu.memory_space<vmem>>, vector<64x128xf32>
    tpu.vector_store %arg6[%c0_40, %c0_41], %35 {strides = array<i32>} : memref<64x128xf32, #tpu.memory_space<vmem>>, vector<64x128xf32>,
    %c0_42 = arith.constant 0 : index
    %c1_43 = arith.constant 1 : index
    %c1_44 = arith.constant 1 : index
    %c0_45 = arith.constant 0 : index
    %37 = vector.load %arg2[%c0_42, %c1_43, %c1_44, %c0_45] : memref<1x10x10x4xbf16, #tpu.memory_space<vmem>>, vector<1x8x8x4xbf16>
    %38 = vector.shape_cast %37 : vector<1x8x8x4xbf16> to vector<8x8x4xbf16>
    %39 = vector.shape_cast %38 : vector<8x8x4xbf16> to vector<64x4xbf16>
    %c4 = arith.constant 4 : index
    %c0_46 = arith.constant 0 : index
    %c0_47 = arith.constant 0 : index
    %40 = vector.load %arg3[%c4, %c0_46, %c0_47] : memref<9x4x128xbf16, #tpu.memory_space<vmem>>, vector<1x4x128xbf16>
    %41 = vector.shape_cast %40 : vector<1x4x128xbf16> to vector<4x128xbf16>
    %cst_48 = arith.constant dense<0.000000e+00> : vector<64x128xf32>
    %42 = tpu.matmul %39, %41, %cst_48 {dimension_numbers = #tpu.dot_dimension_numbers<[1], [0], [0], [1], [0, 0, 1, 1], [], []>} : vector<64x4xbf16>, vector<4x128xbf16>, vector<64x128xf32> -> vector<64x128xf32>
    %c0_49 = arith.constant 0 : index
    %c0_50 = arith.constant 0 : index
    %43 = vector.load %arg6[%c0_49, %c0_50] : memref<64x128xf32, #tpu.memory_space<vmem>>, vector<64x128xf32>
    %44 = arith.addf %43, %42 : vector<64x128xf32>
    %c0_51 = arith.constant 0 : index
    %c0_52 = arith.constant 0 : index
    %45 = vector.load %arg6[%c0_51, %c0_52] : memref<64x128xf32, #tpu.memory_space<vmem>>, vector<64x128xf32>
    tpu.vector_store %arg6[%c0_51, %c0_52], %44 {strides = array<i32>} : memref<64x128xf32, #tpu.memory_space<vmem>>, vector<64x128xf32>,
    %c0_53 = arith.constant 0 : index
    %c1_54 = arith.constant 1 : index
    %c2_55 = arith.constant 2 : index
    %c0_56 = arith.constant 0 : index
    %46 = vector.load %arg2[%c0_53, %c1_54, %c2_55, %c0_56] : memref<1x10x10x4xbf16, #tpu.memory_space<vmem>>, vector<1x8x8x4xbf16>
    %47 = vector.shape_cast %46 : vector<1x8x8x4xbf16> to vector<8x8x4xbf16>
    %48 = vector.shape_cast %47 : vector<8x8x4xbf16> to vector<64x4xbf16>
    %c5 = arith.constant 5 : index
    %c0_57 = arith.constant 0 : index
    %c0_58 = arith.constant 0 : index
    %49 = vector.load %arg3[%c5, %c0_57, %c0_58] : memref<9x4x128xbf16, #tpu.memory_space<vmem>>, vector<1x4x128xbf16>
    %50 = vector.shape_cast %49 : vector<1x4x128xbf16> to vector<4x128xbf16>
    %cst_59 = arith.constant dense<0.000000e+00> : vector<64x128xf32>
    %51 = tpu.matmul %48, %50, %cst_59 {dimension_numbers = #tpu.dot_dimension_numbers<[1], [0], [0], [1], [0, 0, 1, 1], [], []>} : vector<64x4xbf16>, vector<4x128xbf16>, vector<64x128xf32> -> vector<64x128xf32>
    %c0_60 = arith.constant 0 : index
    %c0_61 = arith.constant 0 : index
    %52 = vector.load %arg6[%c0_60, %c0_61] : memref<64x128xf32, #tpu.memory_space<vmem>>, vector<64x128xf32>
    %53 = arith.addf %52, %51 : vector<64x128xf32>
    %c0_62 = arith.constant 0 : index
    %c0_63 = arith.constant 0 : index
    %54 = vector.load %arg6[%c0_62, %c0_63] : memref<64x128xf32, #tpu.memory_space<vmem>>, vector<64x128xf32>
    tpu.vector_store %arg6[%c0_62, %c0_63], %53 {strides = array<i32>} : memref<64x128xf32, #tpu.memory_space<vmem>>, vector<64x128xf32>,
    %c0_64 = arith.constant 0 : index
    %c2_65 = arith.constant 2 : index
    %c0_66 = arith.constant 0 : index
    %c0_67 = arith.constant 0 : index
    %55 = vector.load %arg2[%c0_64, %c2_65, %c0_66, %c0_67] : memref<1x10x10x4xbf16, #tpu.memory_space<vmem>>, vector<1x8x8x4xbf16>
    %56 = vector.shape_cast %55 : vector<1x8x8x4xbf16> to vector<8x8x4xbf16>
    %57 = vector.shape_cast %56 : vector<8x8x4xbf16> to vector<64x4xbf16>
    %c6 = arith.constant 6 : index
    %c0_68 = arith.constant 0 : index
    %c0_69 = arith.constant 0 : index
    %58 = vector.load %arg3[%c6, %c0_68, %c0_69] : memref<9x4x128xbf16, #tpu.memory_space<vmem>>, vector<1x4x128xbf16>
    %59 = vector.shape_cast %58 : vector<1x4x128xbf16> to vector<4x128xbf16>
    %cst_70 = arith.constant dense<0.000000e+00> : vector<64x128xf32>
    %60 = tpu.matmul %57, %59, %cst_70 {dimension_numbers = #tpu.dot_dimension_numbers<[1], [0], [0], [1], [0, 0, 1, 1], [], []>} : vector<64x4xbf16>, vector<4x128xbf16>, vector<64x128xf32> -> vector<64x128xf32>
    %c0_71 = arith.constant 0 : index
    %c0_72 = arith.constant 0 : index
    %61 = vector.load %arg6[%c0_71, %c0_72] : memref<64x128xf32, #tpu.memory_space<vmem>>, vector<64x128xf32>
    %62 = arith.addf %61, %60 : vector<64x128xf32>
    %c0_73 = arith.constant 0 : index
    %c0_74 = arith.constant 0 : index
    %63 = vector.load %arg6[%c0_73, %c0_74] : memref<64x128xf32, #tpu.memory_space<vmem>>, vector<64x128xf32>
    tpu.vector_store %arg6[%c0_73, %c0_74], %62 {strides = array<i32>} : memref<64x128xf32, #tpu.memory_space<vmem>>, vector<64x128xf32>,
    %c0_75 = arith.constant 0 : index
    %c2_76 = arith.constant 2 : index
    %c1_77 = arith.constant 1 : index
    %c0_78 = arith.constant 0 : index
    %64 = vector.load %arg2[%c0_75, %c2_76, %c1_77, %c0_78] : memref<1x10x10x4xbf16, #tpu.memory_space<vmem>>, vector<1x8x8x4xbf16>
    %65 = vector.shape_cast %64 : vector<1x8x8x4xbf16> to vector<8x8x4xbf16>
    %66 = vector.shape_cast %65 : vector<8x8x4xbf16> to vector<64x4xbf16>
    %c7 = arith.constant 7 : index
    %c0_79 = arith.constant 0 : index
    %c0_80 = arith.constant 0 : index
    %67 = vector.load %arg3[%c7, %c0_79, %c0_80] : memref<9x4x128xbf16, #tpu.memory_space<vmem>>, vector<1x4x128xbf16>
    %68 = vector.shape_cast %67 : vector<1x4x128xbf16> to vector<4x128xbf16>
    %cst_81 = arith.constant dense<0.000000e+00> : vector<64x128xf32>
    %69 = tpu.matmul %66, %68, %cst_81 {dimension_numbers = #tpu.dot_dimension_numbers<[1], [0], [0], [1], [0, 0, 1, 1], [], []>} : vector<64x4xbf16>, vector<4x128xbf16>, vector<64x128xf32> -> vector<64x128xf32>
    %c0_82 = arith.constant 0 : index
    %c0_83 = arith.constant 0 : index
    %70 = vector.load %arg6[%c0_82, %c0_83] : memref<64x128xf32, #tpu.memory_space<vmem>>, vector<64x128xf32>
    %71 = arith.addf %70, %69 : vector<64x128xf32>
    %c0_84 = arith.constant 0 : index
    %c0_85 = arith.constant 0 : index
    %72 = vector.load %arg6[%c0_84, %c0_85] : memref<64x128xf32, #tpu.memory_space<vmem>>, vector<64x128xf32>
    tpu.vector_store %arg6[%c0_84, %c0_85], %71 {strides = array<i32>} : memref<64x128xf32, #tpu.memory_space<vmem>>, vector<64x128xf32>,
    %c0_86 = arith.constant 0 : index
    %c2_87 = arith.constant 2 : index
    %c2_88 = arith.constant 2 : index
    %c0_89 = arith.constant 0 : index
    %73 = vector.load %arg2[%c0_86, %c2_87, %c2_88, %c0_89] : memref<1x10x10x4xbf16, #tpu.memory_space<vmem>>, vector<1x8x8x4xbf16>
    %74 = vector.shape_cast %73 : vector<1x8x8x4xbf16> to vector<8x8x4xbf16>
    %75 = vector.shape_cast %74 : vector<8x8x4xbf16> to vector<64x4xbf16>
    %c8 = arith.constant 8 : index
    %c0_90 = arith.constant 0 : index
    %c0_91 = arith.constant 0 : index
    %76 = vector.load %arg3[%c8, %c0_90, %c0_91] : memref<9x4x128xbf16, #tpu.memory_space<vmem>>, vector<1x4x128xbf16>
    %77 = vector.shape_cast %76 : vector<1x4x128xbf16> to vector<4x128xbf16>
    %cst_92 = arith.constant dense<0.000000e+00> : vector<64x128xf32>
    %78 = tpu.matmul %75, %77, %cst_92 {dimension_numbers = #tpu.dot_dimension_numbers<[1], [0], [0], [1], [0, 0, 1, 1], [], []>} : vector<64x4xbf16>, vector<4x128xbf16>, vector<64x128xf32> -> vector<64x128xf32>
    %c0_93 = arith.constant 0 : index
    %c0_94 = arith.constant 0 : index
    %79 = vector.load %arg6[%c0_93, %c0_94] : memref<64x128xf32, #tpu.memory_space<vmem>>, vector<64x128xf32>
    %80 = arith.addf %79, %78 : vector<64x128xf32>
    %c0_95 = arith.constant 0 : index
    %c0_96 = arith.constant 0 : index
    %81 = vector.load %arg6[%c0_95, %c0_96] : memref<64x128xf32, #tpu.memory_space<vmem>>, vector<64x128xf32>
    tpu.vector_store %arg6[%c0_95, %c0_96], %80 {strides = array<i32>} : memref<64x128xf32, #tpu.memory_space<vmem>>, vector<64x128xf32>,
    %c0_97 = arith.constant 0 : index
    %c0_98 = arith.constant 0 : index
    %82 = vector.load %arg6[%c0_97, %c0_98] : memref<64x128xf32, #tpu.memory_space<vmem>>, vector<64x128xf32>
    %83 = arith.truncf %82 : vector<64x128xf32> to vector<64x128xbf16>
    %84 = vector.shape_cast %83 : vector<64x128xbf16> to vector<8x8x128xbf16>
    %c0_99 = arith.constant 0 : index
    %c0_100 = arith.constant 0 : index
    %c0_101 = arith.constant 0 : index
    %c0_102 = arith.constant 0 : index
    %85 = vector.load %arg4[%c0_99, %c0_100, %c0_101, %c0_102] : memref<1x8x8x128xbf16, #tpu.memory_space<vmem>>, vector<1x8x8x128xbf16>
    %86 = vector.shape_cast %85 : vector<1x8x8x128xbf16> to vector<8x8x128xbf16>
    %87 = vector.shape_cast %84 : vector<8x8x128xbf16> to vector<1x8x8x128xbf16>
    tpu.vector_store %arg4[%c0_99, %c0_100, %c0_101, %c0_102], %87 {strides = array<i32>} : memref<1x8x8x128xbf16, #tpu.memory_space<vmem>>, vector<1x8x8x128xbf16>,
    %88 = arith.extf %83 : vector<64x128xbf16> to vector<64x128xf32>
    %c0_103 = arith.constant 0 : index
    %c0_104 = arith.constant 0 : index
    %c0_105 = arith.constant 0 : index
    %89 = vector.load %arg5[%c0_103, %c0_104, %c0_105] : memref<1x2x128xf32, #tpu.memory_space<vmem>>, vector<1x1x128xf32>
    %90 = vector.shape_cast %89 : vector<1x1x128xf32> to vector<1x128xf32>
    %cst_106 = arith.constant dense<0.000000e+00> : vector<128xf32>
    %91 = vector.multi_reduction <add>, %88, %cst_106 [0] : vector<64x128xf32> to vector<128xf32>
    %92 = vector.shape_cast %91 : vector<128xf32> to vector<1x128xf32>
    %93 = arith.addf %90, %92 : vector<1x128xf32>
    %c0_107 = arith.constant 0 : index
    %c0_108 = arith.constant 0 : index
    %c0_109 = arith.constant 0 : index
    %94 = vector.load %arg5[%c0_107, %c0_108, %c0_109] : memref<1x2x128xf32, #tpu.memory_space<vmem>>, vector<1x1x128xf32>
    %95 = vector.shape_cast %94 : vector<1x1x128xf32> to vector<1x128xf32>
    %96 = vector.shape_cast %93 : vector<1x128xf32> to vector<1x1x128xf32>
    tpu.vector_store %arg5[%c0_107, %c0_108, %c0_109], %96 {strides = array<i32>} : memref<1x2x128xf32, #tpu.memory_space<vmem>>, vector<1x1x128xf32>,
    %c0_110 = arith.constant 0 : index
    %c1_111 = arith.constant 1 : index
    %c0_112 = arith.constant 0 : index
    %97 = vector.load %arg5[%c0_110, %c1_111, %c0_112] : memref<1x2x128xf32, #tpu.memory_space<vmem>>, vector<1x1x128xf32>
    %98 = vector.shape_cast %97 : vector<1x1x128xf32> to vector<1x128xf32>
    %99 = arith.mulf %88, %88 : vector<64x128xf32>
    %cst_113 = arith.constant dense<0.000000e+00> : vector<128xf32>
    %100 = vector.multi_reduction <add>, %99, %cst_113 [0] : vector<64x128xf32> to vector<128xf32>
    %101 = vector.shape_cast %100 : vector<128xf32> to vector<1x128xf32>
    %102 = arith.addf %98, %101 : vector<1x128xf32>
    %c0_114 = arith.constant 0 : index
    %c1_115 = arith.constant 1 : index
    %c0_116 = arith.constant 0 : index
    %103 = vector.load %arg5[%c0_114, %c1_115, %c0_116] : memref<1x2x128xf32, #tpu.memory_space<vmem>>, vector<1x1x128xf32>
    %104 = vector.shape_cast %103 : vector<1x1x128xf32> to vector<1x128xf32>
    %105 = vector.shape_cast %102 : vector<1x128xf32> to vector<1x1x128xf32>
    tpu.vector_store %arg5[%c0_114, %c1_115, %c0_116], %105 {strides = array<i32>} : memref<1x2x128xf32, #tpu.memory_space<vmem>>, vector<1x1x128xf32>,
    return
  }
  func.func @transform_0(%arg0: i32, %arg1: i32) -> (i32, i32, i32, i32) {
    %c0_i32 = arith.constant 0 : i32
    %c0_i32_0 = arith.constant 0 : i32
    %c0_i32_1 = arith.constant 0 : i32
    %c0_i32_2 = arith.constant 0 : i32
    return %arg0, %c0_i32, %c0_i32_0, %c0_i32_1 : i32, i32, i32, i32
  }
  func.func @transform_1(%arg0: i32, %arg1: i32) -> (i32, i32, i32) {
    %c0_i32 = arith.constant 0 : i32
    %c0_i32_0 = arith.constant 0 : i32
    %c0_i32_1 = arith.constant 0 : i32
    %c0_i32_2 = arith.constant 0 : i32
    return %c0_i32, %c0_i32_0, %c0_i32_1 : i32, i32, i32
  }
  func.func @transform_2(%arg0: i32, %arg1: i32) -> (i32, i32, i32, i32) {
    %c0_i32 = arith.constant 0 : i32
    %c0_i32_0 = arith.constant 0 : i32
    %c0_i32_1 = arith.constant 0 : i32
    return %arg0, %arg1, %c0_i32, %c0_i32_0 : i32, i32, i32, i32
  }
  func.func @transform_3(%arg0: i32, %arg1: i32) -> (i32, i32, i32) {
    %c0_i32 = arith.constant 0 : i32
    %c0_i32_0 = arith.constant 0 : i32
    %c0_i32_1 = arith.constant 0 : i32
    return %arg0, %c0_i32, %c0_i32_0 : i32, i32, i32
  }
}

module attributes {stable_mosaic.version = 11 : i64} {
  func.func @_bn_relu_kernel(%arg0: i32, %arg1: memref<128x128xbf16, #tpu.memory_space<vmem>>, %arg2: memref<1x128xf32, #tpu.memory_space<vmem>>, %arg3: memref<1x128xf32, #tpu.memory_space<vmem>>, %arg4: memref<128x128xbf16, #tpu.memory_space<vmem>>) attributes {dimension_semantics = [#tpu.dimension_semantics<parallel>], iteration_bounds = array<i64: 1>, scalar_prefetch = 0 : i64, scratch_operands = 0 : i64, tpu.core_type = #tpu.core_type<tc>, window_params = [{transform_indices = @transform_0, window_bounds = array<i64: 128, 128>}, {pipeline_mode = #tpu.pipeline_mode<synchronous>, transform_indices = @transform_1, window_bounds = array<i64: 1, 128>}, {pipeline_mode = #tpu.pipeline_mode<synchronous>, transform_indices = @transform_2, window_bounds = array<i64: 1, 128>}, {transform_indices = @transform_3, window_bounds = array<i64: 128, 128>}]} {
    %c0 = arith.constant 0 : index
    %c0_0 = arith.constant 0 : index
    %0 = vector.load %arg1[%c0, %c0_0] : memref<128x128xbf16, #tpu.memory_space<vmem>>, vector<128x128xbf16>
    %1 = arith.extf %0 : vector<128x128xbf16> to vector<128x128xf32>
    %c0_1 = arith.constant 0 : index
    %c0_2 = arith.constant 0 : index
    %2 = vector.load %arg2[%c0_1, %c0_2] : memref<1x128xf32, #tpu.memory_space<vmem>>, vector<1x128xf32>
    %3 = vector.broadcast %2 : vector<1x128xf32> to vector<128x128xf32>
    %4 = arith.mulf %1, %3 : vector<128x128xf32>
    %c0_3 = arith.constant 0 : index
    %c0_4 = arith.constant 0 : index
    %5 = vector.load %arg3[%c0_3, %c0_4] : memref<1x128xf32, #tpu.memory_space<vmem>>, vector<1x128xf32>
    %6 = vector.broadcast %5 : vector<1x128xf32> to vector<128x128xf32>
    %7 = arith.addf %4, %6 : vector<128x128xf32>
    %cst = arith.constant 0.000000e+00 : f32
    %8 = vector.broadcast %cst : f32 to vector<128x128xf32>
    %9 = arith.maximumf %7, %8 : vector<128x128xf32>
    %10 = arith.truncf %9 : vector<128x128xf32> to vector<128x128xbf16>
    %c0_5 = arith.constant 0 : index
    %c0_6 = arith.constant 0 : index
    %11 = vector.load %arg4[%c0_5, %c0_6] : memref<128x128xbf16, #tpu.memory_space<vmem>>, vector<128x128xbf16>
    tpu.vector_store %arg4[%c0_5, %c0_6], %10 {strides = array<i32>} : memref<128x128xbf16, #tpu.memory_space<vmem>>, vector<128x128xbf16>,
    return
  }
  func.func @transform_0(%arg0: i32) -> (i32, i32) {
    %c0_i32 = arith.constant 0 : i32
    %c0_i32_0 = arith.constant 0 : i32
    return %arg0, %c0_i32 : i32, i32
  }
  func.func @transform_1(%arg0: i32) -> (i32, i32) {
    %c0_i32 = arith.constant 0 : i32
    %c0_i32_0 = arith.constant 0 : i32
    %c0_i32_1 = arith.constant 0 : i32
    return %c0_i32, %c0_i32_0 : i32, i32
  }
  func.func @transform_2(%arg0: i32) -> (i32, i32) {
    %c0_i32 = arith.constant 0 : i32
    %c0_i32_0 = arith.constant 0 : i32
    %c0_i32_1 = arith.constant 0 : i32
    return %c0_i32, %c0_i32_0 : i32, i32
  }
  func.func @transform_3(%arg0: i32) -> (i32, i32) {
    %c0_i32 = arith.constant 0 : i32
    %c0_i32_0 = arith.constant 0 : i32
    return %arg0, %c0_i32 : i32, i32
  }
}

module attributes {stable_mosaic.version = 11 : i64} {
  func.func @kernel(%arg0: i32, %arg1: i32, %arg2: memref<1x10x10x128xbf16, #tpu.memory_space<vmem>>, %arg3: memref<9x128x128xbf16, #tpu.memory_space<vmem>>, %arg4: memref<1x8x8x128xbf16, #tpu.memory_space<vmem>>, %arg5: memref<1x2x128xf32, #tpu.memory_space<vmem>>, %arg6: memref<64x128xf32, #tpu.memory_space<vmem>>) attributes {dimension_semantics = [#tpu.dimension_semantics<parallel>, #tpu.dimension_semantics<arbitrary>], iteration_bounds = array<i64: 2, 1>, scalar_prefetch = 0 : i64, scratch_operands = 1 : i64, tpu.core_type = #tpu.core_type<tc>, window_params = [{transform_indices = @transform_0, window_bounds = array<i64: 1, 10, 10, 128>}, {pipeline_mode = #tpu.pipeline_mode<synchronous>, transform_indices = @transform_1, window_bounds = array<i64: 9, 128, 128>}, {transform_indices = @transform_2, window_bounds = array<i64: 1, 8, 8, 128>}, {transform_indices = @transform_3, window_bounds = array<i64: 1, 2, 128>}]} {
    %c0_i32 = arith.constant 0 : i32
    %0 = arith.cmpi eq, %arg1, %c0_i32 : i32
    %1 = arith.extui %0 : i1 to i32
    %c0_i32_0 = arith.constant 0 : i32
    %2 = arith.cmpi ne, %1, %c0_i32_0 : i32
    scf.if %2 {
      %cst_117 = arith.constant 0.000000e+00 : f32
      %106 = vector.broadcast %cst_117 : f32 to vector<1x2x128xf32>
      %c0_118 = arith.constant 0 : index
      %c0_119 = arith.constant 0 : index
      %c0_120 = arith.constant 0 : index
      %107 = vector.load %arg5[%c0_118, %c0_119, %c0_120] : memref<1x2x128xf32, #tpu.memory_space<vmem>>, vector<1x2x128xf32>
      tpu.vector_store %arg5[%c0_118, %c0_119, %c0_120], %106 {strides = array<i32>} : memref<1x2x128xf32, #tpu.memory_space<vmem>>, vector<1x2x128xf32>,
    } else {
    }
    %c0 = arith.constant 0 : index
    %c0_1 = arith.constant 0 : index
    %c0_2 = arith.constant 0 : index
    %c0_3 = arith.constant 0 : index
    %3 = vector.load %arg2[%c0, %c0_1, %c0_2, %c0_3] : memref<1x10x10x128xbf16, #tpu.memory_space<vmem>>, vector<1x8x8x128xbf16>
    %4 = vector.shape_cast %3 : vector<1x8x8x128xbf16> to vector<8x8x128xbf16>
    %5 = vector.shape_cast %4 : vector<8x8x128xbf16> to vector<64x128xbf16>
    %c0_4 = arith.constant 0 : index
    %c0_5 = arith.constant 0 : index
    %c0_6 = arith.constant 0 : index
    %6 = vector.load %arg3[%c0_4, %c0_5, %c0_6] : memref<9x128x128xbf16, #tpu.memory_space<vmem>>, vector<1x128x128xbf16>
    %7 = vector.shape_cast %6 : vector<1x128x128xbf16> to vector<128x128xbf16>
    %cst = arith.constant dense<0.000000e+00> : vector<64x128xf32>
    %8 = tpu.matmul %5, %7, %cst {dimension_numbers = #tpu.dot_dimension_numbers<[1], [0], [0], [1], [0, 0, 1, 1], [], []>} : vector<64x128xbf16>, vector<128x128xbf16>, vector<64x128xf32> -> vector<64x128xf32>
    %c0_7 = arith.constant 0 : index
    %c0_8 = arith.constant 0 : index
    %9 = vector.load %arg6[%c0_7, %c0_8] : memref<64x128xf32, #tpu.memory_space<vmem>>, vector<64x128xf32>
    tpu.vector_store %arg6[%c0_7, %c0_8], %8 {strides = array<i32>} : memref<64x128xf32, #tpu.memory_space<vmem>>, vector<64x128xf32>,
    %c0_9 = arith.constant 0 : index
    %c0_10 = arith.constant 0 : index
    %c1 = arith.constant 1 : index
    %c0_11 = arith.constant 0 : index
    %10 = vector.load %arg2[%c0_9, %c0_10, %c1, %c0_11] : memref<1x10x10x128xbf16, #tpu.memory_space<vmem>>, vector<1x8x8x128xbf16>
    %11 = vector.shape_cast %10 : vector<1x8x8x128xbf16> to vector<8x8x128xbf16>
    %12 = vector.shape_cast %11 : vector<8x8x128xbf16> to vector<64x128xbf16>
    %c1_12 = arith.constant 1 : index
    %c0_13 = arith.constant 0 : index
    %c0_14 = arith.constant 0 : index
    %13 = vector.load %arg3[%c1_12, %c0_13, %c0_14] : memref<9x128x128xbf16, #tpu.memory_space<vmem>>, vector<1x128x128xbf16>
    %14 = vector.shape_cast %13 : vector<1x128x128xbf16> to vector<128x128xbf16>
    %cst_15 = arith.constant dense<0.000000e+00> : vector<64x128xf32>
    %15 = tpu.matmul %12, %14, %cst_15 {dimension_numbers = #tpu.dot_dimension_numbers<[1], [0], [0], [1], [0, 0, 1, 1], [], []>} : vector<64x128xbf16>, vector<128x128xbf16>, vector<64x128xf32> -> vector<64x128xf32>
    %c0_16 = arith.constant 0 : index
    %c0_17 = arith.constant 0 : index
    %16 = vector.load %arg6[%c0_16, %c0_17] : memref<64x128xf32, #tpu.memory_space<vmem>>, vector<64x128xf32>
    %17 = arith.addf %16, %15 : vector<64x128xf32>
    %c0_18 = arith.constant 0 : index
    %c0_19 = arith.constant 0 : index
    %18 = vector.load %arg6[%c0_18, %c0_19] : memref<64x128xf32, #tpu.memory_space<vmem>>, vector<64x128xf32>
    tpu.vector_store %arg6[%c0_18, %c0_19], %17 {strides = array<i32>} : memref<64x128xf32, #tpu.memory_space<vmem>>, vector<64x128xf32>,
    %c0_20 = arith.constant 0 : index
    %c0_21 = arith.constant 0 : index
    %c2 = arith.constant 2 : index
    %c0_22 = arith.constant 0 : index
    %19 = vector.load %arg2[%c0_20, %c0_21, %c2, %c0_22] : memref<1x10x10x128xbf16, #tpu.memory_space<vmem>>, vector<1x8x8x128xbf16>
    %20 = vector.shape_cast %19 : vector<1x8x8x128xbf16> to vector<8x8x128xbf16>
    %21 = vector.shape_cast %20 : vector<8x8x128xbf16> to vector<64x128xbf16>
    %c2_23 = arith.constant 2 : index
    %c0_24 = arith.constant 0 : index
    %c0_25 = arith.constant 0 : index
    %22 = vector.load %arg3[%c2_23, %c0_24, %c0_25] : memref<9x128x128xbf16, #tpu.memory_space<vmem>>, vector<1x128x128xbf16>
    %23 = vector.shape_cast %22 : vector<1x128x128xbf16> to vector<128x128xbf16>
    %cst_26 = arith.constant dense<0.000000e+00> : vector<64x128xf32>
    %24 = tpu.matmul %21, %23, %cst_26 {dimension_numbers = #tpu.dot_dimension_numbers<[1], [0], [0], [1], [0, 0, 1, 1], [], []>} : vector<64x128xbf16>, vector<128x128xbf16>, vector<64x128xf32> -> vector<64x128xf32>
    %c0_27 = arith.constant 0 : index
    %c0_28 = arith.constant 0 : index
    %25 = vector.load %arg6[%c0_27, %c0_28] : memref<64x128xf32, #tpu.memory_space<vmem>>, vector<64x128xf32>
    %26 = arith.addf %25, %24 : vector<64x128xf32>
    %c0_29 = arith.constant 0 : index
    %c0_30 = arith.constant 0 : index
    %27 = vector.load %arg6[%c0_29, %c0_30] : memref<64x128xf32, #tpu.memory_space<vmem>>, vector<64x128xf32>
    tpu.vector_store %arg6[%c0_29, %c0_30], %26 {strides = array<i32>} : memref<64x128xf32, #tpu.memory_space<vmem>>, vector<64x128xf32>,
    %c0_31 = arith.constant 0 : index
    %c1_32 = arith.constant 1 : index
    %c0_33 = arith.constant 0 : index
    %c0_34 = arith.constant 0 : index
    %28 = vector.load %arg2[%c0_31, %c1_32, %c0_33, %c0_34] : memref<1x10x10x128xbf16, #tpu.memory_space<vmem>>, vector<1x8x8x128xbf16>
    %29 = vector.shape_cast %28 : vector<1x8x8x128xbf16> to vector<8x8x128xbf16>
    %30 = vector.shape_cast %29 : vector<8x8x128xbf16> to vector<64x128xbf16>
    %c3 = arith.constant 3 : index
    %c0_35 = arith.constant 0 : index
    %c0_36 = arith.constant 0 : index
    %31 = vector.load %arg3[%c3, %c0_35, %c0_36] : memref<9x128x128xbf16, #tpu.memory_space<vmem>>, vector<1x128x128xbf16>
    %32 = vector.shape_cast %31 : vector<1x128x128xbf16> to vector<128x128xbf16>
    %cst_37 = arith.constant dense<0.000000e+00> : vector<64x128xf32>
    %33 = tpu.matmul %30, %32, %cst_37 {dimension_numbers = #tpu.dot_dimension_numbers<[1], [0], [0], [1], [0, 0, 1, 1], [], []>} : vector<64x128xbf16>, vector<128x128xbf16>, vector<64x128xf32> -> vector<64x128xf32>
    %c0_38 = arith.constant 0 : index
    %c0_39 = arith.constant 0 : index
    %34 = vector.load %arg6[%c0_38, %c0_39] : memref<64x128xf32, #tpu.memory_space<vmem>>, vector<64x128xf32>
    %35 = arith.addf %34, %33 : vector<64x128xf32>
    %c0_40 = arith.constant 0 : index
    %c0_41 = arith.constant 0 : index
    %36 = vector.load %arg6[%c0_40, %c0_41] : memref<64x128xf32, #tpu.memory_space<vmem>>, vector<64x128xf32>
    tpu.vector_store %arg6[%c0_40, %c0_41], %35 {strides = array<i32>} : memref<64x128xf32, #tpu.memory_space<vmem>>, vector<64x128xf32>,
    %c0_42 = arith.constant 0 : index
    %c1_43 = arith.constant 1 : index
    %c1_44 = arith.constant 1 : index
    %c0_45 = arith.constant 0 : index
    %37 = vector.load %arg2[%c0_42, %c1_43, %c1_44, %c0_45] : memref<1x10x10x128xbf16, #tpu.memory_space<vmem>>, vector<1x8x8x128xbf16>
    %38 = vector.shape_cast %37 : vector<1x8x8x128xbf16> to vector<8x8x128xbf16>
    %39 = vector.shape_cast %38 : vector<8x8x128xbf16> to vector<64x128xbf16>
    %c4 = arith.constant 4 : index
    %c0_46 = arith.constant 0 : index
    %c0_47 = arith.constant 0 : index
    %40 = vector.load %arg3[%c4, %c0_46, %c0_47] : memref<9x128x128xbf16, #tpu.memory_space<vmem>>, vector<1x128x128xbf16>
    %41 = vector.shape_cast %40 : vector<1x128x128xbf16> to vector<128x128xbf16>
    %cst_48 = arith.constant dense<0.000000e+00> : vector<64x128xf32>
    %42 = tpu.matmul %39, %41, %cst_48 {dimension_numbers = #tpu.dot_dimension_numbers<[1], [0], [0], [1], [0, 0, 1, 1], [], []>} : vector<64x128xbf16>, vector<128x128xbf16>, vector<64x128xf32> -> vector<64x128xf32>
    %c0_49 = arith.constant 0 : index
    %c0_50 = arith.constant 0 : index
    %43 = vector.load %arg6[%c0_49, %c0_50] : memref<64x128xf32, #tpu.memory_space<vmem>>, vector<64x128xf32>
    %44 = arith.addf %43, %42 : vector<64x128xf32>
    %c0_51 = arith.constant 0 : index
    %c0_52 = arith.constant 0 : index
    %45 = vector.load %arg6[%c0_51, %c0_52] : memref<64x128xf32, #tpu.memory_space<vmem>>, vector<64x128xf32>
    tpu.vector_store %arg6[%c0_51, %c0_52], %44 {strides = array<i32>} : memref<64x128xf32, #tpu.memory_space<vmem>>, vector<64x128xf32>,
    %c0_53 = arith.constant 0 : index
    %c1_54 = arith.constant 1 : index
    %c2_55 = arith.constant 2 : index
    %c0_56 = arith.constant 0 : index
    %46 = vector.load %arg2[%c0_53, %c1_54, %c2_55, %c0_56] : memref<1x10x10x128xbf16, #tpu.memory_space<vmem>>, vector<1x8x8x128xbf16>
    %47 = vector.shape_cast %46 : vector<1x8x8x128xbf16> to vector<8x8x128xbf16>
    %48 = vector.shape_cast %47 : vector<8x8x128xbf16> to vector<64x128xbf16>
    %c5 = arith.constant 5 : index
    %c0_57 = arith.constant 0 : index
    %c0_58 = arith.constant 0 : index
    %49 = vector.load %arg3[%c5, %c0_57, %c0_58] : memref<9x128x128xbf16, #tpu.memory_space<vmem>>, vector<1x128x128xbf16>
    %50 = vector.shape_cast %49 : vector<1x128x128xbf16> to vector<128x128xbf16>
    %cst_59 = arith.constant dense<0.000000e+00> : vector<64x128xf32>
    %51 = tpu.matmul %48, %50, %cst_59 {dimension_numbers = #tpu.dot_dimension_numbers<[1], [0], [0], [1], [0, 0, 1, 1], [], []>} : vector<64x128xbf16>, vector<128x128xbf16>, vector<64x128xf32> -> vector<64x128xf32>
    %c0_60 = arith.constant 0 : index
    %c0_61 = arith.constant 0 : index
    %52 = vector.load %arg6[%c0_60, %c0_61] : memref<64x128xf32, #tpu.memory_space<vmem>>, vector<64x128xf32>
    %53 = arith.addf %52, %51 : vector<64x128xf32>
    %c0_62 = arith.constant 0 : index
    %c0_63 = arith.constant 0 : index
    %54 = vector.load %arg6[%c0_62, %c0_63] : memref<64x128xf32, #tpu.memory_space<vmem>>, vector<64x128xf32>
    tpu.vector_store %arg6[%c0_62, %c0_63], %53 {strides = array<i32>} : memref<64x128xf32, #tpu.memory_space<vmem>>, vector<64x128xf32>,
    %c0_64 = arith.constant 0 : index
    %c2_65 = arith.constant 2 : index
    %c0_66 = arith.constant 0 : index
    %c0_67 = arith.constant 0 : index
    %55 = vector.load %arg2[%c0_64, %c2_65, %c0_66, %c0_67] : memref<1x10x10x128xbf16, #tpu.memory_space<vmem>>, vector<1x8x8x128xbf16>
    %56 = vector.shape_cast %55 : vector<1x8x8x128xbf16> to vector<8x8x128xbf16>
    %57 = vector.shape_cast %56 : vector<8x8x128xbf16> to vector<64x128xbf16>
    %c6 = arith.constant 6 : index
    %c0_68 = arith.constant 0 : index
    %c0_69 = arith.constant 0 : index
    %58 = vector.load %arg3[%c6, %c0_68, %c0_69] : memref<9x128x128xbf16, #tpu.memory_space<vmem>>, vector<1x128x128xbf16>
    %59 = vector.shape_cast %58 : vector<1x128x128xbf16> to vector<128x128xbf16>
    %cst_70 = arith.constant dense<0.000000e+00> : vector<64x128xf32>
    %60 = tpu.matmul %57, %59, %cst_70 {dimension_numbers = #tpu.dot_dimension_numbers<[1], [0], [0], [1], [0, 0, 1, 1], [], []>} : vector<64x128xbf16>, vector<128x128xbf16>, vector<64x128xf32> -> vector<64x128xf32>
    %c0_71 = arith.constant 0 : index
    %c0_72 = arith.constant 0 : index
    %61 = vector.load %arg6[%c0_71, %c0_72] : memref<64x128xf32, #tpu.memory_space<vmem>>, vector<64x128xf32>
    %62 = arith.addf %61, %60 : vector<64x128xf32>
    %c0_73 = arith.constant 0 : index
    %c0_74 = arith.constant 0 : index
    %63 = vector.load %arg6[%c0_73, %c0_74] : memref<64x128xf32, #tpu.memory_space<vmem>>, vector<64x128xf32>
    tpu.vector_store %arg6[%c0_73, %c0_74], %62 {strides = array<i32>} : memref<64x128xf32, #tpu.memory_space<vmem>>, vector<64x128xf32>,
    %c0_75 = arith.constant 0 : index
    %c2_76 = arith.constant 2 : index
    %c1_77 = arith.constant 1 : index
    %c0_78 = arith.constant 0 : index
    %64 = vector.load %arg2[%c0_75, %c2_76, %c1_77, %c0_78] : memref<1x10x10x128xbf16, #tpu.memory_space<vmem>>, vector<1x8x8x128xbf16>
    %65 = vector.shape_cast %64 : vector<1x8x8x128xbf16> to vector<8x8x128xbf16>
    %66 = vector.shape_cast %65 : vector<8x8x128xbf16> to vector<64x128xbf16>
    %c7 = arith.constant 7 : index
    %c0_79 = arith.constant 0 : index
    %c0_80 = arith.constant 0 : index
    %67 = vector.load %arg3[%c7, %c0_79, %c0_80] : memref<9x128x128xbf16, #tpu.memory_space<vmem>>, vector<1x128x128xbf16>
    %68 = vector.shape_cast %67 : vector<1x128x128xbf16> to vector<128x128xbf16>
    %cst_81 = arith.constant dense<0.000000e+00> : vector<64x128xf32>
    %69 = tpu.matmul %66, %68, %cst_81 {dimension_numbers = #tpu.dot_dimension_numbers<[1], [0], [0], [1], [0, 0, 1, 1], [], []>} : vector<64x128xbf16>, vector<128x128xbf16>, vector<64x128xf32> -> vector<64x128xf32>
    %c0_82 = arith.constant 0 : index
    %c0_83 = arith.constant 0 : index
    %70 = vector.load %arg6[%c0_82, %c0_83] : memref<64x128xf32, #tpu.memory_space<vmem>>, vector<64x128xf32>
    %71 = arith.addf %70, %69 : vector<64x128xf32>
    %c0_84 = arith.constant 0 : index
    %c0_85 = arith.constant 0 : index
    %72 = vector.load %arg6[%c0_84, %c0_85] : memref<64x128xf32, #tpu.memory_space<vmem>>, vector<64x128xf32>
    tpu.vector_store %arg6[%c0_84, %c0_85], %71 {strides = array<i32>} : memref<64x128xf32, #tpu.memory_space<vmem>>, vector<64x128xf32>,
    %c0_86 = arith.constant 0 : index
    %c2_87 = arith.constant 2 : index
    %c2_88 = arith.constant 2 : index
    %c0_89 = arith.constant 0 : index
    %73 = vector.load %arg2[%c0_86, %c2_87, %c2_88, %c0_89] : memref<1x10x10x128xbf16, #tpu.memory_space<vmem>>, vector<1x8x8x128xbf16>
    %74 = vector.shape_cast %73 : vector<1x8x8x128xbf16> to vector<8x8x128xbf16>
    %75 = vector.shape_cast %74 : vector<8x8x128xbf16> to vector<64x128xbf16>
    %c8 = arith.constant 8 : index
    %c0_90 = arith.constant 0 : index
    %c0_91 = arith.constant 0 : index
    %76 = vector.load %arg3[%c8, %c0_90, %c0_91] : memref<9x128x128xbf16, #tpu.memory_space<vmem>>, vector<1x128x128xbf16>
    %77 = vector.shape_cast %76 : vector<1x128x128xbf16> to vector<128x128xbf16>
    %cst_92 = arith.constant dense<0.000000e+00> : vector<64x128xf32>
    %78 = tpu.matmul %75, %77, %cst_92 {dimension_numbers = #tpu.dot_dimension_numbers<[1], [0], [0], [1], [0, 0, 1, 1], [], []>} : vector<64x128xbf16>, vector<128x128xbf16>, vector<64x128xf32> -> vector<64x128xf32>
    %c0_93 = arith.constant 0 : index
    %c0_94 = arith.constant 0 : index
    %79 = vector.load %arg6[%c0_93, %c0_94] : memref<64x128xf32, #tpu.memory_space<vmem>>, vector<64x128xf32>
    %80 = arith.addf %79, %78 : vector<64x128xf32>
    %c0_95 = arith.constant 0 : index
    %c0_96 = arith.constant 0 : index
    %81 = vector.load %arg6[%c0_95, %c0_96] : memref<64x128xf32, #tpu.memory_space<vmem>>, vector<64x128xf32>
    tpu.vector_store %arg6[%c0_95, %c0_96], %80 {strides = array<i32>} : memref<64x128xf32, #tpu.memory_space<vmem>>, vector<64x128xf32>,
    %c0_97 = arith.constant 0 : index
    %c0_98 = arith.constant 0 : index
    %82 = vector.load %arg6[%c0_97, %c0_98] : memref<64x128xf32, #tpu.memory_space<vmem>>, vector<64x128xf32>
    %83 = arith.truncf %82 : vector<64x128xf32> to vector<64x128xbf16>
    %84 = vector.shape_cast %83 : vector<64x128xbf16> to vector<8x8x128xbf16>
    %c0_99 = arith.constant 0 : index
    %c0_100 = arith.constant 0 : index
    %c0_101 = arith.constant 0 : index
    %c0_102 = arith.constant 0 : index
    %85 = vector.load %arg4[%c0_99, %c0_100, %c0_101, %c0_102] : memref<1x8x8x128xbf16, #tpu.memory_space<vmem>>, vector<1x8x8x128xbf16>
    %86 = vector.shape_cast %85 : vector<1x8x8x128xbf16> to vector<8x8x128xbf16>
    %87 = vector.shape_cast %84 : vector<8x8x128xbf16> to vector<1x8x8x128xbf16>
    tpu.vector_store %arg4[%c0_99, %c0_100, %c0_101, %c0_102], %87 {strides = array<i32>} : memref<1x8x8x128xbf16, #tpu.memory_space<vmem>>, vector<1x8x8x128xbf16>,
    %88 = arith.extf %83 : vector<64x128xbf16> to vector<64x128xf32>
    %c0_103 = arith.constant 0 : index
    %c0_104 = arith.constant 0 : index
    %c0_105 = arith.constant 0 : index
    %89 = vector.load %arg5[%c0_103, %c0_104, %c0_105] : memref<1x2x128xf32, #tpu.memory_space<vmem>>, vector<1x1x128xf32>
    %90 = vector.shape_cast %89 : vector<1x1x128xf32> to vector<1x128xf32>
    %cst_106 = arith.constant dense<0.000000e+00> : vector<128xf32>
    %91 = vector.multi_reduction <add>, %88, %cst_106 [0] : vector<64x128xf32> to vector<128xf32>
    %92 = vector.shape_cast %91 : vector<128xf32> to vector<1x128xf32>
    %93 = arith.addf %90, %92 : vector<1x128xf32>
    %c0_107 = arith.constant 0 : index
    %c0_108 = arith.constant 0 : index
    %c0_109 = arith.constant 0 : index
    %94 = vector.load %arg5[%c0_107, %c0_108, %c0_109] : memref<1x2x128xf32, #tpu.memory_space<vmem>>, vector<1x1x128xf32>
    %95 = vector.shape_cast %94 : vector<1x1x128xf32> to vector<1x128xf32>
    %96 = vector.shape_cast %93 : vector<1x128xf32> to vector<1x1x128xf32>
    tpu.vector_store %arg5[%c0_107, %c0_108, %c0_109], %96 {strides = array<i32>} : memref<1x2x128xf32, #tpu.memory_space<vmem>>, vector<1x1x128xf32>,
    %c0_110 = arith.constant 0 : index
    %c1_111 = arith.constant 1 : index
    %c0_112 = arith.constant 0 : index
    %97 = vector.load %arg5[%c0_110, %c1_111, %c0_112] : memref<1x2x128xf32, #tpu.memory_space<vmem>>, vector<1x1x128xf32>
    %98 = vector.shape_cast %97 : vector<1x1x128xf32> to vector<1x128xf32>
    %99 = arith.mulf %88, %88 : vector<64x128xf32>
    %cst_113 = arith.constant dense<0.000000e+00> : vector<128xf32>
    %100 = vector.multi_reduction <add>, %99, %cst_113 [0] : vector<64x128xf32> to vector<128xf32>
    %101 = vector.shape_cast %100 : vector<128xf32> to vector<1x128xf32>
    %102 = arith.addf %98, %101 : vector<1x128xf32>
    %c0_114 = arith.constant 0 : index
    %c1_115 = arith.constant 1 : index
    %c0_116 = arith.constant 0 : index
    %103 = vector.load %arg5[%c0_114, %c1_115, %c0_116] : memref<1x2x128xf32, #tpu.memory_space<vmem>>, vector<1x1x128xf32>
    %104 = vector.shape_cast %103 : vector<1x1x128xf32> to vector<1x128xf32>
    %105 = vector.shape_cast %102 : vector<1x128xf32> to vector<1x1x128xf32>
    tpu.vector_store %arg5[%c0_114, %c1_115, %c0_116], %105 {strides = array<i32>} : memref<1x2x128xf32, #tpu.memory_space<vmem>>, vector<1x1x128xf32>,
    return
  }
  func.func @transform_0(%arg0: i32, %arg1: i32) -> (i32, i32, i32, i32) {
    %c0_i32 = arith.constant 0 : i32
    %c0_i32_0 = arith.constant 0 : i32
    %c0_i32_1 = arith.constant 0 : i32
    %c0_i32_2 = arith.constant 0 : i32
    return %arg0, %c0_i32, %c0_i32_0, %c0_i32_1 : i32, i32, i32, i32
  }
  func.func @transform_1(%arg0: i32, %arg1: i32) -> (i32, i32, i32) {
    %c0_i32 = arith.constant 0 : i32
    %c0_i32_0 = arith.constant 0 : i32
    %c0_i32_1 = arith.constant 0 : i32
    %c0_i32_2 = arith.constant 0 : i32
    return %c0_i32, %c0_i32_0, %c0_i32_1 : i32, i32, i32
  }
  func.func @transform_2(%arg0: i32, %arg1: i32) -> (i32, i32, i32, i32) {
    %c0_i32 = arith.constant 0 : i32
    %c0_i32_0 = arith.constant 0 : i32
    %c0_i32_1 = arith.constant 0 : i32
    return %arg0, %arg1, %c0_i32, %c0_i32_0 : i32, i32, i32, i32
  }
  func.func @transform_3(%arg0: i32, %arg1: i32) -> (i32, i32, i32) {
    %c0_i32 = arith.constant 0 : i32
    %c0_i32_0 = arith.constant 0 : i32
    %c0_i32_1 = arith.constant 0 : i32
    return %arg0, %c0_i32, %c0_i32_0 : i32, i32, i32
  }
}

module attributes {stable_mosaic.version = 11 : i64} {
  func.func @_bn_relu_kernel(%arg0: i32, %arg1: memref<128x128xbf16, #tpu.memory_space<vmem>>, %arg2: memref<1x128xf32, #tpu.memory_space<vmem>>, %arg3: memref<1x128xf32, #tpu.memory_space<vmem>>, %arg4: memref<128x128xf32, #tpu.memory_space<vmem>>) attributes {dimension_semantics = [#tpu.dimension_semantics<parallel>], iteration_bounds = array<i64: 1>, scalar_prefetch = 0 : i64, scratch_operands = 0 : i64, tpu.core_type = #tpu.core_type<tc>, window_params = [{transform_indices = @transform_0, window_bounds = array<i64: 128, 128>}, {pipeline_mode = #tpu.pipeline_mode<synchronous>, transform_indices = @transform_1, window_bounds = array<i64: 1, 128>}, {pipeline_mode = #tpu.pipeline_mode<synchronous>, transform_indices = @transform_2, window_bounds = array<i64: 1, 128>}, {transform_indices = @transform_3, window_bounds = array<i64: 128, 128>}]} {
    %c0 = arith.constant 0 : index
    %c0_0 = arith.constant 0 : index
    %0 = vector.load %arg1[%c0, %c0_0] : memref<128x128xbf16, #tpu.memory_space<vmem>>, vector<128x128xbf16>
    %1 = arith.extf %0 : vector<128x128xbf16> to vector<128x128xf32>
    %c0_1 = arith.constant 0 : index
    %c0_2 = arith.constant 0 : index
    %2 = vector.load %arg2[%c0_1, %c0_2] : memref<1x128xf32, #tpu.memory_space<vmem>>, vector<1x128xf32>
    %3 = vector.broadcast %2 : vector<1x128xf32> to vector<128x128xf32>
    %4 = arith.mulf %1, %3 : vector<128x128xf32>
    %c0_3 = arith.constant 0 : index
    %c0_4 = arith.constant 0 : index
    %5 = vector.load %arg3[%c0_3, %c0_4] : memref<1x128xf32, #tpu.memory_space<vmem>>, vector<1x128xf32>
    %6 = vector.broadcast %5 : vector<1x128xf32> to vector<128x128xf32>
    %7 = arith.addf %4, %6 : vector<128x128xf32>
    %cst = arith.constant 0.000000e+00 : f32
    %8 = vector.broadcast %cst : f32 to vector<128x128xf32>
    %9 = arith.maximumf %7, %8 : vector<128x128xf32>
    %c0_5 = arith.constant 0 : index
    %c0_6 = arith.constant 0 : index
    %10 = vector.load %arg4[%c0_5, %c0_6] : memref<128x128xf32, #tpu.memory_space<vmem>>, vector<128x128xf32>
    tpu.vector_store %arg4[%c0_5, %c0_6], %9 {strides = array<i32>} : memref<128x128xf32, #tpu.memory_space<vmem>>, vector<128x128xf32>,
    return
  }
  func.func @transform_0(%arg0: i32) -> (i32, i32) {
    %c0_i32 = arith.constant 0 : i32
    %c0_i32_0 = arith.constant 0 : i32
    return %arg0, %c0_i32 : i32, i32
  }
  func.func @transform_1(%arg0: i32) -> (i32, i32) {
    %c0_i32 = arith.constant 0 : i32
    %c0_i32_0 = arith.constant 0 : i32
    %c0_i32_1 = arith.constant 0 : i32
    return %c0_i32, %c0_i32_0 : i32, i32
  }
  func.func @transform_2(%arg0: i32) -> (i32, i32) {
    %c0_i32 = arith.constant 0 : i32
    %c0_i32_0 = arith.constant 0 : i32
    %c0_i32_1 = arith.constant 0 : i32
    return %c0_i32, %c0_i32_0 : i32, i32
  }
  func.func @transform_3(%arg0: i32) -> (i32, i32) {
    %c0_i32 = arith.constant 0 : i32
    %c0_i32_0 = arith.constant 0 : i32
    return %arg0, %c0_i32 : i32, i32
  }
}

</mosaic_0001>

<bundles_post_ra>
// kernel: unet_down_conv_forward.7
= control target key start
LH: loop header
LB: loop body
LE: loop exit
PB: predicated region body
PF: predicated region fallthrough
CT: control target
= control target key end

     0   :  { %s422_s0 = inlined_call_operand.vmem [shape: bf16[128,128], index: 0, kind: input, shape index: {}]   ;;  %s423_s1 = inlined_call_operand.vmem [shape: f32[1,128], index: 1, kind: input, shape index: {}]   ;;  %s424_s2 = inlined_call_operand.vmem [shape: f32[1,128], index: 2, kind: input, shape index: {}]   ;;  %s425_s3 = inlined_call_operand.vmem [shape: bf16[128,128], index: 3, kind: output, shape index: {}]  }
   0x1   :  { %v227_v0 = vld [vmem:[%s422_s0] sm:$0xff]   ;;  %v298_v4 = vld [vmem:[%s422_s0 + $0x8] sm:$0xff]   ;;  %v299_v5 = vld [vmem:[%s422_s0 + $0x10] sm:$0xff]  }
   0x2   :  { %v338_v1 = vld [vmem:[%s423_s1] ss:$0 sm:$0xff]  ;;  %v228_v2 = vunpack.c.l.bf16 %v227_v0  ;;  %v229_v3 = vunpack.c.h.bf16 %v227_v0  ;;  %v300_v6 = vld [vmem:[%s422_s0 + $0x18] sm:$0xff]   ;;  %v232_v8 = vunpack.c.l.bf16 %v298_v4  ;;  %v233_v9 = vunpack.c.h.bf16 %v298_v4  ;;  %v302_v33 = vld [vmem:[%s422_s0 + $0x28] sm:$0xff]  }
   0x3   :  { %v352_v7 = vld [vmem:[%s424_s2] ss:$0 sm:$0xff]  ;;  %v236_v10 = vunpack.c.l.bf16 %v299_v5  ;;  %v237_v11 = vunpack.c.h.bf16 %v299_v5  ;;  %v240_v14 = vunpack.c.l.bf16 %v300_v6  ;;  %v241_v15 = vunpack.c.h.bf16 %v300_v6  ;;  %v303_v38 = vld [vmem:[%s422_s0 + $0x30] sm:$0xff]   ;;  %v304_v43 = vld [vmem:[%s422_s0 + $0x38] sm:$0xff]  }
   0x4   :  { %v53_v12 = vmul.f32 %v228_v2, %v338_v1  ;;  %v54_v13 = vmul.f32 %v229_v3, %v338_v1  ;;  %v55_v16 = vmul.f32 %v232_v8, %v338_v1  ;;  %v56_v17 = vmul.f32 %v233_v9, %v338_v1  ;;  %v301_v28 = vld [vmem:[%s422_s0 + $0x20] sm:$0xff]  }
   0x5   :  { %v57_v18 = vmul.f32 %v236_v10, %v338_v1  ;;  %v58_v19 = vmul.f32 %v237_v11, %v338_v1  ;;  %v59_v22 = vmul.f32 %v240_v14, %v338_v1  ;;  %v60_v23 = vmul.f32 %v241_v15, %v338_v1 }
   0x6   :  { %v76_v20 = vadd.f32 %v352_v7, %v53_v12  ;;  %v77_v21 = vadd.f32 %v352_v7, %v54_v13  ;;  %v78_v24 = vadd.f32 %v352_v7, %v55_v16  ;;  %v79_v25 = vadd.f32 %v352_v7, %v56_v17 }
   0x7   :  { %v80_v26 = vadd.f32 %v352_v7, %v57_v18  ;;  %v81_v27 = vadd.f32 %v352_v7, %v58_v19  ;;  %v82_v31 = vadd.f32 %v352_v7, %v59_v22  ;;  %v83_v32 = vadd.f32 %v352_v7, %v60_v23 }
   0x8   :  { %v92_v29 = vmax.f32 %v76_v20, 0.0  ;;  %v93_v30 = vmax.f32 %v77_v21, 0.0  ;;  %v94_v34 = vmax.f32 %v78_v24, 0.0  ;;  %v95_v35 = vmax.f32 %v79_v25, 0.0 }
   0x9   :  { %v96_v36 = vmax.f32 %v80_v26, 0.0  ;;  %v97_v37 = vmax.f32 %v81_v27, 0.0  ;;  %v98_v40 = vmax.f32 %v82_v31, 0.0  ;;  %v99_v41 = vmax.f32 %v83_v32, 0.0 }
   0xa   :  { %v261_v39 = vpack.c.bf16 %v93_v30, %v92_v29  ;;  %v244_v42 = vunpack.c.l.bf16 %v301_v28  ;;  %v266_v44 = vpack.c.bf16 %v95_v35, %v94_v34  ;;  %v245_v46 = vunpack.c.h.bf16 %v301_v28 }
   0xb   :  { %v271_v45 = vpack.c.bf16 %v97_v37, %v96_v36  ;;  %v248_v47 = vunpack.c.l.bf16 %v302_v33  ;;  %v276_v48 = vpack.c.bf16 %v99_v41, %v98_v40  ;;  %v249_v50 = vunpack.c.h.bf16 %v302_v33 }
   0xc   :  { %262 = vst [vmem:[%s425_s3] sm:$0xff] %v261_v39   ;;  %v61_v49 = vmul.f32 %v244_v42, %v338_v1  ;;  %v252_v51 = vunpack.c.l.bf16 %v303_v38  ;;  %305 = vst [vmem:[%s425_s3 + $0x8] sm:$0xff] %v266_v44   ;;  %v62_v52 = vmul.f32 %v245_v46, %v338_v1  ;;  %v253_v54 = vunpack.c.h.bf16 %v303_v38 }
   0xd   :  { %306 = vst [vmem:[%s425_s3 + $0x10] sm:$0xff] %v271_v45   ;;  %v63_v53 = vmul.f32 %v248_v47, %v338_v1  ;;  %v256_v55 = vunpack.c.l.bf16 %v304_v43  ;;  %307 = vst [vmem:[%s425_s3 + $0x18] sm:$0xff] %v276_v48   ;;  %v64_v57 = vmul.f32 %v249_v50, %v338_v1  ;;  %v257_v59 = vunpack.c.h.bf16 %v304_v43 }
   0xe   :  { %v84_v56 = vadd.f32 %v352_v7, %v61_v49  ;;  %v65_v58 = vmul.f32 %v252_v51, %v338_v1  ;;  %v85_v60 = vadd.f32 %v352_v7, %v62_v52  ;;  %v66_v62 = vmul.f32 %v253_v54, %v338_v1 }
   0xf   :  { %v86_v61 = vadd.f32 %v352_v7, %v63_v53  ;;  %v67_v63 = vmul.f32 %v256_v55, %v338_v1  ;;  %v87_v2 = vadd.f32 %v352_v7, %v64_v57  ;;  %v68_v4 = vmul.f32 %v257_v59, %v338_v1 }
  0x10   :  { %v100_v0 = vmax.f32 %v84_v56, 0.0  ;;  %v88_v3 = vadd.f32 %v352_v7, %v65_v58  ;;  %v101_v5 = vmax.f32 %v85_v60, 0.0  ;;  %v89_v8 = vadd.f32 %v352_v7, %v66_v62 }
  0x11   :  { %v102_v6 = vmax.f32 %v86_v61, 0.0  ;;  %v90_v9 = vadd.f32 %v352_v7, %v67_v63  ;;  %v103_v10 = vmax.f32 %v87_v2, 0.0  ;;  %v91_v12 = vadd.f32 %v352_v7, %v68_v4 }
  0x12   :  { %v104_v11 = vmax.f32 %v88_v3, 0.0  ;;  %v281_v13 = vpack.c.bf16 %v101_v5, %v100_v0  ;;  %v105_v14 = vmax.f32 %v89_v8, 0.0 }
  0x13   :  { %v106_v15 = vmax.f32 %v90_v9, 0.0  ;;  %v286_v16 = vpack.c.bf16 %v103_v10, %v102_v6  ;;  %v107_v17 = vmax.f32 %v91_v12, 0.0 }
  0x14   :  { %308 = vst [vmem:[%s425_s3 + $0x20] sm:$0xff] %v281_v13   ;;  %v291_v1 = vpack.c.bf16 %v105_v14, %v104_v11 }
  0x15   :  { %309 = vst [vmem:[%s425_s3 + $0x28] sm:$0xff] %v286_v16   ;;  %v296_v18 = vpack.c.bf16 %v107_v17, %v106_v15 }
  0x16   :  { %310 = vst [vmem:[%s425_s3 + $0x30] sm:$0xff] %v291_v1  }
  0x17   :  { %311 = vst [vmem:[%s425_s3 + $0x38] sm:$0xff] %v296_v18  }

// kernel: unet_down_conv_forward.5
= control target key start
LH: loop header
LB: loop body
LE: loop exit
PB: predicated region body
PF: predicated region fallthrough
CT: control target
= control target key end

     0   :  { %s175_s22 = smov 124   ;;  %vm137_vm0 = vcmask 27648   ;;  %s386_s0 = inlined_call_operand.vmem [shape: bf16[16,2,8,8], index: 0, kind: input, shape index: {}]   ;;  %s387_s1 = inlined_call_operand.vmem [shape: bf16[16,8,4], index: 1, kind: output, shape index: {}]  }
   0x1   :  { %v10_v0 = vld [vmem:[%s386_s0 + $0x10] sm:$0xf]  ;;  %v160_v1 = vld [vmem:[%s386_s0 + $0x14] sm:$0xf]  ;;  %v8_v2 = vld [vmem:[%s386_s0] sm:$0xf] }
   0x2   :  { %v195_v3 = vmax.bf16 %v160_v1, %v10_v0  ;;  %v158_v4 = vld [vmem:[%s386_s0 + $0x4] sm:$0xf]  ;;  %v11_v5 = vld [vmem:[%s386_s0 + $0x18] sm:$0xf]  ;;  %v161_v6 = vld [vmem:[%s386_s0 + $0x1c] sm:$0xf] }
   0x3   :  { %v206_v7 = vmax.bf16 %v158_v4, %v8_v2  ;;  %v9_v8 = vld [vmem:[%s386_s0 + $0x8] sm:$0xf]  ;;  %v159_v9 = vld [vmem:[%s386_s0 + $0xc] sm:$0xf]  ;;  %v216_v10 = vmax.bf16 %v161_v6, %v11_v5  ;;  %v12_v14 = vld [vmem:[%s386_s0 + $0x20] sm:$0xf] }
   0x4   :  { %77 = vrot.lane.b32.xlu1 %v195_v3, %s175_s22  ;;  %v220_v11 = vmax.bf16 %v159_v9, %v9_v8  ;;  %v13_v12 = vld [vmem:[%s386_s0 + $0x28] sm:$0xf]  ;;  %v163_v13 = vld [vmem:[%s386_s0 + $0x2c] sm:$0xf]  ;;  %v162_v15 = vld [vmem:[%s386_s0 + $0x24] sm:$0xf] }
   0x5   :  { %73 = vrot.lane.b32.xlu0 %v206_v7, %s175_s22  ;;  %v236_v16 = vmax.bf16 %v163_v13, %v13_v12  ;;  %v240_v17 = vmax.bf16 %v162_v15, %v12_v14  ;;  %v15_v18 = vld [vmem:[%s386_s0 + $0x38] sm:$0xf]  ;;  %v165_v19 = vld [vmem:[%s386_s0 + $0x3c] sm:$0xf]  ;;  %v14_v20 = vld [vmem:[%s386_s0 + $0x30] sm:$0xf] }
   0x6   :  { %v164_v21 = vld [vmem:[%s386_s0 + $0x34] sm:$0xf]  ;;  %v48_v22 = vmax.bf16 %v165_v19, %v15_v18  ;;  %v17_v24 = vld [vmem:[%s386_s0 + $0x48] sm:$0xf]  ;;  %v167_v25 = vld [vmem:[%s386_s0 + $0x4c] sm:$0xf] }
   0x7   :  { %v47_v23 = vmax.bf16 %v164_v21, %v14_v20  ;;  %v16_v26 = vld [vmem:[%s386_s0 + $0x40] sm:$0xf]  ;;  %v166_v27 = vld [vmem:[%s386_s0 + $0x44] sm:$0xf]  ;;  %v50_v28 = vmax.bf16 %v167_v25, %v17_v24  ;;  %v19_v30 = vld [vmem:[%s386_s0 + $0x58] sm:$0xf] }
   0x8   :  { %79 = vrot.lane.b32.xlu1 %v216_v10, %s175_s22  ;;  %v49_v29 = vmax.bf16 %v166_v27, %v16_v26  ;;  %v169_v31 = vld [vmem:[%s386_s0 + $0x5c] sm:$0xf]  ;;  %v18_v32 = vld [vmem:[%s386_s0 + $0x50] sm:$0xf]  ;;  %v168_v33 = vld [vmem:[%s386_s0 + $0x54] sm:$0xf] }
   0x9   :  { %75 = vrot.lane.b32.xlu0 %v220_v11, %s175_s22  ;;  %v52_v34 = vmax.bf16 %v169_v31, %v19_v30  ;;  %v51_v35 = vmax.bf16 %v168_v33, %v18_v32  ;;  %v21_v36 = vld [vmem:[%s386_s0 + $0x68] sm:$0xf]  ;;  %v171_v37 = vld [vmem:[%s386_s0 + $0x6c] sm:$0xf]  ;;  %v20_v38 = vld [vmem:[%s386_s0 + $0x60] sm:$0xf] }
   0xa   :  { %v170_v39 = vld [vmem:[%s386_s0 + $0x64] sm:$0xf]  ;;  %v54_v40 = vmax.bf16 %v171_v37, %v21_v36  ;;  %v23_v42 = vld [vmem:[%s386_s0 + $0x78] sm:$0xf]  ;;  %v173_v43 = vld [vmem:[%s386_s0 + $0x7c] sm:$0xf] }
   0xb   :  { %v53_v41 = vmax.bf16 %v170_v39, %v20_v38  ;;  %v22_v44 = vld [vmem:[%s386_s0 + $0x70] sm:$0xf]  ;;  %v172_v45 = vld [vmem:[%s386_s0 + $0x74] sm:$0xf]  ;;  %v56_v46 = vmax.bf16 %v173_v43, %v23_v42 }
   0xc   :  { %83 = vrot.lane.b32.xlu1 %v236_v16, %s175_s22  ;;  %v55_v47 = vmax.bf16 %v172_v45, %v22_v44 }
   0xd   :  { %81 = vrot.lane.b32.xlu0 %v240_v17, %s175_s22 }
  0x10   :  { %87 = vrot.lane.b32.xlu1 %v48_v22, %s175_s22 }
  0x11   :  { %85 = vrot.lane.b32.xlu0 %v47_v23, %s175_s22 }
  0x14   :  { %91 = vrot.lane.b32.xlu1 %v50_v28, %s175_s22 }
  0x15   :  { %89 = vrot.lane.b32.xlu0 %v49_v29, %s175_s22 }
  0x18   :  { %95 = vrot.lane.b32.xlu1 %v52_v34, %s175_s22 }
  0x19   :  { %93 = vrot.lane.b32.xlu0 %v51_v35, %s175_s22 }
  0x1c   :  { %99 = vrot.lane.b32.xlu1 %v54_v40, %s175_s22 }
  0x1d   :  { %97 = vrot.lane.b32.xlu0 %v53_v41, %s175_s22 }
  0x20   :  { %103 = vrot.lane.b32.xlu1 %v56_v46, %s175_s22 }
  0x21   :  { %101 = vrot.lane.b32.xlu0 %v55_v47, %s175_s22 }
  0x76   :  { %v78_v48 = vpop.permute.xlu1 %77 }
  0x77   :  { %v123_v49 = vmax.bf16 %v78_v48, %v195_v3  ;;  %v74_v50 = vpop.permute.xlu0 %73 }
  0x78   :  { %v121_v51 = vmax.bf16 %v74_v50, %v206_v7 }
  0x79   :  { %140 = vst.msk [vmem:[%s387_s1 + $0x8] sm:$0xf] %vm137_vm0, %v123_v49 }
  0x7a   :  { %138 = vst.msk [vmem:[%s387_s1] sm:$0xf] %vm137_vm0, %v121_v51  ;;  %v80_v52 = vpop.permute.xlu1 %79 }
  0x7b   :  { %v124_v53 = vmax.bf16 %v80_v52, %v216_v10  ;;  %v76_v54 = vpop.permute.xlu0 %75 }
  0x7c   :  { %v122_v55 = vmax.bf16 %v76_v54, %v220_v11 }
  0x7d   :  { %141 = vst.msk [vmem:[%s387_s1 + $0xc] sm:$0xf] %vm137_vm0, %v124_v53 }
  0x7e   :  { %139 = vst.msk [vmem:[%s387_s1 + $0x4] sm:$0xf] %vm137_vm0, %v122_v55  ;;  %v84_v56 = vpop.permute.xlu1 %83 }
  0x7f   :  { %v126_v57 = vmax.bf16 %v84_v56, %v236_v16  ;;  %v82_v58 = vpop.permute.xlu0 %81 }
  0x80   :  { %v125_v59 = vmax.bf16 %v82_v58, %v240_v17 }
  0x81   :  { %143 = vst.msk [vmem:[%s387_s1 + $0x14] sm:$0xf] %vm137_vm0, %v126_v57 }
  0x82   :  { %142 = vst.msk [vmem:[%s387_s1 + $0x10] sm:$0xf] %vm137_vm0, %v125_v59  ;;  %v88_v60 = vpop.permute.xlu1 %87 }
  0x83   :  { %v128_v61 = vmax.bf16 %v88_v60, %v48_v22  ;;  %v86_v62 = vpop.permute.xlu0 %85 }
  0x84   :  { %v127_v63 = vmax.bf16 %v86_v62, %v47_v23 }
  0x85   :  { %145 = vst.msk [vmem:[%s387_s1 + $0x1c] sm:$0xf] %vm137_vm0, %v128_v61 }
  0x86   :  { %144 = vst.msk [vmem:[%s387_s1 + $0x18] sm:$0xf] %vm137_vm0, %v127_v63  ;;  %v92_v0 = vpop.permute.xlu1 %91 }
  0x87   :  { %v130_v1 = vmax.bf16 %v92_v0, %v50_v28  ;;  %v90_v2 = vpop.permute.xlu0 %89 }
  0x88   :  { %v129_v3 = vmax.bf16 %v90_v2, %v49_v29 }
  0x89   :  { %147 = vst.msk [vmem:[%s387_s1 + $0x24] sm:$0xf] %vm137_vm0, %v130_v1 }
  0x8a   :  { %146 = vst.msk [vmem:[%s387_s1 + $0x20] sm:$0xf] %vm137_vm0, %v129_v3  ;;  %v96_v4 = vpop.permute.xlu1 %95 }
  0x8b   :  { %v132_v5 = vmax.bf16 %v96_v4, %v52_v34  ;;  %v94_v6 = vpop.permute.xlu0 %93 }
  0x8c   :  { %v131_v7 = vmax.bf16 %v94_v6, %v51_v35 }
  0x8d   :  { %149 = vst.msk [vmem:[%s387_s1 + $0x2c] sm:$0xf] %vm137_vm0, %v132_v5 }
  0x8e   :  { %148 = vst.msk [vmem:[%s387_s1 + $0x28] sm:$0xf] %vm137_vm0, %v131_v7  ;;  %v100_v8 = vpop.permute.xlu1 %99 }
  0x8f   :  { %v134_v9 = vmax.bf16 %v100_v8, %v54_v40  ;;  %v98_v10 = vpop.permute.xlu0 %97 }
  0x90   :  { %v133_v11 = vmax.bf16 %v98_v10, %v53_v41 }
  0x91   :  { %151 = vst.msk [vmem:[%s387_s1 + $0x34] sm:$0xf] %vm137_vm0, %v134_v9 }
  0x92   :  { %150 = vst.msk [vmem:[%s387_s1 + $0x30] sm:$0xf] %vm137_vm0, %v133_v11  ;;  %v104_v12 = vpop.permute.xlu1 %103 }
  0x93   :  { %v136_v13 = vmax.bf16 %v104_v12, %v56_v46  ;;  %v102_v14 = vpop.permute.xlu0 %101 }
  0x94   :  { %v135_v15 = vmax.bf16 %v102_v14, %v55_v47 }
  0x95   :  { %153 = vst.msk [vmem:[%s387_s1 + $0x3c] sm:$0xf] %vm137_vm0, %v136_v13 }
  0x96   :  { %152 = vst.msk [vmem:[%s387_s1 + $0x38] sm:$0xf] %vm137_vm0, %v135_v15 }

// kernel: unet_down_conv_forward.9
= control target key start
LH: loop header
LB: loop body
LE: loop exit
PB: predicated region body
PF: predicated region fallthrough
CT: control target
= control target key end

     0   :  { %s303_s0 = inlined_call_operand.vmem [shape: bf16[128,128], index: 0, kind: input, shape index: {}]   ;;  %s304_s1 = inlined_call_operand.vmem [shape: f32[1,128], index: 1, kind: input, shape index: {}]   ;;  %s305_s2 = inlined_call_operand.vmem [shape: f32[1,128], index: 2, kind: input, shape index: {}]   ;;  %s306_s3 = inlined_call_operand.vmem [shape: f32[128,128], index: 3, kind: output, shape index: {}]  }
   0x1   :  { %v131_v0 = vld [vmem:[%s303_s0] sm:$0xff]   ;;  %v162_v4 = vld [vmem:[%s303_s0 + $0x8] sm:$0xff]   ;;  %v163_v5 = vld [vmem:[%s303_s0 + $0x10] sm:$0xff]  }
   0x2   :  { %v195_v1 = vld [vmem:[%s304_s1] ss:$0 sm:$0xff]  ;;  %v132_v2 = vunpack.c.l.bf16 %v131_v0  ;;  %v133_v3 = vunpack.c.h.bf16 %v131_v0  ;;  %v164_v6 = vld [vmem:[%s303_s0 + $0x18] sm:$0xff]   ;;  %v136_v8 = vunpack.c.l.bf16 %v162_v4  ;;  %v137_v9 = vunpack.c.h.bf16 %v162_v4  ;;  %v166_v33 = vld [vmem:[%s303_s0 + $0x28] sm:$0xff]  }
   0x3   :  { %v209_v7 = vld [vmem:[%s305_s2] ss:$0 sm:$0xff]  ;;  %v140_v10 = vunpack.c.l.bf16 %v163_v5  ;;  %v141_v11 = vunpack.c.h.bf16 %v163_v5  ;;  %v144_v14 = vunpack.c.l.bf16 %v164_v6  ;;  %v145_v15 = vunpack.c.h.bf16 %v164_v6  ;;  %v167_v34 = vld [vmem:[%s303_s0 + $0x30] sm:$0xff]   ;;  %v168_v39 = vld [vmem:[%s303_s0 + $0x38] sm:$0xff]  }
   0x4   :  { %v53_v12 = vmul.f32 %v132_v2, %v195_v1  ;;  %v54_v13 = vmul.f32 %v133_v3, %v195_v1  ;;  %v55_v16 = vmul.f32 %v136_v8, %v195_v1  ;;  %v56_v17 = vmul.f32 %v137_v9, %v195_v1  ;;  %v165_v28 = vld [vmem:[%s303_s0 + $0x20] sm:$0xff]  }
   0x5   :  { %v57_v18 = vmul.f32 %v140_v10, %v195_v1  ;;  %v58_v19 = vmul.f32 %v141_v11, %v195_v1  ;;  %v59_v22 = vmul.f32 %v144_v14, %v195_v1  ;;  %v60_v23 = vmul.f32 %v145_v15, %v195_v1 }
   0x6   :  { %v76_v20 = vadd.f32 %v209_v7, %v53_v12  ;;  %v77_v21 = vadd.f32 %v209_v7, %v54_v13  ;;  %v78_v24 = vadd.f32 %v209_v7, %v55_v16  ;;  %v79_v25 = vadd.f32 %v209_v7, %v56_v17 }
   0x7   :  { %v80_v26 = vadd.f32 %v209_v7, %v57_v18  ;;  %v81_v27 = vadd.f32 %v209_v7, %v58_v19  ;;  %v82_v31 = vadd.f32 %v209_v7, %v59_v22  ;;  %v83_v32 = vadd.f32 %v209_v7, %v60_v23 }
   0x8   :  { %v92_v29 = vmax.f32 %v76_v20, 0.0  ;;  %v93_v30 = vmax.f32 %v77_v21, 0.0  ;;  %v94_v35 = vmax.f32 %v78_v24, 0.0  ;;  %v95_v36 = vmax.f32 %v79_v25, 0.0 }
   0x9   :  { %v96_v37 = vmax.f32 %v80_v26, 0.0  ;;  %v97_v38 = vmax.f32 %v81_v27, 0.0  ;;  %v98_v40 = vmax.f32 %v82_v31, 0.0  ;;  %v99_v41 = vmax.f32 %v83_v32, 0.0 }
   0xa   :  { %108 = vst [vmem:[%s306_s3] sm:$0xff] %v92_v29  ;;  %109 = vst [vmem:[%s306_s3 + $0x8] sm:$0xff] %v93_v30  ;;  %v148_v42 = vunpack.c.l.bf16 %v165_v28  ;;  %v149_v43 = vunpack.c.h.bf16 %v165_v28  ;;  %v152_v44 = vunpack.c.l.bf16 %v166_v33  ;;  %v153_v45 = vunpack.c.h.bf16 %v166_v33 }
   0xb   :  { %110 = vst [vmem:[%s306_s3 + $0x10] sm:$0xff] %v94_v35  ;;  %111 = vst [vmem:[%s306_s3 + $0x18] sm:$0xff] %v95_v36  ;;  %v156_v46 = vunpack.c.l.bf16 %v167_v34  ;;  %v157_v47 = vunpack.c.h.bf16 %v167_v34  ;;  %v160_v50 = vunpack.c.l.bf16 %v168_v39  ;;  %v161_v51 = vunpack.c.h.bf16 %v168_v39 }
   0xc   :  { %112 = vst [vmem:[%s306_s3 + $0x20] sm:$0xff] %v96_v37  ;;  %113 = vst [vmem:[%s306_s3 + $0x28] sm:$0xff] %v97_v38  ;;  %v61_v48 = vmul.f32 %v148_v42, %v195_v1  ;;  %v62_v49 = vmul.f32 %v149_v43, %v195_v1  ;;  %v63_v52 = vmul.f32 %v152_v44, %v195_v1 }
   0xd   :  { %114 = vst [vmem:[%s306_s3 + $0x30] sm:$0xff] %v98_v40  ;;  %115 = vst [vmem:[%s306_s3 + $0x38] sm:$0xff] %v99_v41  ;;  %v64_v53 = vmul.f32 %v153_v45, %v195_v1  ;;  %v65_v54 = vmul.f32 %v156_v46, %v195_v1  ;;  %v66_v55 = vmul.f32 %v157_v47, %v195_v1 }
   0xe   :  { %v84_v56 = vadd.f32 %v209_v7, %v61_v48  ;;  %v85_v57 = vadd.f32 %v209_v7, %v62_v49  ;;  %v67_v58 = vmul.f32 %v160_v50, %v195_v1  ;;  %v68_v59 = vmul.f32 %v161_v51, %v195_v1 }
   0xf   :  { %v86_v60 = vadd.f32 %v209_v7, %v63_v52  ;;  %v87_v61 = vadd.f32 %v209_v7, %v64_v53  ;;  %v88_v62 = vadd.f32 %v209_v7, %v65_v54  ;;  %v89_v63 = vadd.f32 %v209_v7, %v66_v55 }
  0x10   :  { %v100_v0 = vmax.f32 %v84_v56, 0.0  ;;  %v101_v2 = vmax.f32 %v85_v57, 0.0  ;;  %v90_v3 = vadd.f32 %v209_v7, %v67_v58  ;;  %v91_v4 = vadd.f32 %v209_v7, %v68_v59 }
  0x11   :  { %v102_v5 = vmax.f32 %v86_v60, 0.0  ;;  %v103_v6 = vmax.f32 %v87_v61, 0.0  ;;  %v104_v8 = vmax.f32 %v88_v62, 0.0  ;;  %v105_v9 = vmax.f32 %v89_v63, 0.0 }
  0x12   :  { %116 = vst [vmem:[%s306_s3 + $0x40] sm:$0xff] %v100_v0  ;;  %117 = vst [vmem:[%s306_s3 + $0x48] sm:$0xff] %v101_v2  ;;  %v106_v1 = vmax.f32 %v90_v3, 0.0  ;;  %v107_v10 = vmax.f32 %v91_v4, 0.0 }
  0x13   :  { %118 = vst [vmem:[%s306_s3 + $0x50] sm:$0xff] %v102_v5  ;;  %119 = vst [vmem:[%s306_s3 + $0x58] sm:$0xff] %v103_v6 }
  0x14   :  { %120 = vst [vmem:[%s306_s3 + $0x60] sm:$0xff] %v104_v8  ;;  %121 = vst [vmem:[%s306_s3 + $0x68] sm:$0xff] %v105_v9 }
  0x15   :  { %122 = vst [vmem:[%s306_s3 + $0x70] sm:$0xff] %v106_v1  ;;  %123 = vst [vmem:[%s306_s3 + $0x78] sm:$0xff] %v107_v10 }

// kernel: unet_down_conv_forward.6
= control target key start
LH: loop header
LB: loop body
LE: loop exit
PB: predicated region body
PF: predicated region fallthrough
CT: control target
= control target key end

     0   :  { %s2563_s12 = smov 0   ;;  %s2565_s13 = smov 0   ;;  %s2993_s0 = inlined_call_operand.vmem [shape: bf16[2,10,10,4], index: 0, kind: input, shape index: {}]   ;;  %s2994_s1 = inlined_call_operand.vmem [shape: bf16[9,4,128], index: 1, kind: input, shape index: {}]   ;;  %s2995_s2 = inlined_call_operand.vmem [shape: bf16[2,8,8,128], index: 2, kind: output, shape index: {0}]   ;;  %s2996_s3 = inlined_call_operand.vmem [shape: f32[2,2,128], index: 3, kind: output, shape index: {1}]  }
   0x1   :  { %s2567_s14 = smov 0  }
   0x2 LB: > { %s26_s15 = sadd.s32 1, %s2536_s13  ;;  %p2102_p0 = scmp.ge.s32.totalorder %s2540_s14, 1  ;;  %s2540_s14 = sphi %s2567_s14, %s14_s14   ;;  %s2536_s13 = sphi %s2565_s13, %s3002_s13   ;;  %s2532_s12 = sphi %s2563_s12, %s3001_s12  }
   0x3   : > { %p28_p1 = scmp.ge.s32.totalorder %s26_s15, 2  ;;  %p154_p2 = scmp.lt.s32.totalorder %s2540_s14, 3 }
   0x5   : > { %s3004_s15 = smov (%p28_p1, %s26_s15), 0  ;;  %p155_p3 = pnand %p2102_p0, %p154_p2 }
   0x6   : > { %p186_p4 = scmp.lt.s32.totalorder (!%p155_p3), %s2532_s12, 1 }
   0x7   : > { %158 = sbr.rel (%p155_p3) target bundleno = 338 (0x152), region = 28 }
   0xc   : > { %v219_v0 = vld [vmem:[%s2994_s1] sm:$0x3]  ;;  %vm253_vm0 = vcmask 1041408   ;;  %v2115_v2 = vld [vmem:[%s2994_s1 + $0x2] sm:$0x3]  ;;  %s3006_s12 = smov (!%p186_p4, %s2532_s12), 1 }
   0xd   : > { %2470 = vmatprep.subr.msk.bf16.mxu0 %vm253_vm0, %v219_v0  ;;  %2471 = vmatprep.subr.msk.bf16.mxu1 %vm253_vm0, %v219_v0  ;;  %v255_v1 = vsel %vm253_vm0, %v219_v0, 0  ;;  %v2132_v3 = vld [vmem:[%s2994_s1 + $0x4] sm:$0x3]  ;;  %vm611_vm1 = vcmask 1042432   ;;  %vm612_vm2 = vcmask 1046532   ;;  %s2480_s22 = smul.u32 80, %s3006_s12 }
   0xe   : > { %2379 = vmatpush3.bf16.msra.mxu0 %v255_v1  ;;  %2469 = vmatpush3.bf16.msra.mxu1 %v255_v1  ;;  %vm240_vm3 = vcmask 31744   ;;  %v488_v4 = vsel %vm253_vm0, %v2115_v2, 0  ;;  %v673_v5 = vsel %vm253_vm0, %v2132_v3, 0  ;;  %vm2605_vm4 = vmor %vm611_vm1, %vm612_vm2  ;;  %vm346_vm5 = vsmask.f32 3328  ;;  %s2106_s11 = sshll.u32 %s3006_s12, 1 }
   0xf   : > { %2472 = vmatprep.subr.msk.bf16.mxu1 %vm253_vm0, %v2115_v2  ;;  %2473 = vmatprep.subr.msk.bf16.mxu0 %vm253_vm0, %v2132_v3  ;;  %s2601_s25 = scalar_lea.vmem %s2993_s0, %s2480_s22  ;;  %vm347_vm6 = vsmask.f32 7440  ;;  %v2149_v9 = vld [vmem:[%s2994_s1 + $0x6] sm:$0x3]  ;;  %v2174_v10 = vld [vmem:[%s2994_s1 + $0x8] sm:$0x3]  ;;  %s2910_s18 = scalar_lea.vmem %s2996_s3, %s2106_s11 }
  0x10   : > { %v2506_v7 = vld [vmem:[%s2601_s25] ss:$8 sps:$4 sm:$0xff]   ;;  %v2508_v11 = vld [vmem:[%s2601_s25 + $0x10] ss:$8 sps:$4 sm:$0xff]   ;;  %v580_v14 = vld [vmem:[%s2601_s25 + $0x4] sm:$0x1] }
  0x11   : > { %v2507_v8 = vld [vmem:[%s2601_s25 + $0x20] ss:$8 sps:$4 sm:$0xff]   ;;  %2380 = vmatprep.mubr.msk.bf16.mxu0 %vm240_vm3, %v2506_v7  ;;  %v2509_v12 = vld [vmem:[%s2601_s25 + $0x30] ss:$8 sps:$4 sm:$0xff]   ;;  %v582_v16 = vld [vmem:[%s2601_s25 + $0xc] sm:$0x1] }
  0x12   : > { %2384 = vmatprep.mubr.msk.bf16.mxu1 %vm240_vm3, %v2507_v8  ;;  %2381 = vmatmul.mubr.msk.bf16.vlgmr.msra.gmra.mxu0 %vm240_vm3, %v2508_v11  ;;  %v579_v13 = vld [vmem:[%s2601_s25] sm:$0xe]  ;;  %v581_v15 = vld [vmem:[%s2601_s25 + $0x8] sm:$0xe]  ;;  %v616_v18 = vrot.slane %v580_v14, 5  ;;  %v620_v20 = vrot.slane %v582_v16, 5  ;;  %vm2648_vm7 = vmor %vm346_vm5, %vm347_vm6 }
  0x13   : > { %2385 = vmatmul.mubr.msk.bf16.vlgmr.msra.gmra.mxu1 %vm240_vm3, %v2509_v12  ;;  %2399 = vmatpush3.bf16.msra.mxu0 %v673_v5  ;;  %v2124_v17 = vrot.slane %v579_v13, 9  ;;  %v2125_v19 = vrot.slane %v581_v15, 9  ;;  %v330_v21 = vld [vmem:[%s2601_s25] sm:$0xf]  ;;  %v331_v22 = vld [vmem:[%s2601_s25 + $0x4] sm:$0x1] }
  0x14   : > { %2389 = vmatpush3.bf16.msra.mxu1 %v488_v4  ;;  %v2630_v23 = vsel %vm253_vm0, %v2149_v9, 0  ;;  %2475 = vmatprep.subr.msk.bf16.mxu0 %vm253_vm0, %v2174_v10  ;;  %v332_v25 = vld [vmem:[%s2601_s25 + $0x8] sm:$0xf]  ;;  %v333_v26 = vld [vmem:[%s2601_s25 + $0xc] sm:$0x1]  ;;  %v350_v27 = vshrl.u32 %v330_v21, 16 }
  0x15   : > { %v617_v24 = vsel %vm2605_vm4, %v2124_v17, %v616_v18  ;;  %v353_v28 = vshll.u32 %v330_v21, 16  ;;  %2474 = vmatprep.subr.msk.bf16.mxu1 %vm253_vm0, %v2149_v9  ;;  %v621_v29 = vsel %vm2605_vm4, %v2125_v19, %v620_v20  ;;  %v359_v30 = vshll.u32 %v331_v22, 16  ;;  %v583_v33 = vld [vmem:[%s2601_s25 + $0x10] sm:$0xe]  ;;  %v584_v38 = vld [vmem:[%s2601_s25 + $0x14] sm:$0x1] }
  0x16   : > { %v364_v31 = vshrl.u32 %v332_v25, 16  ;;  %v367_v32 = vshll.u32 %v332_v25, 16  ;;  %v2133_v34 = vcombine.low %v617_v24, %v621_v29  ;;  %v352_v35 = vrot.slane %v350_v27, 4  ;;  %v585_v41 = vld [vmem:[%s2601_s25 + $0x18] sm:$0xe]  ;;  %s2301_s19 = sshll.u32 %s3006_s12, 5 }
  0x17   : > { %v355_v36 = vrot.slane %v353_v28, 5  ;;  %v373_v37 = vshll.u32 %v333_v26, 16  ;;  %v2126_v42 = vrot.slane %v583_v33, 9  ;;  %v1054_v43 = vsel %vm253_vm0, %v2174_v10, 0  ;;  %v586_v46 = vld [vmem:[%s2601_s25 + $0x1c] sm:$0x1]  ;;  %s2967_s22 = scalar_lea.vmem %s2995_s2, %s2301_s19 }
  0x18   : > { %v366_v39 = vrot.slane %v364_v31, 4  ;;  %v369_v40 = vrot.slane %v367_v32, 5  ;;  %2400 = vmatprep.mubr.msk.bf16.mxu0 %vm240_vm3, %v2133_v34  ;;  %v361_v45 = vrot.slane %v359_v30, 5  ;;  %v624_v47 = vrot.slane %v584_v38, 5  ;;  %v334_v53 = vld [vmem:[%s2601_s25 + $0x10] sm:$0xf] }
  0x19   : > { %v356_v44 = vor.u32 %v355_v36, %v352_v35  ;;  %v2127_v48 = vrot.slane %v585_v41, 9  ;;  %v375_v51 = vrot.slane %v373_v37, 5  ;;  %v628_v52 = vrot.slane %v586_v46, 5  ;;  %v335_v54 = vld [vmem:[%s2601_s25 + $0x14] sm:$0x1] }
  0x1a   : > { %v370_v50 = vor.u32 %v369_v40, %v366_v39  ;;  %v625_v56 = vsel %vm2605_vm4, %v2126_v42, %v624_v47  ;;  %v336_v57 = vld [vmem:[%s2601_s25 + $0x18] sm:$0xf]  ;;  %v337_v58 = vld [vmem:[%s2601_s25 + $0x1c] sm:$0x1]  ;;  %v378_v59 = vshrl.u32 %v334_v53, 16  ;;  %v381_v62 = vshll.u32 %v334_v53, 16 }
  0x1b   : > { %v357_v55 = vrot.slane %v356_v44, 4  ;;  %v629_v61 = vsel %vm2605_vm4, %v2127_v48, %v628_v52  ;;  %v387_v63 = vshll.u32 %v335_v54, 16  ;;  %v587_v0 = vld [vmem:[%s2601_s25 + $0x20] sm:$0xe]  ;;  %v2664_v1 = vld [vmem:[%s2994_s1 + $0xa] sm:$0x3] }
  0x1c   : > { %v371_v60 = vrot.slane %v370_v50, 4  ;;  %v2224_v2 = vld [vmem:[%s2994_s1 + $0xc] sm:$0x3]  ;;  %v2134_v4 = vcombine.low %v625_v56, %v629_v61  ;;  %v380_v5 = vrot.slane %v378_v59, 4  ;;  %v392_v7 = vshrl.u32 %v336_v57, 16 }
  0x1d   : > { %v362_v3 = vsel %vm2648_vm7, %v357_v55, %v361_v45  ;;  %v588_v8 = vld [vmem:[%s2601_s25 + $0x24] sm:$0x1]  ;;  %v589_v9 = vld [vmem:[%s2601_s25 + $0x28] sm:$0xe]  ;;  %v383_v11 = vrot.slane %v381_v62, 5  ;;  %v389_v12 = vrot.slane %v387_v63, 5 }
  0x1e   : > { %v376_v10 = vsel %vm2648_vm7, %v371_v60, %v375_v51  ;;  %v395_v13 = vshll.u32 %v336_v57, 16  ;;  %v590_v14 = vld [vmem:[%s2601_s25 + $0x2c] sm:$0x1]  ;;  %2401 = vmatmul.mubr.msk.bf16.vlgmr.msra.gmra.mxu0 %vm240_vm3, %v2134_v4  ;;  %v394_v16 = vrot.slane %v392_v7, 4  ;;  %v401_v17 = vshll.u32 %v337_v58, 16 }
  0x1f   : > { %v2116_v15 = vcombine.low %v362_v3, %v376_v10  ;;  %v2128_v18 = vrot.slane %v587_v0, 9  ;;  %v338_v19 = vld [vmem:[%s2601_s25 + $0x20] sm:$0xf]  ;;  %v384_v20 = vor.u32 %v383_v11, %v380_v5  ;;  %2419 = vmatpush3.bf16.msra.mxu0 %v1054_v43  ;;  %v632_v22 = vrot.slane %v588_v8, 5  ;;  %v339_v25 = vld [vmem:[%s2601_s25 + $0x24] sm:$0x1] }
  0x20   : > { %v397_v21 = vrot.slane %v395_v13, 5  ;;  %v2129_v24 = vrot.slane %v589_v9, 9  ;;  %v403_v26 = vrot.slane %v401_v17, 5  ;;  %v636_v27 = vrot.slane %v590_v14, 5  ;;  %v340_v28 = vld [vmem:[%s2601_s25 + $0x28] sm:$0xf]  ;;  %2477 = vmatprep.subr.msk.bf16.mxu0 %vm253_vm0, %v2224_v2 }
  0x21   : > { %2390 = vmatprep.mubr.msk.bf16.mxu1 %vm240_vm3, %v2116_v15  ;;  %v2683_v29 = vsel %vm253_vm0, %v2664_v1, 0  ;;  %v2687_v30 = vsel %vm253_vm0, %v2224_v2, 0  ;;  %v385_v31 = vrot.slane %v384_v20, 4  ;;  %v633_v33 = vsel %vm2605_vm4, %v2128_v18, %v632_v22  ;;  %v341_v34 = vld [vmem:[%s2601_s25 + $0x2c] sm:$0x1] }
  0x22   : > { %v398_v32 = vor.u32 %v397_v21, %v394_v16  ;;  %v406_v35 = vshrl.u32 %v338_v19, 16  ;;  %v591_v36 = vld [vmem:[%s2601_s25 + $0x30] sm:$0xe]  ;;  %v637_v37 = vsel %vm2605_vm4, %v2129_v24, %v636_v27  ;;  %v409_v38 = vshll.u32 %v338_v19, 16  ;;  %v592_v41 = vld [vmem:[%s2601_s25 + $0x34] sm:$0x1] }
  0x23   : > { %v415_v39 = vshll.u32 %v339_v25, 16  ;;  %v420_v40 = vshrl.u32 %v340_v28, 16  ;;  %v390_v42 = vsel %vm2648_vm7, %v385_v31, %v389_v12  ;;  %v2135_v44 = vcombine.low %v633_v33, %v637_v37  ;;  %v593_v46 = vld [vmem:[%s2601_s25 + $0x38] sm:$0xe]  ;;  %v594_v47 = vld [vmem:[%s2601_s25 + $0x3c] sm:$0x1] }
  0x24   : > { %v399_v43 = vrot.slane %v398_v32, 4  ;;  %v408_v45 = vrot.slane %v406_v35, 4  ;;  %v411_v48 = vrot.slane %v409_v38, 5  ;;  %v423_v52 = vshll.u32 %v340_v28, 16  ;;  %v342_v53 = vld [vmem:[%s2601_s25 + $0x30] sm:$0xf] }
  0x25   : > { %v417_v50 = vrot.slane %v415_v39, 5  ;;  %v422_v51 = vrot.slane %v420_v40, 4  ;;  %2404 = vmatprep.mubr.msk.bf16.mxu0 %vm240_vm3, %v2135_v44  ;;  %v429_v55 = vshll.u32 %v341_v34, 16  ;;  %v2130_v56 = vrot.slane %v591_v36, 9  ;;  %v343_v58 = vld [vmem:[%s2601_s25 + $0x34] sm:$0x1] }
  0x26   : > { %v404_v54 = vsel %vm2648_vm7, %v399_v43, %v403_v26  ;;  %v640_v57 = vrot.slane %v592_v41, 5  ;;  %v412_v60 = vor.u32 %v411_v48, %v408_v45  ;;  %v425_v61 = vrot.slane %v423_v52, 5  ;;  %v344_v63 = vld [vmem:[%s2601_s25 + $0x38] sm:$0xf]  ;;  %v345_v4 = vld [vmem:[%s2601_s25 + $0x3c] sm:$0x1] }
  0x27   : > { %v2117_v59 = vcombine.low %v390_v42, %v404_v54  ;;  %v2131_v62 = vrot.slane %v593_v46, 9  ;;  %v431_v0 = vrot.slane %v429_v55, 5  ;;  %v644_v3 = vrot.slane %v594_v47, 5  ;;  %v2158_v11 = vld [vmem:[%s2601_s25 + $0x8] sm:$0xf] }
  0x28   : > { %v641_v2 = vsel %vm2605_vm4, %v2130_v56, %v640_v57  ;;  %v434_v5 = vshrl.u32 %v342_v53, 16  ;;  %v413_v7 = vrot.slane %v412_v60, 4  ;;  %v426_v8 = vor.u32 %v425_v61, %v422_v51  ;;  %v2159_v16 = vld [vmem:[%s2601_s25 + $0xc] sm:$0x1]  ;;  %v2160_v25 = vld [vmem:[%s2601_s25 + $0x10] sm:$0xf] }
  0x29   : > { %2391 = vmatmul.mubr.msk.bf16.vlgmr.msra.gmra.mxu1 %vm240_vm3, %v2117_v59  ;;  %v437_v9 = vshll.u32 %v342_v53, 16  ;;  %v443_v10 = vshll.u32 %v343_v58, 16  ;;  %v645_v12 = vsel %vm2605_vm4, %v2131_v62, %v644_v3  ;;  %v448_v14 = vshrl.u32 %v344_v63, 16  ;;  %v2161_v28 = vld [vmem:[%s2601_s25 + $0x14] sm:$0x1] }
  0x2a   : > { %2409 = vmatpush3.bf16.msra.mxu1 %v2630_v23  ;;  %v436_v13 = vrot.slane %v434_v5, 4  ;;  %v451_v15 = vshll.u32 %v344_v63, 16  ;;  %v418_v17 = vsel %vm2648_vm7, %v413_v7, %v417_v50  ;;  %v427_v18 = vrot.slane %v426_v8, 4  ;;  %v2162_v36 = vld [vmem:[%s2601_s25 + $0x18] sm:$0xf] }
  0x2b   : > { %v2136_v19 = vcombine.low %v641_v2, %v645_v12  ;;  %v439_v20 = vrot.slane %v437_v9, 5  ;;  %2476 = vmatprep.subr.msk.bf16.mxu1 %vm253_vm0, %v2664_v1  ;;  %v445_v21 = vrot.slane %v443_v10, 5  ;;  %v450_v23 = vrot.slane %v448_v14, 4  ;;  %v2163_v37 = vld [vmem:[%s2601_s25 + $0x1c] sm:$0x1] }
  0x2c   : > { %v453_v22 = vrot.slane %v451_v15, 5  ;;  %v457_v24 = vshll.u32 %v345_v4, 16  ;;  %v432_v26 = vsel %vm2648_vm7, %v427_v18, %v431_v0  ;;  %v916_v31 = vshrl.u32 %v2158_v11, 16  ;;  %v2510_v46 = vld [vmem:[%s2601_s25 + $0x8] ss:$8 sps:$4 sm:$0xff]  }
  0x2d   : > { %2405 = vmatmul.mubr.msk.bf16.gmra.mxu0 %vm240_vm3, %v2136_v19  ;;  %v440_v27 = vor.u32 %v439_v20, %v436_v13  ;;  %v919_v32 = vshll.u32 %v2158_v11, 16  ;;  %v2118_v33 = vcombine.low %v418_v17, %v432_v26  ;;  %v925_v35 = vshll.u32 %v2159_v16, 16  ;;  %v2164_v51 = vld [vmem:[%s2601_s25 + $0x20] sm:$0xf]  ;;  %v2165_v52 = vld [vmem:[%s2601_s25 + $0x24] sm:$0x1] }
  0x2e   : > { %v454_v34 = vor.u32 %v453_v22, %v450_v23  ;;  %v459_v1 = vrot.slane %v457_v24, 5  ;;  %v918_v39 = vrot.slane %v916_v31, 4  ;;  %v930_v41 = vshrl.u32 %v2160_v25, 16  ;;  %v2166_v58 = vld [vmem:[%s2601_s25 + $0x28] sm:$0xf] }
  0x2f   : > { %v441_v38 = vrot.slane %v440_v27, 4  ;;  %v921_v40 = vrot.slane %v919_v32, 5  ;;  %2394 = vmatprep.mubr.msk.bf16.mxu1 %vm240_vm3, %v2118_v33  ;;  %v927_v43 = vrot.slane %v925_v35, 5  ;;  %v933_v44 = vshll.u32 %v2160_v25, 16  ;;  %v2167_v63 = vld [vmem:[%s2601_s25 + $0x2c] sm:$0x1] }
  0x30   : > { %v455_v42 = vrot.slane %v454_v34, 4  ;;  %v939_v45 = vshll.u32 %v2161_v28, 16  ;;  %v932_v50 = vrot.slane %v930_v41, 4  ;;  %v944_v53 = vshrl.u32 %v2162_v36, 16  ;;  %v2168_v5 = vld [vmem:[%s2601_s25 + $0x30] sm:$0xf] }
  0x31   : > { %v446_v47 = vsel %vm2648_vm7, %v441_v38, %v445_v21  ;;  %v922_v48 = vor.u32 %v921_v40, %v918_v39  ;;  %v935_v55 = vrot.slane %v933_v44, 5  ;;  %v947_v57 = vshll.u32 %v2162_v36, 16  ;;  %v2511_v16 = vld [vmem:[%s2601_s25 + $0x18] ss:$8 sps:$4 sm:$0xff]   ;;  %v2169_v17 = vld [vmem:[%s2601_s25 + $0x34] sm:$0x1] }
  0x32   : > { %v460_v54 = vsel %vm2648_vm7, %v455_v42, %v459_v1  ;;  %v941_v56 = vrot.slane %v939_v45, 5  ;;  %v946_v61 = vrot.slane %v944_v53, 4  ;;  %v953_v62 = vshll.u32 %v2163_v37, 16  ;;  %v2512_v25 = vld [vmem:[%s2601_s25 + $0x28] ss:$8 sps:$4 sm:$0xff]  }
  0x33   : > { %v2119_v59 = vcombine.low %v446_v47, %v460_v54  ;;  %v923_v60 = vrot.slane %v922_v48, 4  ;;  %v936_v0 = vor.u32 %v935_v55, %v932_v50  ;;  %v949_v2 = vrot.slane %v947_v57, 5  ;;  %v2170_v26 = vld [vmem:[%s2601_s25 + $0x38] sm:$0xf]  ;;  %v2171_v27 = vld [vmem:[%s2601_s25 + $0x3c] sm:$0x1] }
  0x34   : > { %v958_v3 = vshrl.u32 %v2164_v51, 16  ;;  %v961_v4 = vshll.u32 %v2164_v51, 16  ;;  %v955_v8 = vrot.slane %v953_v62, 5  ;;  %v967_v9 = vshll.u32 %v2165_v52, 16  ;;  %v2172_v34 = vld [vmem:[%s2601_s25 + $0x40] sm:$0xf] }
  0x35   : > { %2395 = vmatmul.mubr.msk.bf16.gmra.mxu1 %vm240_vm3, %v2119_v59  ;;  %v928_v7 = vsel %vm2648_vm7, %v923_v60, %v927_v43  ;;  %v972_v10 = vshrl.u32 %v2166_v58, 16  ;;  %v937_v11 = vrot.slane %v936_v0, 4  ;;  %v950_v12 = vor.u32 %v949_v2, %v946_v61  ;;  %v2173_v38 = vld [vmem:[%s2601_s25 + $0x44] sm:$0x1]  ;;  %v2755_v39 = vld [vmem:[%s2994_s1 + $0xe] sm:$0x3] }
  0x36   : > { %2410 = vmatprep.mubr.msk.bf16.mxu1 %vm240_vm3, %v2510_v46  ;;  %v960_v13 = vrot.slane %v958_v3, 4  ;;  %v963_v14 = vrot.slane %v961_v4, 5  ;;  %v969_v15 = vrot.slane %v967_v9, 5  ;;  %v975_v19 = vshll.u32 %v2166_v58, 16  ;;  %v2764_v53 = vld [vmem:[%s2994_s1 + $0x10] sm:$0x3] }
  0x37   : > { %v974_v18 = vrot.slane %v972_v10, 4  ;;  %v981_v20 = vshll.u32 %v2167_v63, 16  ;;  %v942_v21 = vsel %vm2648_vm7, %v937_v11, %v941_v56  ;;  %v951_v23 = vrot.slane %v950_v12, 4  ;;  %v2513_v61 = vld [vmem:[%s2601_s25 + $0x38] ss:$8 sps:$4 sm:$0xff]  }
  0x38   : > { %v964_v22 = vor.u32 %v963_v14, %v960_v13  ;;  %v986_v24 = vshrl.u32 %v2168_v5, 16  ;;  %v2175_v28 = vcombine.low %v928_v7, %v942_v21  ;;  %v977_v31 = vrot.slane %v975_v19, 5  ;;  %v2183_v62 = vld [vmem:[%s2601_s25 + $0x8] sm:$0xe]  ;;  %v2184_v0 = vld [vmem:[%s2601_s25 + $0xc] sm:$0x1] }
  0x39   : > { %v983_v32 = vrot.slane %v981_v20, 5  ;;  %v989_v33 = vshll.u32 %v2168_v5, 16  ;;  %v956_v1 = vsel %vm2648_vm7, %v951_v23, %v955_v8  ;;  %v995_v37 = vshll.u32 %v2169_v17, 16  ;;  %v2185_v2 = vld [vmem:[%s2601_s25 + $0x10] sm:$0xe] }
  0x3a   : > { %v965_v35 = vrot.slane %v964_v22, 4  ;;  %v988_v36 = vrot.slane %v986_v24, 4  ;;  %2420 = vmatprep.mubr.msk.bf16.mxu0 %vm240_vm3, %v2175_v28  ;;  %v978_v40 = vor.u32 %v977_v31, %v974_v18  ;;  %v1000_v42 = vshrl.u32 %v2170_v26, 16  ;;  %v2186_v7 = vld [vmem:[%s2601_s25 + $0x14] sm:$0x1] }
  0x3b   : > { %v991_v41 = vrot.slane %v989_v33, 5  ;;  %v1003_v43 = vshll.u32 %v2170_v26, 16  ;;  %v997_v45 = vrot.slane %v995_v37, 5  ;;  %v1009_v46 = vshll.u32 %v2171_v27, 16  ;;  %v2187_v14 = vld [vmem:[%s2601_s25 + $0x18] sm:$0xe] }
  0x3c   : > { %v970_v44 = vsel %vm2648_vm7, %v965_v35, %v969_v15  ;;  %v1014_v47 = vshrl.u32 %v2172_v34, 16  ;;  %v979_v50 = vrot.slane %v978_v40, 4  ;;  %v1002_v52 = vrot.slane %v1000_v42, 4  ;;  %v2188_v15 = vld [vmem:[%s2601_s25 + $0x1c] sm:$0x1] }
  0x3d   : > { %v2176_v48 = vcombine.low %v956_v1, %v970_v44  ;;  %2411 = vmatmul.mubr.msk.bf16.vlgmr.msra.gmra.mxu1 %vm240_vm3, %v2511_v16  ;;  %v992_v51 = vor.u32 %v991_v41, %v988_v36  ;;  %v1005_v54 = vrot.slane %v1003_v43, 5  ;;  %v1017_v56 = vshll.u32 %v2172_v34, 16  ;;  %v2189_v19 = vld [vmem:[%s2601_s25 + $0x20] sm:$0xe]  ;;  %v2190_v20 = vld [vmem:[%s2601_s25 + $0x24] sm:$0x1] }
  0x3e   : > { %2429 = vmatpush3.bf16.msra.mxu1 %v2683_v29  ;;  %2414 = vmatprep.mubr.msk.bf16.mxu1 %vm240_vm3, %v2512_v25  ;;  %v1016_v55 = vrot.slane %v1014_v47, 4  ;;  %v984_v57 = vsel %vm2648_vm7, %v979_v50, %v983_v32  ;;  %v1011_v59 = vrot.slane %v1009_v46, 5  ;;  %v1023_v60 = vshll.u32 %v2173_v38, 16  ;;  %v2514_v27 = vld [vmem:[%s2601_s25 + $0x10] ss:$8 sps:$4 sm:$0xff]  }
  0x3f   : > { %2421 = vmatmul.mubr.msk.bf16.vlgmr.msra.gmra.mxu0 %vm240_vm3, %v2176_v48  ;;  %v993_v58 = vrot.slane %v992_v51, 4  ;;  %2478 = vmatprep.subr.msk.bf16.mxu1 %vm253_vm0, %v2755_v39  ;;  %v1006_v29 = vor.u32 %v1005_v54, %v1002_v52  ;;  %v1019_v63 = vrot.slane %v1017_v56, 5  ;;  %v2199_v3 = vrot.slane %v2183_v62, 9  ;;  %v2191_v28 = vld [vmem:[%s2601_s25 + $0x28] sm:$0xe] }
  0x40   : > { %2439 = vmatpush3.bf16.msra.mxu0 %v2687_v30  ;;  %v1025_v5 = vrot.slane %v1023_v60, 5  ;;  %v1179_v8 = vrot.slane %v2184_v0, 5  ;;  %v2200_v9 = vrot.slane %v2185_v2, 9  ;;  %v1183_v12 = vrot.slane %v2186_v7, 5  ;;  %v2192_v34 = vld [vmem:[%s2601_s25 + $0x2c] sm:$0x1] }
  0x41   : > { %v998_v4 = vsel %vm2648_vm7, %v993_v58, %v997_v45  ;;  %2479 = vmatprep.subr.msk.bf16.mxu0 %vm253_vm0, %v2764_v53  ;;  %v1007_v10 = vrot.slane %v1006_v29, 4  ;;  %v1020_v11 = vor.u32 %v1019_v63, %v1016_v55  ;;  %v2201_v21 = vrot.slane %v2187_v14, 9  ;;  %v2193_v1 = vld [vmem:[%s2601_s25 + $0x30] sm:$0xe]  ;;  %v2194_v35 = vld [vmem:[%s2601_s25 + $0x34] sm:$0x1] }
  0x42   : > { %v2177_v30 = vcombine.low %v984_v57, %v998_v4  ;;  %v1180_v13 = vsel %vm2605_vm4, %v2199_v3, %v1179_v8  ;;  %v1184_v18 = vsel %vm2605_vm4, %v2200_v9, %v1183_v12  ;;  %v1187_v22 = vrot.slane %v2188_v15, 5  ;;  %v2195_v44 = vld [vmem:[%s2601_s25 + $0x38] sm:$0xe]  ;;  %v2196_v45 = vld [vmem:[%s2601_s25 + $0x3c] sm:$0x1] }
  0x43   : > { %v1012_v16 = vsel %vm2648_vm7, %v1007_v10, %v1011_v59  ;;  %v1021_v17 = vrot.slane %v1020_v11, 4  ;;  %v2208_v23 = vcombine.low %v1180_v13, %v1184_v18  ;;  %v2202_v24 = vrot.slane %v2189_v19, 9  ;;  %v2197_v46 = vld [vmem:[%s2601_s25 + $0x40] sm:$0xe]  ;;  %v2198_v50 = vld [vmem:[%s2601_s25 + $0x44] sm:$0x1] }
  0x44   : > { %2424 = vmatprep.mubr.msk.bf16.mxu0 %vm240_vm3, %v2177_v30  ;;  %v1191_v25 = vrot.slane %v2190_v20, 5  ;;  %v1188_v32 = vsel %vm2605_vm4, %v2201_v21, %v1187_v22  ;;  %v2203_v36 = vrot.slane %v2191_v28, 9  ;;  %v1195_v37 = vrot.slane %v2192_v34, 5  ;;  %v2515_v47 = vld [vmem:[%s2601_s25 + $0x20] ss:$8 sps:$4 sm:$0xff]  }
  0x45   : > { %2415 = vmatmul.mubr.msk.bf16.gmra.mxu1 %vm240_vm3, %v2513_v61  ;;  %v1026_v26 = vsel %vm2648_vm7, %v1021_v17, %v1025_v5  ;;  %v2204_v38 = vrot.slane %v2193_v1, 9  ;;  %v1617_v41 = vsel %vm253_vm0, %v2755_v39, 0  ;;  %v1199_v42 = vrot.slane %v2194_v35, 5  ;;  %v2516_v55 = vld [vmem:[%s2601_s25 + $0x30] ss:$8 sps:$4 sm:$0xff]  }
  0x46   : > { %v2178_v31 = vcombine.low %v1012_v16, %v1026_v26  ;;  %2430 = vmatprep.mubr.msk.bf16.mxu1 %vm240_vm3, %v2208_v23  ;;  %v1192_v33 = vsel %vm2605_vm4, %v2202_v24, %v1191_v25  ;;  %v1196_v43 = vsel %vm2605_vm4, %v2203_v36, %v1195_v37  ;;  %v2205_v51 = vrot.slane %v2195_v44, 9  ;;  %v2258_v58 = vld [vmem:[%s2601_s25 + $0x10] sm:$0xe]  ;;  %v2259_v59 = vld [vmem:[%s2601_s25 + $0x14] sm:$0x1] }
  0x47   : > { %v2209_v40 = vcombine.low %v1188_v32, %v1192_v33  ;;  %v1200_v48 = vsel %vm2605_vm4, %v2204_v38, %v1199_v42  ;;  %v1203_v39 = vrot.slane %v2196_v45, 5  ;;  %v2206_v52 = vrot.slane %v2197_v46, 9  ;;  %v2260_v61 = vld [vmem:[%s2601_s25 + $0x18] sm:$0xe]  ;;  %v2261_v62 = vld [vmem:[%s2601_s25 + $0x1c] sm:$0x1] }
  0x48   : > { %2425 = vmatmul.mubr.msk.bf16.gmra.mxu0 %vm240_vm3, %v2178_v31  ;;  %v1799_v54 = vsel %vm253_vm0, %v2764_v53, 0  ;;  %v2210_v56 = vcombine.low %v1196_v43, %v1200_v48  ;;  %v1207_v57 = vrot.slane %v2198_v50, 5  ;;  %v2274_v29 = vrot.slane %v2258_v58, 9  ;;  %v2233_v3 = vld [vmem:[%s2601_s25 + $0x10] sm:$0xf] }
  0x49   : > { %2440 = vmatprep.mubr.msk.bf16.mxu0 %vm240_vm3, %v2514_v27  ;;  %v1204_v60 = vsel %vm2605_vm4, %v2205_v51, %v1203_v39  ;;  %v1742_v63 = vrot.slane %v2259_v59, 5  ;;  %v2275_v0 = vrot.slane %v2260_v61, 9  ;;  %v1746_v2 = vrot.slane %v2261_v62, 5  ;;  %v2234_v4 = vld [vmem:[%s2601_s25 + $0x14] sm:$0x1] }
  0x4a   : > { %v1208_v53 = vsel %vm2605_vm4, %v2206_v52, %v1207_v57  ;;  %v2235_v5 = vld [vmem:[%s2601_s25 + $0x18] sm:$0xf]  ;;  %v2236_v7 = vld [vmem:[%s2601_s25 + $0x1c] sm:$0x1]  ;;  %v1479_v8 = vshrl.u32 %v2233_v3, 16  ;;  %v1482_v9 = vshll.u32 %v2233_v3, 16 }
  0x4b   : > { %v2211_v30 = vcombine.low %v1204_v60, %v1208_v53  ;;  %v1488_v10 = vshll.u32 %v2234_v4, 16  ;;  %v1493_v11 = vshrl.u32 %v2235_v5, 16  ;;  %v1496_v12 = vshll.u32 %v2235_v5, 16  ;;  %v2262_v13 = vld [vmem:[%s2601_s25 + $0x20] sm:$0xe] }
  0x4c   : > { %v1743_v14 = vsel %vm2605_vm4, %v2274_v29, %v1742_v63  ;;  %v1481_v15 = vrot.slane %v1479_v8, 4  ;;  %v1484_v16 = vrot.slane %v1482_v9, 5  ;;  %v1502_v17 = vshll.u32 %v2236_v7, 16  ;;  %v2263_v18 = vld [vmem:[%s2601_s25 + $0x24] sm:$0x1] }
  0x4d   : > { %2431 = vmatmul.mubr.msk.bf16.vlgmr.msra.gmra.mxu1 %vm240_vm3, %v2209_v40  ;;  %v1747_v19 = vsel %vm2605_vm4, %v2275_v0, %v1746_v2  ;;  %v1495_v20 = vrot.slane %v1493_v11, 4  ;;  %v1498_v21 = vrot.slane %v1496_v12, 5  ;;  %v2264_v23 = vld [vmem:[%s2601_s25 + $0x28] sm:$0xe]  ;;  %v2276_v22 = vrot.slane %v2262_v13, 9 }
  0x4e   : > { %2449 = vmatpush3.bf16.msra.mxu1 %v1617_v41  ;;  %2434 = vmatprep.mubr.msk.bf16.mxu1 %vm240_vm3, %v2210_v56  ;;  %v2517_v24 = vld [vmem:[%s2601_s25 + $0x40] ss:$8 sps:$4 sm:$0xff]   ;;  %v1485_v25 = vor.u32 %v1484_v16, %v1481_v15  ;;  %v1490_v26 = vrot.slane %v1488_v10, 5  ;;  %v2265_v27 = vld [vmem:[%s2601_s25 + $0x2c] sm:$0x1]  ;;  %v1750_v28 = vrot.slane %v2263_v18, 5  ;;  %v2283_v36 = vcombine.low %v1743_v14, %v1747_v19 }
  0x4f   : > { %v2277_v31 = vrot.slane %v2264_v23, 9  ;;  %v1499_v32 = vor.u32 %v1498_v21, %v1495_v20  ;;  %v1504_v33 = vrot.slane %v1502_v17, 5  ;;  %v1754_v34 = vrot.slane %v2265_v27, 5  ;;  %v2237_v1 = vld [vmem:[%s2601_s25 + $0x20] sm:$0xf] }
  0x50   : > { %2441 = vmatmul.mubr.msk.bf16.vlgmr.msra.gmra.mxu0 %vm240_vm3, %v2515_v47  ;;  %v2238_v35 = vld [vmem:[%s2601_s25 + $0x24] sm:$0x1]  ;;  %v1486_v37 = vrot.slane %v1485_v25, 4  ;;  %v2239_v38 = vld [vmem:[%s2601_s25 + $0x28] sm:$0xf]  ;;  %v1507_v41 = vshrl.u32 %v2237_v1, 16  ;;  %v1751_v43 = vsel %vm2605_vm4, %v2276_v22, %v1750_v28 }
  0x51   : > { %2459 = vmatpush3.bf16.msra.mxu0 %v1799_v54  ;;  %2444 = vmatprep.mubr.msk.bf16.mxu0 %vm240_vm3, %v2516_v55  ;;  %v2240_v40 = vld [vmem:[%s2601_s25 + $0x2c] sm:$0x1]  ;;  %v1500_v42 = vrot.slane %v1499_v32, 4  ;;  %v1510_v44 = vshll.u32 %v2237_v1, 16  ;;  %v1516_v45 = vshll.u32 %v2238_v35, 16  ;;  %v1755_v48 = vsel %vm2605_vm4, %v2277_v31, %v1754_v34 }
  0x52   : > { %v2266_v46 = vld [vmem:[%s2601_s25 + $0x30] sm:$0xe]  ;;  %v1491_v47 = vsel %vm2648_vm7, %v1486_v37, %v1490_v26  ;;  %v1509_v50 = vrot.slane %v1507_v41, 4  ;;  %v1521_v51 = vshrl.u32 %v2239_v38, 16  ;;  %v2267_v39 = vld [vmem:[%s2601_s25 + $0x34] sm:$0x1]  ;;  %v2284_v4 = vcombine.low %v1751_v43, %v1755_v48 }
  0x53   : > { %v2268_v52 = vld [vmem:[%s2601_s25 + $0x38] sm:$0xe]  ;;  %v1505_v54 = vsel %vm2648_vm7, %v1500_v42, %v1504_v33  ;;  %v1512_v55 = vrot.slane %v1510_v44, 5  ;;  %v1518_v56 = vrot.slane %v1516_v45, 5  ;;  %v1524_v57 = vshll.u32 %v2239_v38, 16 }
  0x54   : > { %v2269_v58 = vld [vmem:[%s2601_s25 + $0x3c] sm:$0x1]  ;;  %v2250_v59 = vcombine.low %v1491_v47, %v1505_v54  ;;  %v1523_v60 = vrot.slane %v1521_v51, 4  ;;  %v1530_v61 = vshll.u32 %v2240_v40, 16  ;;  %v2278_v62 = vrot.slane %v2266_v46, 9 }
  0x55   : > { %2435 = vmatmul.mubr.msk.bf16.gmra.mxu1 %vm240_vm3, %v2211_v30  ;;  %v2241_v29 = vld [vmem:[%s2601_s25 + $0x30] sm:$0xf]  ;;  %v1513_v63 = vor.u32 %v1512_v55, %v1509_v50  ;;  %v1526_v53 = vrot.slane %v1524_v57, 5  ;;  %v1758_v0 = vrot.slane %v2267_v39, 5  ;;  %v2279_v2 = vrot.slane %v2268_v52, 9 }
  0x56   : > { %v2242_v3 = vld [vmem:[%s2601_s25 + $0x34] sm:$0x1]  ;;  %2450 = vmatprep.mubr.msk.bf16.mxu1 %vm240_vm3, %v2250_v59  ;;  %v1532_v5 = vrot.slane %v1530_v61, 5  ;;  %v1762_v7 = vrot.slane %v2269_v58, 5  ;;  %v2243_v8 = vld [vmem:[%s2601_s25 + $0x38] sm:$0xf] }
  0x57   : > { %v1514_v9 = vrot.slane %v1513_v63, 4  ;;  %v1527_v30 = vor.u32 %v1526_v53, %v1523_v60  ;;  %v1759_v10 = vsel %vm2605_vm4, %v2278_v62, %v1758_v0  ;;  %v2244_v11 = vld [vmem:[%s2601_s25 + $0x3c] sm:$0x1]  ;;  %v1535_v12 = vshrl.u32 %v2241_v29, 16  ;;  %v2270_v13 = vld [vmem:[%s2601_s25 + $0x40] sm:$0xe] }
  0x58   : > { %2445 = vmatmul.mubr.msk.bf16.gmra.mxu0 %vm240_vm3, %v2517_v24  ;;  %v1763_v14 = vsel %vm2605_vm4, %v2279_v2, %v1762_v7  ;;  %v1538_v15 = vshll.u32 %v2241_v29, 16  ;;  %v1544_v16 = vshll.u32 %v2242_v3, 16  ;;  %v1549_v17 = vshrl.u32 %v2243_v8, 16  ;;  %v2271_v18 = vld [vmem:[%s2601_s25 + $0x44] sm:$0x1] }
  0x59   : > { %2460 = vmatprep.mubr.msk.bf16.mxu0 %vm240_vm3, %v2283_v36  ;;  %v1519_v19 = vsel %vm2648_vm7, %v1514_v9, %v1518_v56  ;;  %v1528_v20 = vrot.slane %v1527_v30, 4  ;;  %v2285_v21 = vcombine.low %v1759_v10, %v1763_v14  ;;  %v1537_v23 = vrot.slane %v1535_v12, 4  ;;  %v2272_v22 = vld [vmem:[%s2601_s25 + $0x48] sm:$0xe]  ;;  %v2273_v24 = vld [vmem:[%s2601_s25 + $0x4c] sm:$0x1] }
  0x5a   : > { %v1540_v25 = vrot.slane %v1538_v15, 5  ;;  %v1546_v26 = vrot.slane %v1544_v16, 5  ;;  %v1551_v27 = vrot.slane %v1549_v17, 4  ;;  %v1552_v28 = vshll.u32 %v2243_v8, 16  ;;  %v2245_v31 = vld [vmem:[%s2601_s25 + $0x40] sm:$0xf] }
  0x5b   : > { %v1533_v32 = vsel %vm2648_vm7, %v1528_v20, %v1532_v5  ;;  %v1558_v33 = vshll.u32 %v2244_v11, 16  ;;  %v2280_v34 = vrot.slane %v2270_v13, 9  ;;  %v1766_v1 = vrot.slane %v2271_v18, 5  ;;  %v2246_v35 = vld [vmem:[%s2601_s25 + $0x44] sm:$0x1] }
  0x5c   : > { %v2251_v36 = vcombine.low %v1519_v19, %v1533_v32  ;;  %v1541_v37 = vor.u32 %v1540_v25, %v1537_v23  ;;  %v1554_v38 = vrot.slane %v1552_v28, 5  ;;  %v2281_v40 = vrot.slane %v2272_v22, 9  ;;  %v2247_v41 = vld [vmem:[%s2601_s25 + $0x48] sm:$0xf]  ;;  %v2248_v48 = vld [vmem:[%s2601_s25 + $0x4c] sm:$0x1] }
  0x5d   : > { %v1560_v42 = vrot.slane %v1558_v33, 5  ;;  %v1767_v43 = vsel %vm2605_vm4, %v2280_v34, %v1766_v1  ;;  %v1770_v44 = vrot.slane %v2273_v24, 5  ;;  %v1563_v45 = vshrl.u32 %v2245_v31, 16 }
  0x5e   : > { %2451 = vmatmul.mubr.msk.bf16.vlgmr.msra.gmra.mxu1 %vm240_vm3, %v2251_v36  ;;  %v1542_v46 = vrot.slane %v1541_v37, 4  ;;  %v1555_v47 = vor.u32 %v1554_v38, %v1551_v27  ;;  %v1566_v50 = vshll.u32 %v2245_v31, 16  ;;  %v1572_v51 = vshll.u32 %v2246_v35, 16 }
  0x5f   : > { %v1771_v39 = vsel %vm2605_vm4, %v2281_v40, %v1770_v44  ;;  %v1565_v52 = vrot.slane %v1563_v45, 4  ;;  %v1577_v54 = vshrl.u32 %v2247_v41, 16  ;;  %v1580_v55 = vshll.u32 %v2247_v41, 16 }
  0x60   : > { %2461 = vmatmul.mubr.msk.bf16.vlgmr.msra.gmra.mxu0 %vm240_vm3, %v2284_v4  ;;  %v1547_v56 = vsel %vm2648_vm7, %v1542_v46, %v1546_v26  ;;  %v1556_v57 = vrot.slane %v1555_v47, 4  ;;  %v2286_v58 = vcombine.low %v1767_v43, %v1771_v39  ;;  %v1568_v59 = vrot.slane %v1566_v50, 5 }
  0x61   : > { %2464 = vmatprep.mubr.msk.bf16.mxu0 %vm240_vm3, %v2285_v21  ;;  %v1579_v60 = vrot.slane %v1577_v54, 4  ;;  %v1582_v61 = vrot.slane %v1580_v55, 5  ;;  %v1586_v62 = vshll.u32 %v2248_v48, 16  ;;  %v1574_v53 = vrot.slane %v1572_v51, 5 }
  0x62   : > { %v1561_v29 = vsel %vm2648_vm7, %v1556_v57, %v1560_v42  ;;  %v1569_v63 = vor.u32 %v1568_v59, %v1565_v52  ;;  %v2542_v9 = vmov 0.0  }
  0x63   : > { %v2252_v6 = vcombine.low %v1547_v56, %v1561_v29  ;;  %v1583_v0 = vor.u32 %v1582_v61, %v1579_v60  ;;  %v1588_v2 = vrot.slane %v1586_v62, 5  ;;  %210 = vst [vmem:[%s2910_s18] sm:$0x3] %v2542_v9 }
  0x64   : > { %v1570_v3 = vrot.slane %v1569_v63, 4 }
  0x65   : > { %2454 = vmatprep.mubr.msk.bf16.mxu1 %vm240_vm3, %v2252_v6  ;;  %v1584_v4 = vrot.slane %v1583_v0, 4 }
  0x66   : > { %v1575_v5 = vsel %vm2648_vm7, %v1570_v3, %v1574_v53 }
  0x67   : > { %v1589_v7 = vsel %vm2648_vm7, %v1584_v4, %v1588_v2 }
  0x68   : > { %2465 = vmatmul.mubr.msk.bf16.gmra.mxu0 %vm240_vm3, %v2286_v58  ;;  %v2253_v8 = vcombine.low %v1575_v5, %v1589_v7 }
  0x6a   : > { %2455 = vmatmul.mubr.msk.bf16.gmra.mxu1 %vm240_vm3, %v2253_v8 }
  0xd2   : > { %v2382_v30 = vpop.f32.mrf.mxu0 }
  0xd3   : > { %v2913_v12 = vpop.f32.mrf.mxu1 }
  0xd4   : > { %v291_v10 = vpop.f32.mrf.mxu0 }
  0xd5   : > { %v2915_v49 = vpop.f32.mrf.mxu1 }
  0xd6   : > { %v2383_v11 = vpop.f32.mrf.mxu0 }
  0xd7   : > { %v2917_v15 = vpop.f32.mrf.mxu1 }
  0xd8   : > { %v294_v13 = vpop.f32.mrf.mxu0 }
  0xd9   : > { %v2919_v17 = vpop.f32.mrf.mxu1 }
  0xde   : > { %v2402_v14 = vpop.f32.mrf.mxu0 }
  0xe0   : > { %v709_v16 = vpop.f32.mrf.mxu0 }
  0xe2   : > { %v2403_v18 = vpop.f32.mrf.mxu0 }
  0xe4   : > { %v712_v21 = vpop.f32.mrf.mxu0 }
  0xe9   : > { %v2392_v19 = vpop.f32.mrf.mxu1 }
  0xea   : > { %v565_v57 = vadd.f32 %v2392_v19, %v2382_v30 }
  0xeb   : > { %v524_v20 = vpop.f32.mrf.mxu1 }
  0xec   : > { %v563_v60 = vadd.f32 %v524_v20, %v291_v10  ;;  %v750_v53 = vadd.f32 %v2402_v14, %v565_v57 }
  0xed   : > { %v2393_v23 = vpop.f32.mrf.mxu1  ;;  %v2921_v22 = vpop.f32.mrf.mxu0 }
  0xee   : > { %v566_v61 = vadd.f32 %v2393_v23, %v2383_v11  ;;  %v748_v2 = vadd.f32 %v709_v16, %v563_v60 }
  0xef   : > { %v527_v24 = vpop.f32.mrf.mxu1  ;;  %v2923_v25 = vpop.f32.mrf.mxu0 }
  0xf0   : > { %v564_v63 = vadd.f32 %v527_v24, %v294_v13  ;;  %v751_v3 = vadd.f32 %v2403_v18, %v566_v61 }
  0xf1   : > { %v2925_v28 = vpop.f32.mrf.mxu0 }
  0xf2   : > { %v749_v9 = vadd.f32 %v712_v21, %v564_v63 }
  0xf3   : > { %v2927_v32 = vpop.f32.mrf.mxu0 }
  0xf5   : > { %v2396_v26 = vpop.f32.mrf.mxu1 }
  0xf6   : > { %v569_v19 = vadd.f32 %v2396_v26, %v2913_v12 }
  0xf7   : > { %v540_v27 = vpop.f32.mrf.mxu1 }
  0xf8   : > { %v567_v16 = vadd.f32 %v540_v27, %v2915_v49  ;;  %v754_v57 = vadd.f32 %v2921_v22, %v569_v19 }
  0xf9   : > { %v2397_v31 = vpop.f32.mrf.mxu1 }
  0xfa   : > { %v570_v18 = vadd.f32 %v2397_v31, %v2917_v15 }
  0xfb   : > { %v543_v33 = vpop.f32.mrf.mxu1 }
  0xfc   : > { %v568_v12 = vadd.f32 %v543_v33, %v2919_v17  ;;  %v755_v49 = vadd.f32 %v2925_v28, %v570_v18 }
  0xfd   : > { %v2412_v34 = vpop.f32.mrf.mxu1 }
  0xfe   : > { %v885_v0 = vadd.f32 %v2412_v34, %v750_v53  ;;  %v753_v63 = vadd.f32 %v2927_v32, %v568_v12 }
  0xff   : > { %v2422_v1 = vpop.f32.mrf.mxu0  ;;  %v844_v35 = vpop.f32.mrf.mxu1 }
 0x100   : > { %v883_v7 = vadd.f32 %v844_v35, %v748_v2  ;;  %v1131_v11 = vadd.f32 %v2422_v1, %v885_v0 }
 0x101   : > { %v1090_v36 = vpop.f32.mrf.mxu0  ;;  %v2413_v37 = vpop.f32.mrf.mxu1 }
 0x102   : > { %v886_v8 = vadd.f32 %v2413_v37, %v751_v3  ;;  %v1129_v23 = vadd.f32 %v1090_v36, %v883_v7  ;;  %v752_v36 = vadd.f32 %v2923_v25, %v567_v16 }
 0x103   : > { %v2423_v38 = vpop.f32.mrf.mxu0  ;;  %v847_v40 = vpop.f32.mrf.mxu1 }
 0x104   : > { %v884_v10 = vadd.f32 %v847_v40, %v749_v9  ;;  %v1132_v24 = vadd.f32 %v2423_v38, %v886_v8 }
 0x105   : > { %v1093_v41 = vpop.f32.mrf.mxu0  ;;  %v2416_v42 = vpop.f32.mrf.mxu1 }
 0x106   : > { %v1130_v21 = vadd.f32 %v1093_v41, %v884_v10 }
 0x107   : > { %v860_v43 = vpop.f32.mrf.mxu1 }
 0x108   : > { %v2929_v44 = vpop.f32.mrf.mxu0  ;;  %v887_v41 = vadd.f32 %v860_v43, %v752_v36 }
 0x109   : > { %v2417_v45 = vpop.f32.mrf.mxu1 }
 0x10a   : > { %v2931_v46 = vpop.f32.mrf.mxu0 }
 0x10b   : > { %v2933_v47 = vpop.f32.mrf.mxu1 }
 0x10c   : > { %v2935_v48 = vpop.f32.mrf.mxu0  ;;  %v888_v28 = vadd.f32 %v2933_v47, %v753_v63 }
 0x10d   : > { %v2432_v50 = vpop.f32.mrf.mxu1 }
 0x10e   : > { %v2937_v51 = vpop.f32.mrf.mxu0  ;;  %v1313_v14 = vadd.f32 %v2432_v50, %v1131_v11  ;;  %v889_v50 = vadd.f32 %v2416_v42, %v754_v57 }
 0x10f   : > { %v1272_v39 = vpop.f32.mrf.mxu1 }
 0x110   : > { %v2442_v52 = vpop.f32.mrf.mxu0  ;;  %v1311_v35 = vadd.f32 %v1272_v39, %v1129_v23  ;;  %v1135_v42 = vadd.f32 %v2929_v44, %v889_v50 }
 0x111   : > { %v2433_v54 = vpop.f32.mrf.mxu1  ;;  %v1448_v60 = vadd.f32 %v2442_v52, %v1313_v14 }
 0x112   : > { %v1407_v55 = vpop.f32.mrf.mxu0  ;;  %v1314_v37 = vadd.f32 %v2433_v54, %v1132_v24  ;;  %v890_v54 = vadd.f32 %v2417_v45, %v755_v49 }
 0x113   : > { %v1275_v56 = vpop.f32.mrf.mxu1  ;;  %v1446_v38 = vadd.f32 %v1407_v55, %v1311_v35  ;;  %v1133_v55 = vadd.f32 %v2931_v46, %v887_v41  ;;  %v1134_v46 = vadd.f32 %v2937_v51, %v888_v28 }
 0x114   : > { %v2443_v58 = vpop.f32.mrf.mxu0  ;;  %v1312_v26 = vadd.f32 %v1275_v56, %v1130_v21  ;;  %v1136_v43 = vadd.f32 %v2935_v48, %v890_v54 }
 0x115   : > { %v2939_v59 = vpop.f32.mrf.mxu1  ;;  %v1449_v39 = vadd.f32 %v2443_v58, %v1314_v37 }
 0x116   : > { %v1410_v62 = vpop.f32.mrf.mxu0  ;;  %v1317_v44 = vadd.f32 %v2939_v59, %v1135_v42 }
 0x117   : > { %v2941_v29 = vpop.f32.mrf.mxu1  ;;  %v1447_v52 = vadd.f32 %v1410_v62, %v1312_v26 }
 0x118   : > { %v2943_v6 = vpop.f32.mrf.mxu0  ;;  %v1315_v62 = vadd.f32 %v2941_v29, %v1133_v55 }
 0x119   : > { %v2437_v5 = vpop.f32.mrf.mxu1  ;;  %v1452_v11 = vadd.f32 %v2943_v6, %v1317_v44 }
 0x11a   : > { %v2945_v4 = vpop.f32.mrf.mxu0  ;;  %v1318_v2 = vadd.f32 %v2437_v5, %v1136_v43 }
 0x11b   : > { %v1291_v13 = vpop.f32.mrf.mxu1  ;;  %v1450_v59 = vadd.f32 %v2945_v4, %v1315_v62 }
 0x11c   : > { %v2947_v30 = vpop.f32.mrf.mxu0  ;;  %v1316_v8 = vadd.f32 %v1291_v13, %v1134_v46 }
 0x11d   : > { %v1453_v29 = vadd.f32 %v2947_v30, %v1318_v2  ;;  %v1946_v2 = vld [vmem:[%s2910_s18] sm:$0x1] }
 0x11e   : > { %v2950_v20 = vpop.f32.mrf.mxu0  ;;  %v2452_v40 = vpop.f32.mrf.mxu1 }
 0x11f   : > { %v1694_v31 = vadd.f32 %v2452_v40, %v1448_v60  ;;  %v1451_v35 = vadd.f32 %v2950_v20, %v1316_v8 }
 0x120   : > { %v2462_v34 = vpop.f32.mrf.mxu0  ;;  %v1653_v27 = vpop.f32.mrf.mxu1 }
 0x121   : > { %v1692_v17 = vadd.f32 %v1653_v27, %v1446_v38  ;;  %v1876_v56 = vadd.f32 %v2462_v34, %v1694_v31 }
 0x122   : > { %v1835_v1 = vpop.f32.mrf.mxu0  ;;  %v2453_v22 = vpop.f32.mrf.mxu1 }
 0x123   : > { %v1695_v33 = vadd.f32 %v2453_v22, %v1449_v39  ;;  %v1874_v45 = vadd.f32 %v1835_v1, %v1692_v17 }
 0x124   : > { %v2463_v15 = vpop.f32.mrf.mxu0  ;;  %v1656_v25 = vpop.f32.mrf.mxu1 }
 0x125   : > { %v1877_v53 = vadd.f32 %v2463_v15, %v1695_v33  ;;  %v1693_v0 = vadd.f32 %v1656_v25, %v1447_v52 }
 0x126   : > { %v1838_v61 = vpop.f32.mrf.mxu0 }
 0x127   : > { %v1899_v58 = vpack.c.bf16 %v1877_v53, %v1876_v56  ;;  %v1875_v47 = vadd.f32 %v1838_v61, %v1693_v0 }
 0x128   : > { %v2466_v32 = vpop.f32.mrf.mxu0 }
 0x129   : > { %2330 = vst [vmem:[%s2967_s22 + $0x8] sm:$0xff] %v1899_v58   ;;  %v1898_v48 = vpack.c.bf16 %v1875_v47, %v1874_v45  ;;  %v1940_v5 = vunpack.c.l.bf16 %v1899_v58  ;;  %v1941_v40 = vunpack.c.h.bf16 %v1899_v58 }
 0x12a   : > { %v2456_v3 = vpop.f32.mrf.mxu1  ;;  %v1851_v7 = vpop.f32.mrf.mxu0 }
 0x12b   : > { %2314 = vst [vmem:[%s2967_s22] sm:$0xff] %v1898_v48   ;;  %v1938_v9 = vunpack.c.l.bf16 %v1898_v48  ;;  %v1939_v10 = vunpack.c.h.bf16 %v1898_v48  ;;  %v1698_v24 = vadd.f32 %v2456_v3, %v1452_v11  ;;  %v1965_v1 = vmul.f32 %v1940_v5, %v1940_v5  ;;  %v1962_v3 = vld [vmem:[%s2910_s18 + $0x1] sm:$0x1] }
 0x12c   : > { %v1669_v19 = vpop.f32.mrf.mxu1  ;;  %v2467_v51 = vpop.f32.mrf.mxu0  ;;  %v1966_v27 = vmul.f32 %v1941_v40, %v1941_v40 }
 0x12d   : > { %v1963_v14 = vmul.f32 %v1938_v9, %v1938_v9  ;;  %v1964_v23 = vmul.f32 %v1939_v10, %v1939_v10  ;;  %v1947_v18 = vadd.f32 %v1939_v10, %v1938_v9  ;;  %v1696_v34 = vadd.f32 %v1669_v19, %v1450_v59 }
 0x12e   : > { %v2457_v16 = vpop.f32.mrf.mxu1  ;;  %v1880_v21 = vadd.f32 %v2466_v32, %v1698_v24  ;;  %v1854_v12 = vpop.f32.mrf.mxu0 }
 0x12f   : > { %v1699_v13 = vadd.f32 %v2457_v16, %v1453_v29  ;;  %v1971_v6 = vadd.f32 %v1964_v23, %v1963_v14  ;;  %v1948_v26 = vadd.f32 %v1947_v18, %v1940_v5  ;;  %v1878_v30 = vadd.f32 %v1851_v7, %v1696_v34 }
 0x130   : > { %v1672_v37 = vpop.f32.mrf.mxu1 }
 0x131   : > { %v1881_v4 = vadd.f32 %v2467_v51, %v1699_v13  ;;  %v1697_v57 = vadd.f32 %v1672_v37, %v1451_v35  ;;  %v1972_v36 = vadd.f32 %v1971_v6, %v1965_v1  ;;  %v1949_v31 = vadd.f32 %v1948_v26, %v1941_v40 }
 0x133   : > { %v1901_v60 = vpack.c.bf16 %v1881_v4, %v1880_v21  ;;  %v1879_v50 = vadd.f32 %v1854_v12, %v1697_v57  ;;  %v1973_v54 = vadd.f32 %v1972_v36, %v1966_v27 }
 0x135   : > { %2332 = vst [vmem:[%s2967_s22 + $0x18] sm:$0xff] %v1901_v60   ;;  %v1900_v49 = vpack.c.bf16 %v1879_v50, %v1878_v30  ;;  %v1944_v38 = vunpack.c.l.bf16 %v1901_v60  ;;  %v1945_v22 = vunpack.c.h.bf16 %v1901_v60 }
 0x137   : > { %2331 = vst [vmem:[%s2967_s22 + $0x10] sm:$0xff] %v1900_v49   ;;  %v1942_v15 = vunpack.c.l.bf16 %v1900_v49  ;;  %v1943_v20 = vunpack.c.h.bf16 %v1900_v49  ;;  %v1969_v33 = vmul.f32 %v1944_v38, %v1944_v38  ;;  %v1970_v25 = vmul.f32 %v1945_v22, %v1945_v22 }
 0x139   : > { %v1950_v39 = vadd.f32 %v1949_v31, %v1942_v15  ;;  %v1967_v41 = vmul.f32 %v1942_v15, %v1942_v15  ;;  %v1968_v63 = vmul.f32 %v1943_v20, %v1943_v20 }
 0x13b   : > { %v1951_v61 = vadd.f32 %v1950_v39, %v1943_v20  ;;  %v1974_v17 = vadd.f32 %v1973_v54, %v1967_v41 }
 0x13d   : > { %v1952_v52 = vadd.f32 %v1951_v61, %v1944_v38  ;;  %v1975_v42 = vadd.f32 %v1974_v17, %v1968_v63 }
 0x13f   : > { %v1953_v28 = vadd.f32 %v1952_v52, %v1945_v22  ;;  %v1976_v56 = vadd.f32 %v1975_v42, %v1969_v33 }
 0x141   : > { %v1954_v53 = vrot.slane %v1953_v28, 4  ;;  %v1977_v0 = vadd.f32 %v1976_v56, %v1970_v25 }
 0x143   : > { %v1955_v55 = vadd.f32 %v1954_v53, %v1953_v28  ;;  %v1978_v43 = vrot.slane %v1977_v0, 4 }
 0x145   : > { %v1956_v32 = vrot.slane %v1955_v55, 2  ;;  %v1979_v44 = vadd.f32 %v1978_v43, %v1977_v0 }
 0x147   : > { %v1957_v45 = vadd.f32 %v1956_v32, %v1955_v55  ;;  %v1980_v58 = vrot.slane %v1979_v44, 2 }
 0x149   : > { %v1958_v47 = vrot.slane %v1957_v45, 1  ;;  %v1981_v62 = vadd.f32 %v1980_v58, %v1979_v44 }
 0x14b   : > { %v1959_v46 = vadd.f32 %v1958_v47, %v1957_v45  ;;  %v1982_v48 = vrot.slane %v1981_v62, 1 }
 0x14d   : > { %v1960_v7 = vadd.f32 %v1959_v46, %v1946_v2  ;;  %v1983_v8 = vadd.f32 %v1982_v48, %v1981_v62 }
 0x14f   : > { %1961 = vst [vmem:[%s2910_s18] sm:$0x1] %v1960_v7  ;;  %v1984_v9 = vadd.f32 %v1983_v8, %v1962_v3 }
 0x151   : > { %1985 = vst [vmem:[%s2910_s18 + $0x1] sm:$0x1] %v1984_v9 }
 0x152 PF: > { %s14_s14 = sadd.s32 1, %s2540_s14   ;;  %s3001_s12 = smov %s2536_s13 }
 0x153   : > { %p11_p5 = scmp.ge.s32.totalorder %s14_s14, 4   ;;  %s3002_s13 = smov %s3004_s15 }
 0x155   :  { %13 = sbr.rel (!%p11_p5) target bundleno = 2 (0x2), region = 84 }

// kernel: unet_down_conv_forward.8
= control target key start
LH: loop header
LB: loop body
LE: loop exit
PB: predicated region body
PF: predicated region fallthrough
CT: control target
= control target key end

     0   :  { %s3450_s12 = smov 0   ;;  %s3452_s13 = smov 0   ;;  %s3944_s0 = inlined_call_operand.vmem [shape: bf16[2,10,10,128], index: 0, kind: input, shape index: {}]   ;;  %s3945_s1 = inlined_call_operand.vmem [shape: bf16[9,128,128], index: 1, kind: input, shape index: {}]   ;;  %s3946_s2 = inlined_call_operand.vmem [shape: bf16[2,8,8,128], index: 2, kind: output, shape index: {0}]   ;;  %s3947_s3 = inlined_call_operand.vmem [shape: f32[2,2,128], index: 3, kind: output, shape index: {1}]  }
   0x1   :  { %s3454_s14 = smov 0  }
   0x2 LB: > { %s26_s15 = sadd.s32 1, %s3423_s13  ;;  %p2568_p0 = scmp.ge.s32.totalorder %s3427_s14, 1  ;;  %s3427_s14 = sphi %s3454_s14, %s14_s14   ;;  %s3423_s13 = sphi %s3452_s13, %s3961_s13   ;;  %s3419_s12 = sphi %s3450_s12, %s3960_s12  }
   0x3   : > { %p28_p1 = scmp.ge.s32.totalorder %s26_s15, 2  ;;  %p154_p2 = scmp.lt.s32.totalorder %s3427_s14, 3 }
   0x5   : > { %s3963_s15 = smov (%p28_p1, %s26_s15), 0  ;;  %p155_p3 = pnand %p2568_p0, %p154_p2 }
   0x7   : > { %158 = sbr.rel (%p155_p3) target bundleno = 409 (0x199), region = 28 }
   0xc   : > { %v3321_v0 = vld [vmem:[%s3945_s1 + $0x38] sm:$0xff]   ;;  %v3323_v2 = vld [vmem:[%s3945_s1 + $0x30] sm:$0xff]   ;;  %p186_p4 = scmp.lt.s32.totalorder %s3419_s12, 1  ;;  %v3325_v4 = vld [vmem:[%s3945_s1 + $0x28] sm:$0xff]   ;;  %vm396_vm0 = vsmask.f32 3328 }
   0xd   : > { %v3322_v1 = vld [vmem:[%s3945_s1 + $0x78] sm:$0xff]   ;;  %3063 = vmatprep.subr.bf16.mxu0 %v3321_v0  ;;  %v3324_v3 = vld [vmem:[%s3945_s1 + $0x70] sm:$0xff]   ;;  %v3326_v5 = vld [vmem:[%s3945_s1 + $0x68] sm:$0xff]   ;;  %vm397_vm1 = vsmask.f32 7440  ;;  %vm713_vm3 = vcmask 1042432  }
   0xe   : > { %3087 = vmatprep.subr.bf16.mxu1 %v3322_v1  ;;  %3064 = vmatpush3.bf16.msra.mxu0 %v3321_v0  ;;  %s3965_s12 = smov (!%p186_p4, %s3419_s12), 1  ;;  %v3327_v6 = vld [vmem:[%s3945_s1 + $0x20] sm:$0xff]   ;;  %v3329_v8 = vld [vmem:[%s3945_s1 + $0x18] sm:$0xff]   ;;  %v3331_v10 = vld [vmem:[%s3945_s1 + $0x10] sm:$0xff]   ;;  %vm714_vm4 = vcmask 1046532  }
   0xf   : > { %3088 = vmatpush3.bf16.msra.mxu1 %v3322_v1  ;;  %3065 = vmatprep.subr.bf16.mxu0 %v3323_v2  ;;  %v3328_v7 = vld [vmem:[%s3945_s1 + $0x60] sm:$0xff]   ;;  %s3295_s5 = smul.u32 80, %s3965_s12  ;;  %v3330_v9 = vld [vmem:[%s3945_s1 + $0x58] sm:$0xff]   ;;  %v3332_v11 = vld [vmem:[%s3945_s1 + $0x50] sm:$0xff]   ;;  %s2923_s7 = sshll.u32 %s3965_s12, 5 }
  0x10   : > { %3089 = vmatprep.subr.bf16.mxu1 %v3324_v3  ;;  %v3333_v16 = vld [vmem:[%s3945_s1 + $0x8] sm:$0xff]   ;;  %v3335_v39 = vld [vmem:[%s3945_s1] sm:$0xff]   ;;  %vm3532_vm2 = vmor %vm396_vm0, %vm397_vm1  ;;  %s199_s10 = scalar_lea.vmem %s3946_s2, %s2923_s7 }
  0x11   : > { %s3507_s18 = scalar_lea.vmem %s3944_s0, %s3295_s5  ;;  %v3334_v18 = vld [vmem:[%s3945_s1 + $0x48] sm:$0xff]   ;;  %v3336_v45 = vld [vmem:[%s3945_s1 + $0x40] sm:$0xff]   ;;  %v3339_v59 = vld [vmem:[%s3945_s1 + $0xb8] sm:$0xff]  }
  0x12   : > { %3066 = vmatpush3.bf16.msra.mxu0 %v3323_v2  ;;  %v3337_v12 = vld [vmem:[%s3507_s18] ss:$8 sps:$4 sm:$0xff]   ;;  %v381_v14 = vld [vmem:[%s3507_s18 + $0x4] sm:$0x1]  ;;  %v383_v17 = vld [vmem:[%s3507_s18 + $0xc] sm:$0x1] }
  0x13   : > { %3090 = vmatpush3.bf16.msra.mxu1 %v3324_v3  ;;  %3067 = vmatprep.subr.bf16.mxu0 %v3325_v4  ;;  %v380_v13 = vld [vmem:[%s3507_s18] sm:$0xf]  ;;  %v382_v15 = vld [vmem:[%s3507_s18 + $0x8] sm:$0xf]  ;;  %v409_v21 = vshll.u32 %v381_v14, 16  ;;  %v423_v24 = vshll.u32 %v383_v17, 16  ;;  %vm3594_vm5 = vmor %vm713_vm3, %vm714_vm4 }
  0x14   : > { %3091 = vmatprep.subr.bf16.mxu1 %v3326_v5  ;;  %3079 = vmatprep.mubr.bf16.mxu0 %v3337_v12  ;;  %v400_v19 = vshrl.u32 %v380_v13, 16  ;;  %v403_v20 = vshll.u32 %v380_v13, 16  ;;  %v414_v22 = vshrl.u32 %v382_v15, 16  ;;  %v417_v23 = vshll.u32 %v382_v15, 16  ;;  %v384_v29 = vld [vmem:[%s3507_s18 + $0x10] sm:$0xf] }
  0x15   : > { %v411_v27 = vrot.slane %v409_v21, 5  ;;  %v425_v31 = vrot.slane %v423_v24, 5  ;;  %v385_v32 = vld [vmem:[%s3507_s18 + $0x14] sm:$0x1]  ;;  %v386_v33 = vld [vmem:[%s3507_s18 + $0x18] sm:$0xf] }
  0x16   : > { %3068 = vmatpush3.bf16.msra.mxu0 %v3325_v4  ;;  %v402_v25 = vrot.slane %v400_v19, 4  ;;  %v405_v26 = vrot.slane %v403_v20, 5  ;;  %v416_v28 = vrot.slane %v414_v22, 4  ;;  %v419_v30 = vrot.slane %v417_v23, 5  ;;  %v387_v35 = vld [vmem:[%s3507_s18 + $0x1c] sm:$0x1] }
  0x17   : > { %3092 = vmatpush3.bf16.msra.mxu1 %v3326_v5  ;;  %3069 = vmatprep.subr.bf16.mxu0 %v3327_v6  ;;  %v428_v36 = vshrl.u32 %v384_v29, 16  ;;  %v431_v37 = vshll.u32 %v384_v29, 16  ;;  %v437_v38 = vshll.u32 %v385_v32, 16  ;;  %v442_v42 = vshrl.u32 %v386_v33, 16  ;;  %v3338_v56 = vld [vmem:[%s3507_s18 + $0x10] ss:$8 sps:$4 sm:$0xff]  }
  0x18   : > { %3093 = vmatprep.subr.bf16.mxu1 %v3328_v7  ;;  %v406_v34 = vor.u32 %v405_v26, %v402_v25  ;;  %v420_v41 = vor.u32 %v419_v30, %v416_v28  ;;  %v445_v43 = vshll.u32 %v386_v33, 16  ;;  %v451_v44 = vshll.u32 %v387_v35, 16  ;;  %v3340_v62 = vld [vmem:[%s3945_s1 + $0xf8] sm:$0xff]   ;;  %v3341_v2 = vld [vmem:[%s3945_s1 + $0xb0] sm:$0xff]   ;;  %v3343_v5 = vld [vmem:[%s3945_s1 + $0xa8] sm:$0xff]  }
  0x19   : > { %v430_v47 = vrot.slane %v428_v36, 4  ;;  %v433_v48 = vrot.slane %v431_v37, 5  ;;  %v439_v50 = vrot.slane %v437_v38, 5  ;;  %v444_v51 = vrot.slane %v442_v42, 4  ;;  %v3342_v4 = vld [vmem:[%s3945_s1 + $0xf0] sm:$0xff]   ;;  %v3345_v14 = vld [vmem:[%s3945_s1 + $0xa0] sm:$0xff]  }
  0x1a   : > { %3070 = vmatpush3.bf16.msra.mxu0 %v3327_v6  ;;  %v407_v46 = vrot.slane %v406_v34, 4  ;;  %v421_v49 = vrot.slane %v420_v41, 4  ;;  %v447_v52 = vrot.slane %v445_v43, 5  ;;  %v453_v58 = vrot.slane %v451_v44, 5  ;;  %v3344_v6 = vld [vmem:[%s3945_s1 + $0xe8] sm:$0xff]   ;;  %v3346_v19 = vld [vmem:[%s3945_s1 + $0xe0] sm:$0xff]  }
  0x1b   : > { %3094 = vmatpush3.bf16.msra.mxu1 %v3328_v7  ;;  %3071 = vmatprep.subr.bf16.mxu0 %v3329_v8  ;;  %v434_v54 = vor.u32 %v433_v48, %v430_v47  ;;  %v3349_v7 = vld [vmem:[%s3507_s18 + $0x20] ss:$8 sps:$4 sm:$0xff]   ;;  %v3350_v22 = vld [vmem:[%s3507_s18 + $0x30] ss:$8 sps:$4 sm:$0xff]   ;;  %v393_v29 = vld [vmem:[%s3507_s18 + $0x34] sm:$0x1] }
  0x1c   : > { %3095 = vmatprep.subr.bf16.mxu1 %v3330_v9  ;;  %v412_v53 = vsel %vm3532_vm2, %v407_v46, %v411_v27  ;;  %v426_v55 = vsel %vm3532_vm2, %v421_v49, %v425_v31  ;;  %v448_v57 = vor.u32 %v447_v52, %v444_v51  ;;  %v392_v27 = vld [vmem:[%s3507_s18 + $0x30] sm:$0xf]  ;;  %v394_v30 = vld [vmem:[%s3507_s18 + $0x38] sm:$0xf]  ;;  %v395_v31 = vld [vmem:[%s3507_s18 + $0x3c] sm:$0x1] }
  0x1d   : > { %v2601_v60 = vcombine.low %v412_v53, %v426_v55  ;;  %v435_v61 = vrot.slane %v434_v54, 4  ;;  %v484_v33 = vshrl.u32 %v392_v27, 16  ;;  %v487_v34 = vshll.u32 %v392_v27, 16  ;;  %v3347_v41 = vld [vmem:[%s3945_s1 + $0x98] sm:$0xff]   ;;  %v689_v27 = vld [vmem:[%s3507_s18 + $0x20] sm:$0xe] }
  0x1e   : > { %3072 = vmatpush3.bf16.msra.mxu0 %v3329_v8  ;;  %v449_v63 = vrot.slane %v448_v57, 4  ;;  %v388_v8 = vld [vmem:[%s3507_s18 + $0x20] sm:$0xf]  ;;  %v493_v35 = vshll.u32 %v393_v29, 16  ;;  %v498_v37 = vshrl.u32 %v394_v30, 16  ;;  %v501_v38 = vshll.u32 %v394_v30, 16 }
  0x1f   : > { %3096 = vmatpush3.bf16.msra.mxu1 %v3330_v9  ;;  %3073 = vmatprep.subr.bf16.mxu0 %v3331_v10  ;;  %v440_v0 = vsel %vm3532_vm2, %v435_v61, %v439_v50  ;;  %v389_v9 = vld [vmem:[%s3507_s18 + $0x24] sm:$0x1]  ;;  %v456_v12 = vshrl.u32 %v388_v8, 16  ;;  %v459_v13 = vshll.u32 %v388_v8, 16  ;;  %v486_v43 = vrot.slane %v484_v33, 4  ;;  %v3351_v57 = vld [vmem:[%s3945_s1 + $0x90] sm:$0xff]  }
  0x20   : > { %3097 = vmatprep.subr.bf16.mxu1 %v3332_v11  ;;  %3103 = vmatprep.mubr.bf16.mxu1 %v2601_v60  ;;  %v454_v1 = vsel %vm3532_vm2, %v449_v63, %v453_v58  ;;  %v465_v15 = vshll.u32 %v389_v9, 16  ;;  %v489_v44 = vrot.slane %v487_v34, 5  ;;  %v500_v47 = vrot.slane %v498_v37, 4  ;;  %v681_v61 = vld [vmem:[%s3507_s18] sm:$0xe]  ;;  %v3402_v40 = vld [vmem:[%s3945_s1 + $0x210] sm:$0xff]  }
  0x21   : > { %v2602_v3 = vcombine.low %v440_v0, %v454_v1  ;;  %v458_v20 = vrot.slane %v456_v12, 4  ;;  %v461_v21 = vrot.slane %v459_v13, 5  ;;  %v503_v48 = vrot.slane %v501_v38, 5  ;;  %v683_v63 = vld [vmem:[%s3507_s18 + $0x8] sm:$0xe] }
  0x22   : > { %3074 = vmatpush3.bf16.msra.mxu0 %v3331_v10  ;;  %v390_v10 = vld [vmem:[%s3507_s18 + $0x28] sm:$0xf]  ;;  %v467_v23 = vrot.slane %v465_v15, 5  ;;  %v490_v50 = vor.u32 %v489_v44, %v486_v43  ;;  %v495_v51 = vrot.slane %v493_v35, 5  ;;  %v685_v9 = vld [vmem:[%s3507_s18 + $0x10] sm:$0xe] }
  0x23   : > { %3098 = vmatpush3.bf16.msra.mxu1 %v3332_v11  ;;  %3075 = vmatprep.subr.bf16.mxu0 %v3333_v16  ;;  %v391_v11 = vld [vmem:[%s3507_s18 + $0x2c] sm:$0x1]  ;;  %v473_v17 = vshll.u32 %v390_v10, 16  ;;  %v462_v28 = vor.u32 %v461_v21, %v458_v20  ;;  %v504_v53 = vor.u32 %v503_v48, %v500_v47  ;;  %v687_v12 = vld [vmem:[%s3507_s18 + $0x18] sm:$0xe]  ;;  %v3362_v47 = vld [vmem:[%s3945_s1 + $0x170] sm:$0xff]  }
  0x24   : > { %3099 = vmatprep.subr.bf16.mxu1 %v3334_v18  ;;  %v3353_v1 = vld [vmem:[%s3945_s1 + $0x88] sm:$0xff]   ;;  %v688_v13 = vld [vmem:[%s3507_s18 + $0x1c] sm:$0x1]  ;;  %v694_v38 = vld [vmem:[%s3507_s18 + $0x34] sm:$0x1]  ;;  %v3429_v55 = vmov 0.0  }
  0x25   : > { %v475_v25 = vrot.slane %v473_v17, 5  ;;  %v463_v36 = vrot.slane %v462_v28, 4  ;;  %v505_v58 = vrot.slane %v504_v53, 4  ;;  %v3357_v21 = vld [vmem:[%s3507_s18 + $0x8] ss:$8 sps:$4 sm:$0xff]  }
  0x26   : > { %3076 = vmatpush3.bf16.msra.mxu0 %v3333_v16  ;;  %v470_v16 = vshrl.u32 %v390_v10, 16  ;;  %v686_v10 = vld [vmem:[%s3507_s18 + $0x14] sm:$0x1]  ;;  %v690_v28 = vld [vmem:[%s3507_s18 + $0x24] sm:$0x1] }
  0x27   : > { %3100 = vmatpush3.bf16.msra.mxu1 %v3334_v18  ;;  %3077 = vmatprep.subr.bf16.mxu0 %v3335_v39  ;;  %v479_v18 = vshll.u32 %v391_v11, 16  ;;  %v468_v46 = vsel %vm3532_vm2, %v463_v36, %v467_v23  ;;  %v726_v15 = vrot.slane %v686_v10, 5  ;;  %v3358_v23 = vld [vmem:[%s3945_s1 + $0x138] sm:$0xff]   ;;  %v691_v29 = vld [vmem:[%s3507_s18 + $0x28] sm:$0xe]  ;;  %v734_v33 = vrot.slane %v690_v28, 5 }
  0x28   : > { %3101 = vmatprep.subr.bf16.mxu1 %v3336_v45  ;;  %v472_v24 = vrot.slane %v470_v16, 4  ;;  %v3355_v16 = vld [vmem:[%s3945_s1 + $0x80] sm:$0xff]   ;;  %v692_v30 = vld [vmem:[%s3507_s18 + $0x2c] sm:$0x1]  ;;  %v2618_v34 = vrot.slane %v691_v29, 9 }
  0x29   : > { %v481_v26 = vrot.slane %v479_v18, 5  ;;  %v2616_v18 = vrot.slane %v687_v12, 9  ;;  %v738_v35 = vrot.slane %v692_v30, 5  ;;  %v693_v36 = vld [vmem:[%s3507_s18 + $0x30] sm:$0xe] }
  0x2a   : > { %3078 = vmatpush3.bf16.msra.mxu0 %v3335_v39  ;;  %v476_v32 = vor.u32 %v475_v25, %v472_v24  ;;  %v507_v39 = vshll.u32 %v395_v31, 16  ;;  %v3360_v31 = vld [vmem:[%s3507_s18 + $0x18] ss:$8 sps:$4 sm:$0xff]   ;;  %v2619_v44 = vrot.slane %v693_v36, 9 }
  0x2b   : > { %3102 = vmatpush3.bf16.msra.mxu1 %v3336_v45  ;;  %3111 = vmatprep.subr.bf16.mxu0 %v3339_v59  ;;  %v3348_v45 = vld [vmem:[%s3945_s1 + $0xd8] sm:$0xff]   ;;  %v739_v43 = vsel %vm3594_vm5, %v2618_v34, %v738_v35 }
  0x2c   : > { %3135 = vmatprep.subr.bf16.mxu1 %v3340_v62  ;;  %v477_v42 = vrot.slane %v476_v32, 4  ;;  %v509_v54 = vrot.slane %v507_v39, 5  ;;  %v2617_v32 = vrot.slane %v689_v27, 9  ;;  %v695_v39 = vld [vmem:[%s3507_s18 + $0x38] sm:$0xe]  ;;  %v3374_v27 = vld [vmem:[%s3945_s1 + $0x148] sm:$0xff]  }
  0x2d   : > { %3080 = vmatmul.mubr.bf16.vlgmr.msra.gmra.mxu0 %v3338_v56  ;;  %v491_v56 = vrot.slane %v490_v50, 4  ;;  %v2620_v48 = vrot.slane %v695_v39, 9 }
  0x2e   : > { %3104 = vmatmul.mubr.bf16.vlgmr.msra.gmra.mxu1 %v2602_v3  ;;  %3112 = vmatpush3.bf16.msra.mxu0 %v3339_v59  ;;  %v482_v49 = vsel %vm3532_vm2, %v477_v42, %v481_v26  ;;  %v3352_v59 = vld [vmem:[%s3945_s1 + $0xd0] sm:$0xff]   ;;  %v510_v0 = vsel %vm3532_vm2, %v505_v58, %v509_v54  ;;  %v2613_v3 = vrot.slane %v681_v61, 9  ;;  %v3359_v26 = vld [vmem:[%s3945_s1 + $0x178] sm:$0xff]   ;;  %v735_v42 = vsel %vm3594_vm5, %v2617_v32, %v734_v33  ;;  %v3363_v54 = vld [vmem:[%s3945_s1 + $0x128] sm:$0xff]  }
  0x2f   : > { %3136 = vmatpush3.bf16.msra.mxu1 %v3340_v62  ;;  %3113 = vmatprep.subr.bf16.mxu0 %v3341_v2  ;;  %v2603_v52 = vcombine.low %v468_v46, %v482_v49  ;;  %v496_v60 = vsel %vm3532_vm2, %v491_v56, %v495_v51  ;;  %v682_v62 = vld [vmem:[%s3507_s18 + $0x4] sm:$0x1]  ;;  %v3361_v46 = vld [vmem:[%s3945_s1 + $0x130] sm:$0xff]   ;;  %v2639_v50 = vcombine.low %v735_v42, %v739_v43  ;;  %v3364_v56 = vld [vmem:[%s3945_s1 + $0x168] sm:$0xff]  }
  0x30   : > { %3137 = vmatprep.subr.bf16.mxu1 %v3342_v4  ;;  %3083 = vmatprep.mubr.bf16.mxu0 %v3349_v7  ;;  %v3354_v7 = vld [vmem:[%s3945_s1 + $0xc8] sm:$0xff]   ;;  %v3366_v58 = vld [vmem:[%s3507_s18 + $0x38] ss:$8 sps:$4 sm:$0xff]   ;;  %v2732_v43 = vld [vmem:[%s3507_s18 + $0x14] sm:$0x1] }
  0x31   : > { %3107 = vmatprep.mubr.bf16.mxu1 %v2603_v52  ;;  %v3365_v51 = vld [vmem:[%s3507_s18 + $0x28] ss:$8 sps:$4 sm:$0xff]   ;;  %v3369_v61 = vld [vmem:[%s3945_s1 + $0x118] sm:$0xff]   ;;  %v2730_v32 = vld [vmem:[%s3507_s18 + $0xc] sm:$0x1] }
  0x32   : > { %3114 = vmatpush3.bf16.msra.mxu0 %v3341_v2  ;;  %v684_v2 = vld [vmem:[%s3507_s18 + $0xc] sm:$0x1] }
  0x33   : > { %3138 = vmatpush3.bf16.msra.mxu1 %v3342_v4  ;;  %3115 = vmatprep.subr.bf16.mxu0 %v3343_v5  ;;  %v718_v4 = vrot.slane %v682_v62, 5  ;;  %v722_v8 = vrot.slane %v684_v2, 5  ;;  %v3370_v62 = vld [vmem:[%s3945_s1 + $0x158] sm:$0xff]   ;;  %v2687_v2 = vld [vmem:[%s3507_s18 + $0x10] sm:$0xf] }
  0x34   : > { %3139 = vmatprep.subr.bf16.mxu1 %v3344_v6 }
  0x35   : > { %3084 = vmatmul.mubr.bf16.gmra.mxu0 %v3350_v22  ;;  %v719_v11 = vsel %vm3594_vm5, %v2613_v3, %v718_v4  ;;  %v3356_v22 = vld [vmem:[%s3945_s1 + $0xc0] sm:$0xff]   ;;  %v2688_v3 = vld [vmem:[%s3507_s18 + $0x14] sm:$0x1] }
  0x36   : > { %3116 = vmatpush3.bf16.msra.mxu0 %v3343_v5  ;;  %v2614_v5 = vrot.slane %v683_v63, 9  ;;  %v2685_v63 = vld [vmem:[%s3507_s18 + $0x8] sm:$0xf]  ;;  %v1145_v10 = vshll.u32 %v2688_v3, 16 }
  0x37   : > { %3140 = vmatpush3.bf16.msra.mxu1 %v3344_v6  ;;  %3117 = vmatprep.subr.bf16.mxu0 %v3345_v14  ;;  %v2604_v6 = vcombine.low %v496_v60, %v510_v0  ;;  %v3368_v60 = vld [vmem:[%s3945_s1 + $0x160] sm:$0xff]   ;;  %v2686_v0 = vld [vmem:[%s3507_s18 + $0xc] sm:$0x1]  ;;  %v1122_v4 = vshrl.u32 %v2685_v63, 16 }
  0x38   : > { %3141 = vmatprep.subr.bf16.mxu1 %v3346_v19  ;;  %v723_v17 = vsel %vm3594_vm5, %v2614_v5, %v722_v8  ;;  %v1125_v5 = vshll.u32 %v2685_v63, 16  ;;  %v1136_v8 = vshrl.u32 %v2687_v2, 16  ;;  %v2736_v63 = vld [vmem:[%s3507_s18 + $0x24] sm:$0x1] }
  0x39   : > { %3108 = vmatmul.mubr.bf16.gmra.mxu1 %v2604_v6  ;;  %v2637_v20 = vcombine.low %v719_v11, %v723_v17  ;;  %v3372_v6 = vld [vmem:[%s3945_s1 + $0x150] sm:$0xff]   ;;  %v2689_v11 = vld [vmem:[%s3507_s18 + $0x18] sm:$0xf]  ;;  %v1124_v12 = vrot.slane %v1122_v4, 4 }
  0x3a   : > { %3118 = vmatpush3.bf16.msra.mxu0 %v3345_v14  ;;  %v2615_v14 = vrot.slane %v685_v9, 9  ;;  %3151 = vmatprep.mubr.bf16.mxu1 %v3357_v21  ;;  %v1139_v9 = vshll.u32 %v2687_v2, 16  ;;  %v1138_v17 = vrot.slane %v1136_v8, 4  ;;  %v3373_v21 = vld [vmem:[%s3945_s1 + $0x108] sm:$0xff]  }
  0x3b   : > { %3142 = vmatpush3.bf16.msra.mxu1 %v3346_v19  ;;  %3119 = vmatprep.subr.bf16.mxu0 %v3347_v41  ;;  %v730_v19 = vrot.slane %v688_v13, 5  ;;  %v1127_v13 = vrot.slane %v1125_v5, 5 }
  0x3c   : > { %3143 = vmatprep.subr.bf16.mxu1 %v3348_v45  ;;  %3127 = vmatprep.mubr.bf16.mxu0 %v2637_v20  ;;  %v727_v24 = vsel %vm3594_vm5, %v2615_v14, %v726_v15  ;;  %v2690_v14 = vld [vmem:[%s3507_s18 + $0x1c] sm:$0x1]  ;;  %v2691_v15 = vld [vmem:[%s3507_s18 + $0x20] sm:$0xf]  ;;  %v2692_v20 = vld [vmem:[%s3507_s18 + $0x24] sm:$0x1] }
  0x3d   : > { %v731_v25 = vsel %vm3594_vm5, %v2616_v18, %v730_v19  ;;  %v1141_v18 = vrot.slane %v1139_v9, 5  ;;  %v1147_v19 = vrot.slane %v1145_v10, 5  ;;  %v1164_v29 = vshrl.u32 %v2691_v15, 16  ;;  %v2693_v10 = vld [vmem:[%s3507_s18 + $0x28] sm:$0xf] }
  0x3e   : > { %3120 = vmatpush3.bf16.msra.mxu0 %v3347_v41  ;;  %v2638_v37 = vcombine.low %v727_v24, %v731_v25  ;;  %v696_v41 = vld [vmem:[%s3507_s18 + $0x3c] sm:$0x1]  ;;  %v1153_v24 = vshll.u32 %v2689_v11, 16  ;;  %v1159_v25 = vshll.u32 %v2690_v14, 16  ;;  %v1167_v30 = vshll.u32 %v2691_v15, 16 }
  0x3f   : > { %3144 = vmatpush3.bf16.msra.mxu1 %v3348_v45  ;;  %3121 = vmatprep.subr.bf16.mxu0 %v3351_v57  ;;  %v742_v45 = vrot.slane %v694_v38, 5  ;;  %v746_v49 = vrot.slane %v696_v41, 5  ;;  %v1142_v28 = vor.u32 %v1141_v18, %v1138_v17  ;;  %v1166_v39 = vrot.slane %v1164_v29, 4  ;;  %v2696_v15 = vld [vmem:[%s3507_s18 + $0x34] sm:$0x1] }
  0x40   : > { %3145 = vmatprep.subr.bf16.mxu1 %v3352_v59  ;;  %v1155_v35 = vrot.slane %v1153_v24, 5  ;;  %v1161_v36 = vrot.slane %v1159_v25, 5  ;;  %v1169_v41 = vrot.slane %v1167_v30, 5  ;;  %v1181_v17 = vshll.u32 %v2693_v10, 16  ;;  %v2697_v24 = vld [vmem:[%s3507_s18 + $0x38] sm:$0xf] }
  0x41   : > { %v743_v52 = vsel %vm3594_vm5, %v2619_v44, %v742_v45  ;;  %v747_v53 = vsel %vm3594_vm5, %v2620_v48, %v746_v49  ;;  %v1143_v38 = vrot.slane %v1142_v28, 4  ;;  %v3375_v44 = vld [vmem:[%s3945_s1 + $0x100] sm:$0xff]   ;;  %v1437_v48 = vrot.slane %v2730_v32, 5  ;;  %v2698_v28 = vld [vmem:[%s3507_s18 + $0x3c] sm:$0x1] }
  0x42   : > { %3122 = vmatpush3.bf16.msra.mxu0 %v3351_v57  ;;  %v2640_v57 = vcombine.low %v743_v52, %v747_v53  ;;  %v1441_v52 = vrot.slane %v2732_v43, 5  ;;  %v3376_v53 = vld [vmem:[%s3945_s1 + $0x140] sm:$0xff]   ;;  %v1206_v29 = vshrl.u32 %v2697_v24, 16 }
  0x43   : > { %3146 = vmatpush3.bf16.msra.mxu1 %v3352_v59  ;;  %3123 = vmatprep.subr.bf16.mxu0 %v3353_v1  ;;  %v3367_v59 = vld [vmem:[%s3945_s1 + $0x120] sm:$0xff]   ;;  %v1148_v49 = vsel %vm3532_vm2, %v1143_v38, %v1147_v19 }
  0x44   : > { %3147 = vmatprep.subr.bf16.mxu1 %v3354_v7  ;;  %v1208_v38 = vrot.slane %v1206_v29, 4  ;;  %v3389_v29 = vld [vmem:[%s3945_s1 + $0x188] sm:$0xff]  }
  0x46   : > { %3124 = vmatpush3.bf16.msra.mxu0 %v3353_v1  ;;  %v3371_v1 = vld [vmem:[%s3945_s1 + $0x110] sm:$0xff]  }
  0x47   : > { %3148 = vmatpush3.bf16.msra.mxu1 %v3354_v7  ;;  %3125 = vmatprep.subr.bf16.mxu0 %v3355_v16  ;;  %v1131_v7 = vshll.u32 %v2686_v0, 16 }
  0x48   : > { %3149 = vmatprep.subr.bf16.mxu1 %v3356_v22 }
  0x4a   : > { %3126 = vmatpush3.bf16.msra.mxu0 %v3355_v16  ;;  %v1133_v16 = vrot.slane %v1131_v7, 5  ;;  %v1449_v7 = vrot.slane %v2736_v63, 5  ;;  %v2740_v63 = vld [vmem:[%s3507_s18 + $0x34] sm:$0x1] }
  0x4b   : > { %3150 = vmatpush3.bf16.msra.mxu1 %v3356_v22  ;;  %3159 = vmatprep.subr.bf16.mxu0 %v3358_v23  ;;  %v1128_v22 = vor.u32 %v1127_v13, %v1124_v12  ;;  %v2695_v12 = vld [vmem:[%s3507_s18 + $0x30] sm:$0xf]  ;;  %v3378_v13 = vld [vmem:[%s3945_s1 + $0x1f8] sm:$0xff]  }
  0x4c   : > { %3183 = vmatprep.subr.bf16.mxu1 %v3359_v26 }
  0x4d   : > { %3128 = vmatmul.mubr.bf16.vlgmr.msra.gmra.mxu0 %v2638_v37  ;;  %v1129_v33 = vrot.slane %v1128_v22, 4  ;;  %v2731_v37 = vld [vmem:[%s3507_s18 + $0x10] sm:$0xe]  ;;  %v1195_v22 = vshll.u32 %v2695_v12, 16 }
  0x4e   : > { %3152 = vmatmul.mubr.bf16.vlgmr.msra.gmra.mxu1 %v3360_v31  ;;  %3160 = vmatpush3.bf16.msra.mxu0 %v3358_v23  ;;  %v1150_v23 = vshrl.u32 %v2689_v11, 16  ;;  %v1173_v31 = vshll.u32 %v2692_v20, 16  ;;  %v2694_v11 = vld [vmem:[%s3507_s18 + $0x2c] sm:$0x1]  ;;  %v3379_v20 = vld [vmem:[%s3945_s1 + $0x1b0] sm:$0xff]  }
  0x4f   : > { %3184 = vmatpush3.bf16.msra.mxu1 %v3359_v26  ;;  %3161 = vmatprep.subr.bf16.mxu0 %v3361_v46  ;;  %v2729_v26 = vld [vmem:[%s3507_s18 + $0x8] sm:$0xe]  ;;  %v1134_v45 = vsel %vm3532_vm2, %v1129_v33, %v1133_v16  ;;  %v1178_v16 = vshrl.u32 %v2693_v10, 16  ;;  %v1187_v18 = vshll.u32 %v2694_v11, 16  ;;  %v2699_v33 = vld [vmem:[%s3507_s18 + $0x40] sm:$0xf] }
  0x50   : > { %3185 = vmatprep.subr.bf16.mxu1 %v3362_v47  ;;  %3131 = vmatprep.mubr.bf16.mxu0 %v2639_v50  ;;  %v1152_v34 = vrot.slane %v1150_v23, 4  ;;  %v1175_v42 = vrot.slane %v1173_v31, 5  ;;  %v1170_v50 = vor.u32 %v1169_v41, %v1166_v39  ;;  %v1201_v23 = vshll.u32 %v2696_v15, 16  ;;  %v2743_v10 = vld [vmem:[%s3507_s18 + $0x40] sm:$0xe] }
  0x51   : > { %3155 = vmatprep.mubr.bf16.mxu1 %v3365_v51  ;;  %v2746_v51 = vrot.slane %v2731_v37, 9  ;;  %v1180_v25 = vrot.slane %v1178_v16, 4  ;;  %v1197_v31 = vrot.slane %v1195_v22, 5  ;;  %v2700_v37 = vld [vmem:[%s3507_s18 + $0x44] sm:$0x1]  ;;  %v1215_v39 = vshll.u32 %v2698_v28, 16 }
  0x52   : > { %3162 = vmatpush3.bf16.msra.mxu0 %v3361_v46  ;;  %v1156_v46 = vor.u32 %v1155_v35, %v1152_v34  ;;  %v1203_v32 = vrot.slane %v1201_v23, 5  ;;  %v1209_v34 = vshll.u32 %v2697_v24, 16  ;;  %v3380_v35 = vld [vmem:[%s3945_s1 + $0x1f0] sm:$0xff]   ;;  %v1220_v41 = vshrl.u32 %v2699_v33, 16  ;;  %v2744_v15 = vld [vmem:[%s3507_s18 + $0x44] sm:$0x1] }
  0x53   : > { %3186 = vmatpush3.bf16.msra.mxu1 %v3362_v47  ;;  %3163 = vmatprep.subr.bf16.mxu0 %v3363_v54  ;;  %v2745_v47 = vrot.slane %v2729_v26, 9  ;;  %v1183_v26 = vrot.slane %v1181_v17, 5  ;;  %v2752_v17 = vrot.slane %v2743_v10, 9  ;;  %v3386_v24 = vld [vmem:[%s3945_s1 + $0x1d8] sm:$0xff]   ;;  %v3388_v28 = vld [vmem:[%s3945_s1 + $0x1d0] sm:$0xff]  }
  0x54   : > { %3187 = vmatprep.subr.bf16.mxu1 %v3364_v56  ;;  %v1211_v43 = vrot.slane %v1209_v34, 5  ;;  %v2819_v34 = vld [vmem:[%s3507_s18 + $0x18] sm:$0xf] }
  0x55   : > { %3132 = vmatmul.mubr.bf16.gmra.mxu0 %v2640_v57  ;;  %v1438_v57 = vsel %vm3594_vm5, %v2745_v47, %v1437_v48  ;;  %v1217_v47 = vrot.slane %v1215_v39, 5  ;;  %v1222_v48 = vrot.slane %v1220_v41, 4  ;;  %v1855_v39 = vshrl.u32 %v2819_v34, 16 }
  0x56   : > { %3164 = vmatpush3.bf16.msra.mxu0 %v3363_v54  ;;  %3156 = vmatmul.mubr.bf16.gmra.mxu1 %v3366_v58  ;;  %v2717_v54 = vcombine.low %v1134_v45, %v1148_v49  ;;  %v2733_v58 = vld [vmem:[%s3507_s18 + $0x18] sm:$0xe]  ;;  %v1229_v45 = vshll.u32 %v2700_v37, 16  ;;  %v3381_v49 = vld [vmem:[%s3945_s1 + $0x1a8] sm:$0xff]   ;;  %v1858_v41 = vshll.u32 %v2819_v34, 16 }
  0x57   : > { %3188 = vmatpush3.bf16.msra.mxu1 %v3364_v56  ;;  %3165 = vmatprep.subr.bf16.mxu0 %v3367_v59  ;;  %v1157_v56 = vrot.slane %v1156_v46, 4  ;;  %v2747_v0 = vrot.slane %v2733_v58, 9  ;;  %v2738_v58 = vld [vmem:[%s3507_s18 + $0x2c] sm:$0x1] }
  0x58   : > { %3189 = vmatprep.subr.bf16.mxu1 %v3368_v60  ;;  %3175 = vmatprep.mubr.bf16.mxu0 %v2717_v54  ;;  %v3382_v54 = vld [vmem:[%s3945_s1 + $0x1e8] sm:$0xff]  }
  0x5a   : > { %3166 = vmatpush3.bf16.msra.mxu0 %v3367_v59  ;;  %v2734_v59 = vld [vmem:[%s3507_s18 + $0x1c] sm:$0x1] }
  0x5b   : > { %3190 = vmatpush3.bf16.msra.mxu1 %v3368_v60  ;;  %3167 = vmatprep.subr.bf16.mxu0 %v3369_v61  ;;  %v1171_v60 = vrot.slane %v1170_v50, 4  ;;  %v1445_v3 = vrot.slane %v2734_v59, 5 }
  0x5c   : > { %3191 = vmatprep.subr.bf16.mxu1 %v3370_v62 }
  0x5d   : > { %v1176_v5 = vsel %vm3532_vm2, %v1171_v60, %v1175_v42  ;;  %v1446_v9 = vsel %vm3594_vm5, %v2747_v0, %v1445_v3 }
  0x5e   : > { %3168 = vmatpush3.bf16.msra.mxu0 %v3369_v61  ;;  %v1442_v61 = vsel %vm3594_vm5, %v2746_v51, %v1441_v52  ;;  %v1212_v51 = vor.u32 %v1211_v43, %v1208_v38  ;;  %v3391_v43 = vld [vmem:[%s3945_s1 + $0x180] sm:$0xff]  }
  0x5f   : > { %3192 = vmatpush3.bf16.msra.mxu1 %v3370_v62  ;;  %3169 = vmatprep.subr.bf16.mxu0 %v3371_v1  ;;  %v2735_v62 = vld [vmem:[%s3507_s18 + $0x20] sm:$0xe]  ;;  %v2769_v2 = vcombine.low %v1438_v57, %v1442_v61  ;;  %v2737_v57 = vld [vmem:[%s3507_s18 + $0x28] sm:$0xe] }
  0x60   : > { %3193 = vmatprep.subr.bf16.mxu1 %v3372_v6  ;;  %v2748_v4 = vrot.slane %v2735_v62, 9  ;;  %v1213_v60 = vrot.slane %v1212_v51, 4  ;;  %v2739_v62 = vld [vmem:[%s3507_s18 + $0x30] sm:$0xe]  ;;  %v2749_v0 = vrot.slane %v2737_v57, 9 }
  0x61   : > { %3199 = vmatprep.mubr.bf16.mxu1 %v2769_v2  ;;  %v1453_v2 = vrot.slane %v2738_v58, 5  ;;  %v2750_v3 = vrot.slane %v2739_v62, 9  ;;  %v2821_v51 = vld [vmem:[%s3507_s18 + $0x20] sm:$0xf] }
  0x62   : > { %3170 = vmatpush3.bf16.msra.mxu0 %v3371_v1  ;;  %v1162_v1 = vsel %vm3532_vm2, %v1157_v56, %v1161_v36  ;;  %v1450_v14 = vsel %vm3594_vm5, %v2748_v4, %v1449_v7  ;;  %v1184_v36 = vor.u32 %v1183_v26, %v1180_v25  ;;  %v1457_v4 = vrot.slane %v2740_v63, 5 }
  0x63   : > { %3194 = vmatpush3.bf16.msra.mxu1 %v3372_v6  ;;  %3171 = vmatprep.subr.bf16.mxu0 %v3373_v21  ;;  %v3377_v6 = vld [vmem:[%s3945_s1 + $0x1b8] sm:$0xff]   ;;  %v2718_v8 = vcombine.low %v1162_v1, %v1176_v5  ;;  %v2770_v19 = vcombine.low %v1446_v9, %v1450_v14  ;;  %v1218_v7 = vsel %vm3532_vm2, %v1213_v60, %v1217_v47  ;;  %v1869_v57 = vshrl.u32 %v2821_v51, 16 }
  0x64   : > { %3195 = vmatprep.subr.bf16.mxu1 %v3374_v27  ;;  %v1185_v46 = vrot.slane %v1184_v36, 4  ;;  %v2741_v5 = vld [vmem:[%s3507_s18 + $0x38] sm:$0xe]  ;;  %v2742_v9 = vld [vmem:[%s3507_s18 + $0x3c] sm:$0x1]  ;;  %v1458_v14 = vsel %vm3594_vm5, %v2750_v3, %v1457_v4  ;;  %v1872_v58 = vshll.u32 %v2821_v51, 16 }
  0x65   : > { %v2751_v11 = vrot.slane %v2741_v5, 9  ;;  %v1461_v16 = vrot.slane %v2742_v9, 5  ;;  %v3395_v4 = vld [vmem:[%s3945_s1 + $0x238] sm:$0xff]  }
  0x66   : > { %3172 = vmatpush3.bf16.msra.mxu0 %v3373_v21  ;;  %v1192_v21 = vshrl.u32 %v2695_v12, 16  ;;  %v3384_v12 = vld [vmem:[%s3945_s1 + $0x1e0] sm:$0xff]  }
  0x67   : > { %3196 = vmatpush3.bf16.msra.mxu1 %v3374_v27  ;;  %3173 = vmatprep.subr.bf16.mxu0 %v3375_v44  ;;  %v1189_v27 = vrot.slane %v1187_v18, 5  ;;  %v1462_v23 = vsel %vm3594_vm5, %v2751_v11, %v1461_v16 }
  0x68   : > { %3197 = vmatprep.subr.bf16.mxu1 %v3376_v53  ;;  %v1194_v30 = vrot.slane %v1192_v21, 4  ;;  %v3385_v21 = vld [vmem:[%s3945_s1 + $0x198] sm:$0xff]  }
  0x69   : > { %v1190_v56 = vsel %vm3532_vm2, %v1185_v46, %v1189_v27  ;;  %v3387_v27 = vld [vmem:[%s3945_s1 + $0x190] sm:$0xff]  }
  0x6a   : > { %3174 = vmatpush3.bf16.msra.mxu0 %v3375_v44  ;;  %v1198_v42 = vor.u32 %v1197_v31, %v1194_v30  ;;  %v1223_v44 = vshll.u32 %v2699_v33, 16  ;;  %v3393_v30 = vld [vmem:[%s3507_s18 + $0x10] ss:$8 sps:$4 sm:$0xff]   ;;  %v3390_v31 = vld [vmem:[%s3945_s1 + $0x1c8] sm:$0xff]   ;;  %v2818_v33 = vld [vmem:[%s3507_s18 + $0x14] sm:$0x1] }
  0x6b   : > { %3198 = vmatpush3.bf16.msra.mxu1 %v3376_v53  ;;  %3207 = vmatprep.subr.bf16.mxu0 %v3377_v6  ;;  %v1231_v53 = vrot.slane %v1229_v45, 5  ;;  %v1850_v38 = vshll.u32 %v2818_v33, 16 }
  0x6c   : > { %3231 = vmatprep.subr.bf16.mxu1 %v3378_v13  ;;  %v1199_v50 = vrot.slane %v1198_v42, 4  ;;  %v1225_v52 = vrot.slane %v1223_v44, 5  ;;  %v3392_v44 = vld [vmem:[%s3945_s1 + $0x1c0] sm:$0xff]  }
  0x6d   : > { %3176 = vmatmul.mubr.bf16.vlgmr.msra.gmra.mxu0 %v2718_v8  ;;  %v1852_v47 = vrot.slane %v1850_v38, 5 }
  0x6e   : > { %3200 = vmatmul.mubr.bf16.vlgmr.msra.gmra.mxu1 %v2770_v19  ;;  %3208 = vmatpush3.bf16.msra.mxu0 %v3377_v6  ;;  %v1204_v59 = vsel %vm3532_vm2, %v1199_v50, %v1203_v32  ;;  %v1226_v61 = vor.u32 %v1225_v52, %v1222_v48  ;;  %v3383_v6 = vld [vmem:[%s3945_s1 + $0x1a0] sm:$0xff]   ;;  %v2817_v32 = vld [vmem:[%s3507_s18 + $0x10] sm:$0xf]  ;;  %v1857_v48 = vrot.slane %v1855_v39, 4 }
  0x6f   : > { %3232 = vmatpush3.bf16.msra.mxu1 %v3378_v13  ;;  %3209 = vmatprep.subr.bf16.mxu0 %v3379_v20  ;;  %v2719_v1 = vcombine.low %v1190_v56, %v1204_v59  ;;  %v1454_v13 = vsel %vm3594_vm5, %v2749_v0, %v1453_v2  ;;  %v1841_v36 = vshrl.u32 %v2817_v32, 16  ;;  %v1844_v37 = vshll.u32 %v2817_v32, 16  ;;  %v2822_v52 = vld [vmem:[%s3507_s18 + $0x24] sm:$0x1]  ;;  %v2824_v56 = vld [vmem:[%s3507_s18 + $0x2c] sm:$0x1] }
  0x70   : > { %3233 = vmatprep.subr.bf16.mxu1 %v3380_v35  ;;  %v1227_v8 = vrot.slane %v1226_v61, 4  ;;  %v2771_v19 = vcombine.low %v1454_v13, %v1458_v14  ;;  %v1878_v60 = vshll.u32 %v2822_v52, 16  ;;  %v1871_v0 = vrot.slane %v1869_v57, 4  ;;  %v3397_v14 = vld [vmem:[%s3507_s18 + $0x30] ss:$8 sps:$4 sm:$0xff]   ;;  %v3399_v32 = vld [vmem:[%s3945_s1 + $0x228] sm:$0xff]  }
  0x71   : > { %3179 = vmatprep.mubr.bf16.mxu0 %v2719_v1  ;;  %v1843_v45 = vrot.slane %v1841_v36, 4  ;;  %v1846_v46 = vrot.slane %v1844_v37, 5  ;;  %v1874_v1 = vrot.slane %v1872_v58, 5  ;;  %v1892_v2 = vshll.u32 %v2824_v56, 16  ;;  %v2830_v36 = vld [vmem:[%s3507_s18 + $0x44] sm:$0x1] }
  0x72   : > { %3210 = vmatpush3.bf16.msra.mxu0 %v3379_v20  ;;  %v1232_v18 = vsel %vm3532_vm2, %v1227_v8, %v1231_v53  ;;  %v1465_v20 = vrot.slane %v2744_v15, 5  ;;  %3203 = vmatprep.mubr.bf16.mxu1 %v2771_v19  ;;  %v1880_v10 = vrot.slane %v1878_v60, 5  ;;  %v2825_v19 = vld [vmem:[%s3507_s18 + $0x30] sm:$0xf]  ;;  %v3398_v37 = vld [vmem:[%s3507_s18 + $0x40] ss:$8 sps:$4 sm:$0xff]  }
  0x73   : > { %3234 = vmatpush3.bf16.msra.mxu1 %v3380_v35  ;;  %3211 = vmatprep.subr.bf16.mxu0 %v3381_v49  ;;  %v2720_v22 = vcombine.low %v1218_v7, %v1232_v18  ;;  %v2820_v35 = vld [vmem:[%s3507_s18 + $0x1c] sm:$0x1]  ;;  %v1847_v53 = vor.u32 %v1846_v46, %v1843_v45  ;;  %v3394_v7 = vld [vmem:[%s3507_s18 + $0x20] ss:$8 sps:$4 sm:$0xff]   ;;  %v1875_v9 = vor.u32 %v1874_v1, %v1871_v0  ;;  %v1894_v11 = vrot.slane %v1892_v2, 5  ;;  %v3396_v18 = vld [vmem:[%s3945_s1 + $0x230] sm:$0xff]  }
  0x74   : > { %3235 = vmatprep.subr.bf16.mxu1 %v3382_v54  ;;  %v1466_v25 = vsel %vm3594_vm5, %v2752_v17, %v1465_v20  ;;  %v1864_v42 = vshll.u32 %v2820_v35, 16  ;;  %v2826_v20 = vld [vmem:[%s3507_s18 + $0x34] sm:$0x1]  ;;  %v2832_v46 = vld [vmem:[%s3507_s18 + $0x4c] sm:$0x1]  ;;  %v3400_v60 = vld [vmem:[%s3945_s1 + $0x220] sm:$0xff]  }
  0x75   : > { %3180 = vmatmul.mubr.bf16.gmra.mxu0 %v2720_v22  ;;  %v2772_v26 = vcombine.low %v1462_v23, %v1466_v25  ;;  %v1848_v63 = vrot.slane %v1847_v53, 4  ;;  %v1876_v16 = vrot.slane %v1875_v9, 4  ;;  %v2827_v22 = vld [vmem:[%s3507_s18 + $0x38] sm:$0xf]  ;;  %v2828_v23 = vld [vmem:[%s3507_s18 + $0x3c] sm:$0x1] }
  0x76   : > { %3212 = vmatpush3.bf16.msra.mxu0 %v3381_v49  ;;  %3223 = vmatprep.mubr.bf16.mxu0 %v3393_v30  ;;  %v1860_v49 = vrot.slane %v1858_v41, 5  ;;  %v1866_v50 = vrot.slane %v1864_v42, 5  ;;  %v1900_v25 = vshll.u32 %v2825_v19, 16  ;;  %v2829_v30 = vld [vmem:[%s3507_s18 + $0x40] sm:$0xf]  ;;  %v1920_v35 = vshll.u32 %v2828_v23, 16 }
  0x77   : > { %3236 = vmatpush3.bf16.msra.mxu1 %v3382_v54  ;;  %3213 = vmatprep.subr.bf16.mxu0 %v3383_v6  ;;  %v2823_v54 = vld [vmem:[%s3507_s18 + $0x28] sm:$0xf]  ;;  %v1853_v8 = vsel %vm3532_vm2, %v1848_v63, %v1852_v47  ;;  %v1928_v47 = vshll.u32 %v2829_v30, 16  ;;  %v1948_v56 = vshll.u32 %v2832_v46, 16  ;;  %v3404_v46 = vld [vmem:[%s3945_s1 + $0x200] sm:$0xff]  }
  0x78   : > { %3237 = vmatprep.subr.bf16.mxu1 %v3384_v12  ;;  %3204 = vmatmul.mubr.bf16.gmra.mxu1 %v2772_v26  ;;  %v1861_v59 = vor.u32 %v1860_v49, %v1857_v48  ;;  %v1883_v61 = vshrl.u32 %v2823_v54, 16  ;;  %v1886_v62 = vshll.u32 %v2823_v54, 16  ;;  %v1902_v34 = vrot.slane %v1900_v25, 5  ;;  %v2831_v42 = vld [vmem:[%s3507_s18 + $0x48] sm:$0xf] }
  0x79   : > { %v1922_v45 = vrot.slane %v1920_v35, 5  ;;  %v1934_v48 = vshll.u32 %v2830_v36, 16  ;;  %v1939_v51 = vshrl.u32 %v2831_v42, 16  ;;  %v1942_v52 = vshll.u32 %v2831_v42, 16  ;;  %v2868_v35 = vld [vmem:[%s3507_s18 + $0x2c] sm:$0x1] }
  0x7a   : > { %3214 = vmatpush3.bf16.msra.mxu0 %v3383_v6  ;;  %v1862_v3 = vrot.slane %v1861_v59, 4  ;;  %v1885_v5 = vrot.slane %v1883_v61, 4  ;;  %v1888_v6 = vrot.slane %v1886_v62, 5  ;;  %v1930_v54 = vrot.slane %v1928_v47, 5  ;;  %v3403_v36 = vld [vmem:[%s3945_s1 + $0x208] sm:$0xff]  }
  0x7b   : > { %3238 = vmatpush3.bf16.msra.mxu1 %v3384_v12  ;;  %3215 = vmatprep.subr.bf16.mxu0 %v3385_v21  ;;  %v1941_v58 = vrot.slane %v1939_v51, 4  ;;  %v1944_v59 = vrot.slane %v1942_v52, 5  ;;  %v1936_v63 = vrot.slane %v1934_v48, 5  ;;  %v1950_v0 = vrot.slane %v1948_v56, 5  ;;  %v2873_v42 = vld [vmem:[%s3507_s18 + $0x40] sm:$0xe] }
  0x7c   : > { %3239 = vmatprep.subr.bf16.mxu1 %v3386_v24  ;;  %v1867_v12 = vsel %vm3532_vm2, %v1862_v3, %v1866_v50  ;;  %v1889_v13 = vor.u32 %v1888_v6, %v1885_v5  ;;  %v3401_v6 = vld [vmem:[%s3945_s1 + $0x218] sm:$0xff]   ;;  %v2883_v47 = vrot.slane %v2873_v42, 9 }
  0x7d   : > { %v2849_v15 = vcombine.low %v1853_v8, %v1867_v12  ;;  %v1945_v2 = vor.u32 %v1944_v59, %v1941_v58  ;;  %v2862_v8 = vld [vmem:[%s3507_s18 + $0x14] sm:$0x1] }
  0x7e   : > { %3216 = vmatpush3.bf16.msra.mxu0 %v3385_v21  ;;  %v1890_v17 = vrot.slane %v1889_v13, 4  ;;  %v1881_v21 = vsel %vm3532_vm2, %v1876_v16, %v1880_v10  ;;  %v2863_v10 = vld [vmem:[%s3507_s18 + $0x18] sm:$0xe]  ;;  %v2156_v13 = vrot.slane %v2862_v8, 5 }
  0x7f   : > { %3240 = vmatpush3.bf16.msra.mxu1 %v3386_v24  ;;  %3217 = vmatprep.subr.bf16.mxu0 %v3387_v27  ;;  %v1897_v24 = vshrl.u32 %v2825_v19, 16  ;;  %v1946_v5 = vrot.slane %v1945_v2, 4 }
  0x80   : > { %3241 = vmatprep.subr.bf16.mxu1 %v3388_v28  ;;  %3247 = vmatprep.mubr.bf16.mxu1 %v2849_v15  ;;  %v1895_v26 = vsel %vm3532_vm2, %v1890_v17, %v1894_v11  ;;  %v2864_v11 = vld [vmem:[%s3507_s18 + $0x1c] sm:$0x1]  ;;  %v2878_v15 = vrot.slane %v2863_v10, 9  ;;  %v2869_v17 = vld [vmem:[%s3507_s18 + $0x30] sm:$0xe] }
  0x81   : > { %v1899_v33 = vrot.slane %v1897_v24, 4  ;;  %v2160_v16 = vrot.slane %v2864_v11, 5  ;;  %v2881_v23 = vrot.slane %v2869_v17, 9 }
  0x82   : > { %3218 = vmatpush3.bf16.msra.mxu0 %v3387_v27  ;;  %v1906_v27 = vshll.u32 %v2826_v20, 16 }
  0x83   : > { %3242 = vmatpush3.bf16.msra.mxu1 %v3388_v28  ;;  %3219 = vmatprep.subr.bf16.mxu0 %v3389_v29  ;;  %v1911_v28 = vshrl.u32 %v2827_v22, 16  ;;  %v2161_v25 = vsel %vm3594_vm5, %v2878_v15, %v2160_v16 }
  0x84   : > { %3243 = vmatprep.subr.bf16.mxu1 %v3390_v31  ;;  %v1908_v38 = vrot.slane %v1906_v27, 5 }
  0x85   : > { %v1913_v39 = vrot.slane %v1911_v28, 4 }
  0x86   : > { %3220 = vmatpush3.bf16.msra.mxu0 %v3389_v29  ;;  %v1914_v29 = vshll.u32 %v2827_v22, 16  ;;  %v2872_v22 = vld [vmem:[%s3507_s18 + $0x3c] sm:$0x1] }
  0x87   : > { %3244 = vmatpush3.bf16.msra.mxu1 %v3390_v31  ;;  %3221 = vmatprep.subr.bf16.mxu0 %v3391_v43  ;;  %v2850_v31 = vcombine.low %v1881_v21, %v1895_v26  ;;  %v2871_v21 = vld [vmem:[%s3507_s18 + $0x38] sm:$0xe]  ;;  %v2176_v27 = vrot.slane %v2872_v22, 5 }
  0x88   : > { %3245 = vmatprep.subr.bf16.mxu1 %v3392_v44  ;;  %v1916_v41 = vrot.slane %v1914_v29, 5  ;;  %v2882_v26 = vrot.slane %v2871_v21, 9 }
  0x8a   : > { %3222 = vmatpush3.bf16.msra.mxu0 %v3391_v43  ;;  %v1925_v43 = vshrl.u32 %v2829_v30, 16  ;;  %v1917_v49 = vor.u32 %v1916_v41, %v1913_v39  ;;  %v2177_v30 = vsel %vm3594_vm5, %v2882_v26, %v2176_v27  ;;  %v2168_v41 = vrot.slane %v2868_v35, 5 }
  0x8b   : > { %3246 = vmatpush3.bf16.msra.mxu1 %v3392_v44  ;;  %3255 = vmatprep.subr.bf16.mxu0 %v3395_v4  ;;  %v1903_v44 = vor.u32 %v1902_v34, %v1899_v33  ;;  %v2866_v33 = vld [vmem:[%s3507_s18 + $0x24] sm:$0x1]  ;;  %v2867_v34 = vld [vmem:[%s3507_s18 + $0x28] sm:$0xe] }
  0x8c   : > { %3279 = vmatprep.subr.bf16.mxu1 %v3395_v4  ;;  %v1927_v50 = vrot.slane %v1925_v43, 4  ;;  %v1918_v57 = vrot.slane %v1917_v49, 4  ;;  %v2880_v39 = vrot.slane %v2867_v34, 9  ;;  %v2874_v43 = vld [vmem:[%s3507_s18 + $0x44] sm:$0x1] }
  0x8d   : > { %3224 = vmatmul.mubr.bf16.vlgmr.msra.gmra.mxu0 %v3394_v7  ;;  %v1904_v53 = vrot.slane %v1903_v44, 4  ;;  %v2861_v7 = vld [vmem:[%s3507_s18 + $0x10] sm:$0xe]  ;;  %v2875_v44 = vld [vmem:[%s3507_s18 + $0x48] sm:$0xe]  ;;  %v2180_v48 = vrot.slane %v2874_v43, 5 }
  0x8e   : > { %3256 = vmatpush3.bf16.msra.mxu0 %v3395_v4  ;;  %3227 = vmatprep.mubr.bf16.mxu0 %v3397_v14  ;;  %v1931_v62 = vor.u32 %v1930_v54, %v1927_v50  ;;  %v1923_v1 = vsel %vm3532_vm2, %v1918_v57, %v1922_v45  ;;  %v2877_v12 = vrot.slane %v2861_v7, 9  ;;  %v1951_v14 = vsel %vm3532_vm2, %v1946_v5, %v1950_v0  ;;  %v2876_v45 = vld [vmem:[%s3507_s18 + $0x4c] sm:$0x1] }
  0x8f   : > { %3257 = vmatprep.subr.bf16.mxu0 %v3396_v18  ;;  %3248 = vmatmul.mubr.bf16.vlgmr.msra.gmra.mxu1 %v2850_v31  ;;  %v1909_v61 = vsel %vm3532_vm2, %v1904_v53, %v1908_v38  ;;  %v2865_v31 = vld [vmem:[%s3507_s18 + $0x20] sm:$0xe]  ;;  %v2164_v38 = vrot.slane %v2866_v33, 5  ;;  %v2884_v49 = vrot.slane %v2875_v44, 9  ;;  %v2184_v50 = vrot.slane %v2876_v45, 5 }
  0x90   : > { %3287 = vmatpush3.bf16.msra.mxu1 %v3395_v4  ;;  %v2851_v3 = vcombine.low %v1909_v61, %v1923_v1  ;;  %v1932_v4 = vrot.slane %v1931_v62, 4  ;;  %v2157_v20 = vsel %vm3594_vm5, %v2877_v12, %v2156_v13  ;;  %v2169_v52 = vsel %vm3594_vm5, %v2880_v39, %v2168_v41 }
  0x91   : > { %3280 = vmatprep.subr.bf16.mxu1 %v3396_v18  ;;  %v2901_v28 = vcombine.low %v2157_v20, %v2161_v25  ;;  %v2181_v54 = vsel %vm3594_vm5, %v2883_v47, %v2180_v48  ;;  %v2185_v56 = vsel %vm3594_vm5, %v2884_v49, %v2184_v50 }
  0x92   : > { %3258 = vmatpush3.bf16.msra.mxu0 %v3396_v18  ;;  %3251 = vmatprep.mubr.bf16.mxu1 %v2851_v3  ;;  %v1937_v9 = vsel %vm3532_vm2, %v1932_v4, %v1936_v63  ;;  %v2904_v57 = vcombine.low %v2181_v54, %v2185_v56 }
  0x93   : > { %3259 = vmatprep.subr.bf16.mxu0 %v3399_v32  ;;  %v2852_v19 = vcombine.low %v1937_v9, %v1951_v14 }
  0x94   : > { %3288 = vmatpush3.bf16.msra.mxu1 %v3396_v18  ;;  %v2870_v18 = vld [vmem:[%s3507_s18 + $0x34] sm:$0x1]  ;;  %s2572_s18 = sshll.u32 %s3965_s12, 1 }
  0x95   : > { %3228 = vmatmul.mubr.bf16.gmra.mxu0 %v3398_v37  ;;  %3281 = vmatprep.subr.bf16.mxu1 %v3399_v32  ;;  %v2172_v24 = vrot.slane %v2870_v18, 5  ;;  %v2879_v37 = vrot.slane %v2865_v31, 9  ;;  %s3912_s6 = scalar_lea.vmem %s3947_s3, %s2572_s18 }
  0x96   : > { %3260 = vmatpush3.bf16.msra.mxu0 %v3399_v32  ;;  %3271 = vmatprep.mubr.bf16.mxu0 %v2901_v28  ;;  %210 = vst [vmem:[%s3912_s6] sm:$0x3] %v3429_v55 }
  0x97   : > { %3261 = vmatprep.subr.bf16.mxu0 %v3400_v60  ;;  %3252 = vmatmul.mubr.bf16.gmra.mxu1 %v2852_v19  ;;  %v2173_v29 = vsel %vm3594_vm5, %v2881_v23, %v2172_v24  ;;  %v2165_v51 = vsel %vm3594_vm5, %v2879_v37, %v2164_v38 }
  0x98   : > { %3289 = vmatpush3.bf16.msra.mxu1 %v3399_v32  ;;  %v2903_v32 = vcombine.low %v2173_v29, %v2177_v30  ;;  %v2902_v53 = vcombine.low %v2165_v51, %v2169_v52 }
  0x99   : > { %3282 = vmatprep.subr.bf16.mxu1 %v3400_v60 }
  0x9a   : > { %3262 = vmatpush3.bf16.msra.mxu0 %v3400_v60  ;;  %3275 = vmatprep.mubr.bf16.mxu1 %v2903_v32 }
  0x9b   : > { %3263 = vmatprep.subr.bf16.mxu0 %v3401_v6 }
  0x9c   : > { %3290 = vmatpush3.bf16.msra.mxu1 %v3400_v60 }
  0x9d   : > { %3283 = vmatprep.subr.bf16.mxu1 %v3401_v6 }
  0x9e   : > { %3264 = vmatpush3.bf16.msra.mxu0 %v3401_v6 }
  0x9f   : > { %3265 = vmatprep.subr.bf16.mxu0 %v3402_v40 }
  0xa0   : > { %3291 = vmatpush3.bf16.msra.mxu1 %v3401_v6 }
  0xa1   : > { %3284 = vmatprep.subr.bf16.mxu1 %v3402_v40 }
  0xa2   : > { %3266 = vmatpush3.bf16.msra.mxu0 %v3402_v40 }
  0xa3   : > { %3267 = vmatprep.subr.bf16.mxu0 %v3403_v36 }
  0xa4   : > { %3292 = vmatpush3.bf16.msra.mxu1 %v3402_v40 }
  0xa5   : > { %3285 = vmatprep.subr.bf16.mxu1 %v3403_v36 }
  0xa6   : > { %3268 = vmatpush3.bf16.msra.mxu0 %v3403_v36 }
  0xa7   : > { %3269 = vmatprep.subr.bf16.mxu0 %v3404_v46 }
  0xa8   : > { %3293 = vmatpush3.bf16.msra.mxu1 %v3403_v36 }
  0xa9   : > { %3286 = vmatprep.subr.bf16.mxu1 %v3404_v46 }
  0xaa   : > { %3270 = vmatpush3.bf16.msra.mxu0 %v3404_v46 }
  0xac   : > { %3294 = vmatpush3.bf16.msra.mxu1 %v3404_v46 }
  0xad   : > { %3272 = vmatmul.mubr.bf16.vlgmr.msra.gmra.mxu0 %v2902_v53 }
  0xaf   : > { %3276 = vmatmul.mubr.bf16.vlgmr.msra.gmra.mxu1 %v2904_v57 }
  0xed   : > { %v3081_v58 = vpop.f32.mrf.mxu0 }
  0xee   : > { %v3105_v59 = vpop.f32.mrf.mxu1 }
  0xef   : > { %v341_v60 = vpop.f32.mrf.mxu0  ;;  %v667_v49 = vadd.f32 %v3105_v59, %v3081_v58 }
  0xf0   : > { %v626_v61 = vpop.f32.mrf.mxu1 }
  0xf1   : > { %v3082_v62 = vpop.f32.mrf.mxu0  ;;  %v665_v53 = vadd.f32 %v626_v61, %v341_v60 }
  0xf2   : > { %v3106_v63 = vpop.f32.mrf.mxu1 }
  0xf3   : > { %v344_v0 = vpop.f32.mrf.mxu0  ;;  %v668_v50 = vadd.f32 %v3106_v63, %v3082_v62 }
  0xf4   : > { %v629_v2 = vpop.f32.mrf.mxu1 }
  0xf5   : > { %v3085_v1 = vpop.f32.mrf.mxu0  ;;  %v666_v54 = vadd.f32 %v629_v2, %v344_v0 }
  0xf7   : > { %v357_v4 = vpop.f32.mrf.mxu0 }
  0xf9   : > { %v3109_v3 = vpop.f32.mrf.mxu1  ;;  %v3086_v6 = vpop.f32.mrf.mxu0 }
  0xfa   : > { %v671_v55 = vadd.f32 %v3109_v3, %v3085_v1 }
  0xfb   : > { %v642_v5 = vpop.f32.mrf.mxu1  ;;  %v360_v8 = vpop.f32.mrf.mxu0 }
  0xfc   : > { %v669_v59 = vadd.f32 %v642_v5, %v357_v4 }
  0xfd   : > { %v3110_v7 = vpop.f32.mrf.mxu1 }
  0xff   : > { %v645_v10 = vpop.f32.mrf.mxu1 }
 0x100   : > { %v670_v62 = vadd.f32 %v645_v10, %v360_v8 }
 0x10d   : > { %v3129_v9 = vpop.f32.mrf.mxu0 }
 0x10e   : > { %v3153_v11 = vpop.f32.mrf.mxu1  ;;  %v904_v56 = vadd.f32 %v3129_v9, %v667_v49 }
 0x10f   : > { %v863_v12 = vpop.f32.mrf.mxu0 }
 0x110   : > { %v1050_v13 = vpop.f32.mrf.mxu1  ;;  %v1091_v61 = vadd.f32 %v3153_v11, %v904_v56 }
 0x111   : > { %v3130_v14 = vpop.f32.mrf.mxu0 }
 0x112   : > { %v3154_v15 = vpop.f32.mrf.mxu1  ;;  %v905_v57 = vadd.f32 %v3130_v14, %v668_v50 }
 0x113   : > { %v866_v16 = vpop.f32.mrf.mxu0 }
 0x114   : > { %v1053_v17 = vpop.f32.mrf.mxu1  ;;  %v1092_v0 = vadd.f32 %v3154_v15, %v905_v57 }
 0x115   : > { %v3133_v18 = vpop.f32.mrf.mxu0 }
 0x116   : > { %v3157_v19 = vpop.f32.mrf.mxu1  ;;  %v908_v63 = vadd.f32 %v3133_v18, %v671_v55 }
 0x117   : > { %v879_v20 = vpop.f32.mrf.mxu0 }
 0x118   : > { %v1066_v21 = vpop.f32.mrf.mxu1  ;;  %v906_v2 = vadd.f32 %v879_v20, %v669_v59 }
 0x119   : > { %v3134_v22 = vpop.f32.mrf.mxu0 }
 0x11a   : > { %v3158_v23 = vpop.f32.mrf.mxu1 }
 0x11b   : > { %v882_v24 = vpop.f32.mrf.mxu0 }
 0x11c   : > { %v1069_v25 = vpop.f32.mrf.mxu1  ;;  %v907_v9 = vadd.f32 %v882_v24, %v670_v62 }
 0x11e   : > { %v1094_v4 = vadd.f32 %v1069_v25, %v907_v9 }
 0x12d   : > { %v3177_v40 = vpop.f32.mrf.mxu0 }
 0x12e   : > { %v3201_v26 = vpop.f32.mrf.mxu1  ;;  %v1389_v50 = vadd.f32 %v3177_v40, %v1091_v61 }
 0x12f   : > { %v1348_v27 = vpop.f32.mrf.mxu0 }
 0x130   : > { %v1582_v28 = vpop.f32.mrf.mxu1  ;;  %v1623_v10 = vadd.f32 %v3201_v26, %v1389_v50 }
 0x131   : > { %v3178_v29 = vpop.f32.mrf.mxu0 }
 0x132   : > { %v3202_v30 = vpop.f32.mrf.mxu1  ;;  %v1390_v1 = vadd.f32 %v3178_v29, %v1092_v0 }
 0x133   : > { %v1351_v31 = vpop.f32.mrf.mxu0 }
 0x134   : > { %v1585_v32 = vpop.f32.mrf.mxu1  ;;  %v1624_v18 = vadd.f32 %v3202_v30, %v1390_v1 }
 0x135   : > { %v3181_v33 = vpop.f32.mrf.mxu0 }
 0x137   : > { %v1364_v35 = vpop.f32.mrf.mxu0 }
 0x138   : > { %v3205_v34 = vpop.f32.mrf.mxu1 }
 0x139   : > { %v3182_v37 = vpop.f32.mrf.mxu0 }
 0x13a   : > { %v3915_v36 = vpop.f32.mrf.mxu1 }
 0x13b   : > { %3952 = vst [vmem:[#allocation3_spill] sm:$0xff] %v3915_v36  ;;  %v1367_v39 = vpop.f32.mrf.mxu0  ;;  %v672_v36 = vadd.f32 %v3110_v7, %v3086_v6  ;;  %v1095_v6 = vadd.f32 %v3157_v19, %v908_v63 }
 0x13c   : > { %v3206_v38 = vpop.f32.mrf.mxu1  ;;  %v1392_v20 = vadd.f32 %v1367_v39, %v1094_v4 }
 0x13d   : > { %v1393_v5 = vadd.f32 %v3181_v33, %v1095_v6 }
 0x13e   : > { %v1601_v42 = vpop.f32.mrf.mxu1 }
 0x13f   : > { %v1627_v19 = vadd.f32 %v3205_v34, %v1393_v5 }
 0x142   : > { %v3956_v25 = vld [vmem:[#allocation3_spill] sm:$0xff] }
 0x14d   : > { %v3225_v41 = vpop.f32.mrf.mxu0 }
 0x14e   : > { %v1810_v24 = vadd.f32 %v3225_v41, %v1623_v10 }
 0x14f   : > { %v3917_v43 = vpop.f32.mrf.mxu1  ;;  %v1769_v44 = vpop.f32.mrf.mxu0 }
 0x150   : > { %3953 = vst [vmem:[#allocation4_spill] sm:$0xff] %v3917_v43  ;;  %v902_v43 = vadd.f32 %v863_v12, %v665_v53 }
 0x151   : > { %v3919_v45 = vpop.f32.mrf.mxu1  ;;  %v3226_v46 = vpop.f32.mrf.mxu0 }
 0x152   : > { %3954 = vst [vmem:[#allocation5_spill] sm:$0xff] %v3919_v45  ;;  %v903_v45 = vadd.f32 %v866_v16, %v666_v54  ;;  %v1089_v49 = vadd.f32 %v1050_v13, %v902_v43  ;;  %v1093_v54 = vadd.f32 %v1066_v21, %v906_v2  ;;  %v1811_v40 = vadd.f32 %v3226_v46, %v1624_v18 }
 0x153   : > { %v3250_v47 = vpop.f32.mrf.mxu1  ;;  %v1772_v48 = vpop.f32.mrf.mxu0 }
 0x154   : > { %v1090_v14 = vadd.f32 %v1053_v17, %v903_v45  ;;  %v1387_v53 = vadd.f32 %v1348_v27, %v1089_v49  ;;  %v1391_v15 = vadd.f32 %v1364_v35, %v1093_v54  ;;  %v2109_v43 = vadd.f32 %v3250_v47, %v1811_v40 }
 0x155   : > { %v3921_v51 = vpop.f32.mrf.mxu1  ;;  %v3229_v52 = vpop.f32.mrf.mxu0 }
 0x156   : > { %3955 = vst [vmem:[#allocation6_spill] sm:$0xff] %v3921_v51  ;;  %v909_v51 = vadd.f32 %v3134_v22, %v672_v36  ;;  %v1388_v16 = vadd.f32 %v1351_v31, %v1090_v14  ;;  %v1621_v13 = vadd.f32 %v1582_v28, %v1387_v53  ;;  %v1625_v33 = vadd.f32 %v3956_v25, %v1391_v15 }
 0x157   : > { %v3253_v58 = vpop.f32.mrf.mxu1  ;;  %v1785_v60 = vpop.f32.mrf.mxu0  ;;  %v1626_v36 = vadd.f32 %v1601_v42, %v1392_v20  ;;  %v1814_v26 = vadd.f32 %v3229_v52, %v1627_v19  ;;  %v3957_v35 = vld [vmem:[#allocation4_spill] sm:$0xff] }
 0x158   : > { %v1096_v7 = vadd.f32 %v3158_v23, %v909_v51  ;;  %v1622_v17 = vadd.f32 %v1585_v32, %v1388_v16  ;;  %v1808_v27 = vadd.f32 %v1769_v44, %v1621_v13  ;;  %v2108_v39 = vadd.f32 %v3957_v35, %v1810_v24 }
 0x159   : > { %v2083_v3 = vpop.f32.mrf.mxu1  ;;  %v3230_v12 = vpop.f32.mrf.mxu0  ;;  %v1812_v32 = vadd.f32 %v1785_v60, %v1625_v33  ;;  %v3958_v34 = vld [vmem:[#allocation5_spill] sm:$0xff]  ;;  %v2112_v57 = vadd.f32 %v3253_v58, %v1814_v26 }
 0x15a   : > { %v1394_v8 = vadd.f32 %v3182_v37, %v1096_v7  ;;  %v1809_v31 = vadd.f32 %v1772_v48, %v1622_v17 }
 0x15b   : > { %v3254_v11 = vpop.f32.mrf.mxu1  ;;  %v1788_v22 = vpop.f32.mrf.mxu0  ;;  %v2110_v63 = vadd.f32 %v2083_v3, %v1812_v32 }
 0x15c   : > { %v1628_v23 = vadd.f32 %v3206_v38, %v1394_v8  ;;  %v1813_v41 = vadd.f32 %v1788_v22, %v1626_v36  ;;  %v2106_v38 = vadd.f32 %v3958_v34, %v1808_v27 }
 0x15d   : > { %v2086_v21 = vpop.f32.mrf.mxu1  ;;  %v3959_v46 = vld [vmem:[#allocation6_spill] sm:$0xff] }
 0x15e   : > { %v1815_v30 = vadd.f32 %v3230_v12, %v1628_v23  ;;  %v2107_v44 = vadd.f32 %v3959_v46, %v1809_v31  ;;  %v2111_v60 = vadd.f32 %v2086_v21, %v1813_v41  ;;  %v2428_v46 = vld [vmem:[%s3912_s6 + $0x1] sm:$0x1] }
 0x160   : > { %v2113_v42 = vadd.f32 %v3254_v11, %v1815_v30 }
 0x16d   : > { %v3273_v29 = vpop.f32.mrf.mxu0 }
 0x16e   : > { %v2342_v48 = vadd.f32 %v3273_v29, %v2108_v39 }
 0x16f   : > { %v2301_v37 = vpop.f32.mrf.mxu0  ;;  %v3277_v28 = vpop.f32.mrf.mxu1 }
 0x170   : > { %v2340_v47 = vadd.f32 %v2301_v37, %v2106_v38  ;;  %v2346_v61 = vadd.f32 %v3277_v28, %v2112_v57 }
 0x171   : > { %v3274_v45 = vpop.f32.mrf.mxu0  ;;  %v2317_v51 = vpop.f32.mrf.mxu1 }
 0x172   : > { %v2343_v56 = vadd.f32 %v3274_v45, %v2109_v43  ;;  %v2344_v49 = vadd.f32 %v2317_v51, %v2110_v63  ;;  %v2412_v45 = vld [vmem:[%s3912_s6] sm:$0x1] }
 0x173   : > { %v2304_v52 = vpop.f32.mrf.mxu0  ;;  %v3278_v59 = vpop.f32.mrf.mxu1 }
 0x174   : > { %v2365_v55 = vpack.c.bf16 %v2343_v56, %v2342_v48  ;;  %v2341_v62 = vadd.f32 %v2304_v52, %v2107_v44  ;;  %v2347_v0 = vadd.f32 %v3278_v59, %v2113_v42 }
 0x175   : > { %v2320_v9 = vpop.f32.mrf.mxu1 }
 0x176   : > { %2952 = vst [vmem:[%s199_s10 + $0x8] sm:$0xff] %v2365_v55   ;;  %v2364_v2 = vpack.c.bf16 %v2341_v62, %v2340_v47  ;;  %v2367_v14 = vpack.c.bf16 %v2347_v0, %v2346_v61  ;;  %v2345_v58 = vadd.f32 %v2320_v9, %v2111_v60  ;;  %v2406_v50 = vunpack.c.l.bf16 %v2365_v55 }
 0x177   : > { %v2407_v12 = vunpack.c.h.bf16 %v2365_v55 }
 0x178   : > { %2936 = vst [vmem:[%s199_s10] sm:$0xff] %v2364_v2   ;;  %v2404_v1 = vunpack.c.l.bf16 %v2364_v2  ;;  %v2405_v6 = vunpack.c.h.bf16 %v2364_v2  ;;  %2954 = vst [vmem:[%s199_s10 + $0x18] sm:$0xff] %v2367_v14   ;;  %v2366_v7 = vpack.c.bf16 %v2345_v58, %v2344_v49  ;;  %v2431_v3 = vmul.f32 %v2406_v50, %v2406_v50 }
 0x179   : > { %v2432_v10 = vmul.f32 %v2407_v12, %v2407_v12  ;;  %v2410_v20 = vunpack.c.l.bf16 %v2367_v14  ;;  %v2411_v24 = vunpack.c.h.bf16 %v2367_v14 }
 0x17a   : > { %v2413_v53 = vadd.f32 %v2405_v6, %v2404_v1  ;;  %v2429_v16 = vmul.f32 %v2404_v1, %v2404_v1  ;;  %v2430_v54 = vmul.f32 %v2405_v6, %v2405_v6  ;;  %2953 = vst [vmem:[%s199_s10 + $0x10] sm:$0xff] %v2366_v7   ;;  %v2408_v8 = vunpack.c.l.bf16 %v2366_v7 }
 0x17b   : > { %v2409_v11 = vunpack.c.h.bf16 %v2366_v7  ;;  %v2435_v29 = vmul.f32 %v2410_v20, %v2410_v20  ;;  %v2436_v21 = vmul.f32 %v2411_v24, %v2411_v24 }
 0x17c   : > { %v2414_v4 = vadd.f32 %v2413_v53, %v2406_v50  ;;  %v2437_v5 = vadd.f32 %v2430_v54, %v2429_v16  ;;  %v2433_v13 = vmul.f32 %v2408_v8, %v2408_v8 }
 0x17d   : > { %v2434_v19 = vmul.f32 %v2409_v11, %v2409_v11 }
 0x17e   : > { %v2438_v18 = vadd.f32 %v2437_v5, %v2431_v3  ;;  %v2415_v15 = vadd.f32 %v2414_v4, %v2407_v12 }
 0x180   : > { %v2416_v22 = vadd.f32 %v2415_v15, %v2408_v8  ;;  %v2439_v17 = vadd.f32 %v2438_v18, %v2432_v10 }
 0x182   : > { %v2417_v40 = vadd.f32 %v2416_v22, %v2409_v11  ;;  %v2440_v23 = vadd.f32 %v2439_v17, %v2433_v13 }
 0x184   : > { %v2418_v27 = vadd.f32 %v2417_v40, %v2410_v20  ;;  %v2441_v31 = vadd.f32 %v2440_v23, %v2434_v19 }
 0x186   : > { %v2419_v25 = vadd.f32 %v2418_v27, %v2411_v24  ;;  %v2442_v33 = vadd.f32 %v2441_v31, %v2435_v29 }
 0x188   : > { %v2420_v36 = vrot.slane %v2419_v25, 4  ;;  %v2443_v26 = vadd.f32 %v2442_v33, %v2436_v21 }
 0x18a   : > { %v2421_v30 = vadd.f32 %v2420_v36, %v2419_v25  ;;  %v2444_v37 = vrot.slane %v2443_v26, 4 }
 0x18c   : > { %v2422_v35 = vrot.slane %v2421_v30, 2  ;;  %v2445_v39 = vadd.f32 %v2444_v37, %v2443_v26 }
 0x18e   : > { %v2423_v43 = vadd.f32 %v2422_v35, %v2421_v30  ;;  %v2446_v28 = vrot.slane %v2445_v39, 2 }
 0x190   : > { %v2424_v32 = vrot.slane %v2423_v43, 1  ;;  %v2447_v41 = vadd.f32 %v2446_v28, %v2445_v39 }
 0x192   : > { %v2425_v34 = vadd.f32 %v2424_v32, %v2423_v43  ;;  %v2448_v38 = vrot.slane %v2447_v41, 1 }
 0x194   : > { %v2426_v44 = vadd.f32 %v2425_v34, %v2412_v45  ;;  %v2449_v48 = vadd.f32 %v2448_v38, %v2447_v41 }
 0x196   : > { %2427 = vst [vmem:[%s3912_s6] sm:$0x1] %v2426_v44  ;;  %v2450_v51 = vadd.f32 %v2449_v48, %v2428_v46 }
 0x198   : > { %2451 = vst [vmem:[%s3912_s6 + $0x1] sm:$0x1] %v2450_v51 }
 0x199 PF: > { %s14_s14 = sadd.s32 1, %s3427_s14   ;;  %s3960_s12 = smov %s3423_s13 }
 0x19a   : > { %p11_p5 = scmp.ge.s32.totalorder %s14_s14, 4   ;;  %s3961_s13 = smov %s3963_s15 }
 0x19c   :  { %13 = sbr.rel (!%p11_p5) target bundleno = 2 (0x2), region = 84 }

</bundles_post_ra>
